<compile_context>
chip_gen: v7x
topology: tpu7x:2x2x1
jax: 0.10.0
libtpu: 0.0.40
codegen_flags: <defaults>
</compile_context>

<pallas_src>
import jax
import jax.numpy as jnp
from jax.experimental import pallas as pl
from jax.experimental.pallas import tpu as pltpu

# ---------------- config (small, synthetic) ----------------
B, S, D, H, LAYERS = 2, 8, 32, 4, 2          # batch, seq, width, heads, layers
DH = D // H
MLP = 4 * D
PROJ = 16                                     # text projection dim
PROJ_PAD = 128                                # lane-dense padded projection dim
N_CTX = 2                                     # MaPLe compound-prompt length
EPS = 1e-5
NEG = -1e30                                   # fp32 mask fill (must stay fp32)


def _full(shape):
    """Full-array block; index_map ignores grid index + scalar-prefetch refs."""
    n = len(shape)
    return pl.BlockSpec(shape, lambda *args, n=n: (0,) * n)


def _ln(x, g, b):
    mu = jnp.mean(x, axis=-1, keepdims=True)
    var = jnp.mean((x - mu) ** 2, axis=-1, keepdims=True)
    return (x - mu) * jax.lax.rsqrt(var + EPS) * g + b


def _bf16(x):
    return x.astype(jnp.bfloat16)


# ---------------- fused Pallas kernel ----------------
def text_encoder_kernel(eot_ref,                                   # SMEM scalar prefetch: (B,) EOT idx
                        texts_ref, pos_ref, ctx_ref,
                        ln1g_ref, ln1b_ref, wqkv_ref, bqkv_ref, wo_ref, bo_ref,
                        ln2g_ref, ln2b_ref, w1_ref, b1_ref, w2_ref, b2_ref,
                        lnfg_ref, lnfb_ref, proj_ref,
                        xh_ref, xfull_ref):
    n_prompts = ctx_ref.shape[0]
    scale = 1.0 / (DH ** 0.5)

    # Causal mask built in-kernel (no (S, S) input DMA), fp32.
    q_ids = jax.lax.broadcasted_iota(jnp.int32, (S, S), 0)
    k_ids = jax.lax.broadcasted_iota(jnp.int32, (S, S), 1)
    mask = jnp.where(k_ids > q_ids, jnp.float32(NEG), jnp.float32(0.0))      # (S, S)

    # MaPLe splice selector: sequence rows [1, 1 + N_CTX)
    row = jax.lax.broadcasted_iota(jnp.int32, (S, 1), 0)
    in_ctx = jnp.logical_and(row >= 1, row < 1 + N_CTX)                      # (S, 1)

    # texts + positional embedding (PyTorch permute(1,0,2) round-trip is a layout no-op).
    x = texts_ref[...] + pos_ref[...]                                        # (B, S, D) fp32

    counter = 0
    for l in range(LAYERS):                    # static unroll; all weights resident in VMEM
        if l > 0 and counter < n_prompts:
            # In-kernel compound-prompt splice: replace rows 1 .. 1+N_CTX.
            x = jnp.where(in_ctx[None], ctx_ref[counter][None], x)
            counter += 1

        # ---- pre-LN multi-head causal self-attention ----
        xn = _ln(x, ln1g_ref[l], ln1b_ref[l])                                # (B, S, D) fp32
        xn_f = xn.reshape(B * S, D)

        # ONE fused, lane-dense QKV matmul per layer (bf16 operands, fp32 accumulate).
        qkv = jnp.dot(_bf16(xn_f), wqkv_ref[l],
                      preferred_element_type=jnp.float32) + bqkv_ref[l]      # (B*S, 3D) fp32
        q = qkv[:, 0 * D:1 * D].reshape(B, S, D)
        k = qkv[:, 1 * D:2 * D].reshape(B, S, D)
        v = qkv[:, 2 * D:3 * D].reshape(B, S, D)

        head_ctx = []
        for h in range(H):                     # static heads; heads stay packed in the lane axis
            sl = slice(h * DH, (h + 1) * DH)
            q_h, k_h, v_h = _bf16(q[:, :, sl]), _bf16(k[:, :, sl]), _bf16(v[:, :, sl])
            s = jnp.einsum('bqd,bkd->bqk', q_h, k_h,
                           preferred_element_type=jnp.float32) * scale + mask[None]
            s = s - jnp.max(s, axis=-1, keepdims=True)                       # fp32 softmax
            p = jnp.exp(s)
            p = p * pl.reciprocal(jnp.sum(p, axis=-1, keepdims=True), approx=True)
            head_ctx.append(jnp.einsum('bqk,bkd->bqd', _bf16(p), v_h,
                                       preferred_element_type=jnp.float32))  # (B, S, DH)
        o = jnp.concatenate(head_ctx, axis=-1).reshape(B * S, D)             # (B*S, D) fp32
        # Single full-D output projection (fills the MXU contraction dim).
        attn = jnp.dot(_bf16(o), wo_ref[l],
                       preferred_element_type=jnp.float32) + bo_ref[l]
        x = x + attn.reshape(B, S, D)

        # ---- pre-LN MLP with QuickGELU (elementwise fp32, matmul operands bf16) ----
        xn2 = _ln(x, ln2g_ref[l], ln2b_ref[l]).reshape(B * S, D)
        h1 = jnp.dot(_bf16(xn2), w1_ref[l],
                     preferred_element_type=jnp.float32) + b1_ref[l]
        h1 = h1 * jax.nn.sigmoid(1.702 * h1)                                 # QuickGELU
        h2 = jnp.dot(_bf16(h1), w2_ref[l],
                     preferred_element_type=jnp.float32) + b2_ref[l]
        x = x + h2.reshape(B, S, D)

    # ---- final LayerNorm (fp32) ----
    x = _ln(x, lnfg_ref[0], lnfb_ref[0])
    xfull_ref[...] = x
    # TODO(synk): at real sizes keep D a multiple of 128 so this store is unmasked.

    # ---- EOT gather: scalar-addressed dynamic row read from the output ref ----
    rows = []
    for b in range(B):                          # static B; SMEM index -> dynamic sublane read
        rows.append(xfull_ref[b, pl.ds(eot_ref[b], 1), :])                   # (1, D)
    x_eot = jnp.concatenate(rows, axis=0)                                    # (B, D) fp32

    # Lane-dense (B, 128) projection store; host slices back to PROJ.
    xh_ref[...] = jnp.dot(_bf16(x_eot), proj_ref[...],
                          preferred_element_type=jnp.float32)


# ---------------- host-side packing (free, one-time) ----------------
def pack_params(params):
    L = params['layers']
    f32, bf16 = jnp.float32, jnp.bfloat16
    stack = lambda name, dt=f32: jnp.stack([lp[name] for lp in L]).astype(dt)
    # Fused, lane-dense QKV weight/bias: (L, D, 3D) bf16, (L, 3D) fp32.
    wqkv = jnp.stack([jnp.concatenate([lp['w_q'], lp['w_k'], lp['w_v']], axis=1)
                      for lp in L]).astype(bf16)
    bqkv = jnp.stack([jnp.concatenate([lp['b_q'], lp['b_k'], lp['b_v']])
                      for lp in L]).astype(f32)
    # Zero-padded, lane-dense text projection: (D, 128) bf16.
    proj_pad = jnp.zeros((D, PROJ_PAD), f32).at[:, :PROJ].set(
        params['text_projection']).astype(bf16)
    return {
        'ln1_g': stack('ln1_g'), 'ln1_b': stack('ln1_b'),
        'wqkv': wqkv, 'bqkv': bqkv,
        'wo': stack('w_out', bf16), 'bo': stack('b_out'),
        'ln2_g': stack('ln2_g'), 'ln2_b': stack('ln2_b'),
        'w1': stack('w_fc1', bf16), 'b1': stack('b_fc1'),
        'w2': stack('w_fc2', bf16), 'b2': stack('b_fc2'),
        'lnf_g': params['lnf_g'].reshape(1, D),
        'lnf_b': params['lnf_b'].reshape(1, D),
        'proj': proj_pad,
    }


def pack_prompts(compound_prompts_text):
    # Place each compound prompt at rows [1, 1 + N_CTX) of an (S, D) slab.
    slabs = []
    for p in compound_prompts_text:
        slabs.append(jnp.zeros((S, D), jnp.float32).at[1:1 + N_CTX].set(p))
    return jnp.stack(slabs)                                        # (n_prompts, S, D)


# ---------------- fused wrapper ----------------
def text_encoder_forward(texts, tokens, compound_prompts_text, params):
    kp = pack_params(params)
    ctx = pack_prompts(compound_prompts_text)
    eot = jnp.argmax(tokens[:, 0, :], axis=-1).astype(jnp.int32)   # tokens.squeeze(1).argmax(-1)

    operands = (texts, params['pos_emb'], ctx,
                kp['ln1_g'], kp['ln1_b'], kp['wqkv'], kp['bqkv'], kp['wo'], kp['bo'],
                kp['ln2_g'], kp['ln2_b'], kp['w1'], kp['b1'], kp['w2'], kp['b2'],
                kp['lnf_g'], kp['lnf_b'], kp['proj'])

    grid_spec = pltpu.PrefetchScalarGridSpec(
        num_scalar_prefetch=1,                 # EOT indices -> SMEM, read inside the kernel
        grid=(1,),                             # whole forward fused in one step (toy size)
        in_specs=[_full(op.shape) for op in operands],
        out_specs=[_full((B, PROJ_PAD)), _full((B, S, D))],
    )
    x_h_pad, x_full = pl.pallas_call(
        text_encoder_kernel,
        grid_spec=grid_spec,
        out_shape=(jax.ShapeDtypeStruct((B, PROJ_PAD), jnp.float32),
                   jax.ShapeDtypeStruct((B, S, D), jnp.float32)),
        compiler_params=pltpu.CompilerParams(
            dimension_semantics=("arbitrary",),
            vmem_limit_bytes=32 * 1024 * 1024),
    )(eot, *operands)
    return x_h_pad[:, :PROJ], x_full           # strip the lane padding on the host


# ---------------- pure-JAX reference (fp32, mirrors the PyTorch module) ----------------
def causal_mask():
    i = jnp.arange(S)
    return jnp.where(i[None, :] > i[:, None], NEG, 0.0).astype(jnp.float32)


def insert_prompt(x, prompt):
    prefix = x[:, :1]
    suffix = x[:, 1 + N_CTX:]
    ctx = jnp.broadcast_to(prompt[None], (x.shape[0], N_CTX, x.shape[2]))
    return jnp.concatenate([prefix, ctx, suffix], axis=1)


def _ref_block(x, mask, lp):
    xn = _ln(x, lp['ln1_g'], lp['ln1_b'])
    q = (xn @ lp['w_q'] + lp['b_q']).reshape(B, S, H, DH).transpose(0, 2, 1, 3)
    k = (xn @ lp['w_k'] + lp['b_k']).reshape(B, S, H, DH).transpose(0, 2, 1, 3)
    v = (xn @ lp['w_v'] + lp['b_v']).reshape(B, S, H, DH).transpose(0, 2, 1, 3)
    s = jnp.einsum('bhqd,bhkd->bhqk', q, k) / (DH ** 0.5) + mask
    p = jax.nn.softmax(s, axis=-1)
    a = jnp.einsum('bhqk,bhkd->bhqd', p, v).transpose(0, 2, 1, 3).reshape(B, S, D)
    x = x + a @ lp['w_out'] + lp['b_out']
    xn2 = _ln(x, lp['ln2_g'], lp['ln2_b'])
    h1 = xn2 @ lp['w_fc1'] + lp['b_fc1']
    h1 = h1 * jax.nn.sigmoid(1.702 * h1)
    return x + h1 @ lp['w_fc2'] + lp['b_fc2']


def ref_forward(texts, tokens, compound_prompts_text, params):
    mask = causal_mask()
    x = texts + params['pos_emb'][None]
    counter = 0
    for i in range(LAYERS):
        if i > 0 and counter < len(compound_prompts_text):
            x = insert_prompt(x, compound_prompts_text[counter])
            counter += 1
        x = _ref_block(x, mask, params['layers'][i])
    x = _ln(x, params['lnf_g'], params['lnf_b'])
    eot = jnp.argmax(tokens[:, 0, :], axis=-1)
    x_eot = jnp.take_along_axis(x, eot[:, None, None], axis=1)[:, 0]
    return x_eot @ params['text_projection'], x


# ---------------- deterministic param init ----------------
def init_params(key):
    keys = iter(jax.random.split(key, 128))

    def nrm(shape, scale=0.02):
        return (scale * jax.random.normal(next(keys), shape)).astype(jnp.float32)

    params = {
        'pos_emb': nrm((S, D), 0.01),
        'lnf_g': jnp.ones((D,), jnp.float32),
        'lnf_b': jnp.zeros((D,), jnp.float32),
        'text_projection': nrm((D, PROJ), 0.05),
        'layers': [],
    }
    for _ in range(LAYERS):
        params['layers'].append({
            'ln1_g': jnp.ones((D,), jnp.float32),
            'ln1_b': jnp.zeros((D,), jnp.float32),
            'w_q': nrm((D, D)), 'w_k': nrm((D, D)), 'w_v': nrm((D, D)),
            'b_q': jnp.zeros((D,), jnp.float32),
            'b_k': jnp.zeros((D,), jnp.float32),
            'b_v': jnp.zeros((D,), jnp.float32),
            'w_out': nrm((D, D)),
            'b_out': jnp.zeros((D,), jnp.float32),
            'ln2_g': jnp.ones((D,), jnp.float32),
            'ln2_b': jnp.zeros((D,), jnp.float32),
            'w_fc1': nrm((D, MLP)),
            'b_fc1': jnp.zeros((MLP,), jnp.float32),
            'w_fc2': nrm((MLP, D)),
            'b_fc2': jnp.zeros((D,), jnp.float32),
        })
    return params


if __name__ == "__main__":
    key = jax.random.PRNGKey(0)
    k_par, k_txt, k_tok, k_ctx = jax.random.split(key, 4)
    params = init_params(k_par)

    texts = jax.random.normal(k_txt, (B, S, D), jnp.float32)                  # prompt embeddings
    tokens = jax.random.randint(k_tok, (B, 1, S), 1, 1000, dtype=jnp.int32)   # token ids (argmax -> EOT)
    compound_prompts_text = [0.02 * jax.random.normal(k_ctx, (N_CTX, D), jnp.float32)]

    x_h, x_full = text_encoder_forward(texts, tokens, compound_prompts_text, params)
    jax.block_until_ready((x_h, x_full))

    r_h, r_full = ref_forward(texts, tokens, compound_prompts_text, params)
    assert x_h.shape == (B, PROJ) and x_full.shape == (B, S, D)
    assert bool(jnp.all(jnp.isfinite(x_h))) and bool(jnp.all(jnp.isfinite(x_full)))
    # Tolerance relaxed slightly (1e-2 -> 2e-2): matmul operands are bf16 (fp32 accumulate).
    assert jnp.allclose(x_h, r_h, atol=2e-2, rtol=2e-2)
    assert jnp.allclose(x_full, r_full, atol=2e-2, rtol=2e-2)
    print("KERNEL_OK")
</pallas_src>

<mosaic_0001>
module attributes {stable_mosaic.version = 11 : i64} {
  func.func @text_encoder_kernel(%arg0: i32, %arg1: memref<2xi32, #tpu.memory_space<smem>>, %arg2: memref<2x8x32xf32, #tpu.memory_space<vmem>>, %arg3: memref<8x32xf32, #tpu.memory_space<vmem>>, %arg4: memref<1x8x32xf32, #tpu.memory_space<vmem>>, %arg5: memref<2x32xf32, #tpu.memory_space<vmem>>, %arg6: memref<2x32xf32, #tpu.memory_space<vmem>>, %arg7: memref<2x32x96xbf16, #tpu.memory_space<vmem>>, %arg8: memref<2x96xf32, #tpu.memory_space<vmem>>, %arg9: memref<2x32x32xbf16, #tpu.memory_space<vmem>>, %arg10: memref<2x32xf32, #tpu.memory_space<vmem>>, %arg11: memref<2x32xf32, #tpu.memory_space<vmem>>, %arg12: memref<2x32xf32, #tpu.memory_space<vmem>>, %arg13: memref<2x32x128xbf16, #tpu.memory_space<vmem>>, %arg14: memref<2x128xf32, #tpu.memory_space<vmem>>, %arg15: memref<2x128x32xbf16, #tpu.memory_space<vmem>>, %arg16: memref<2x32xf32, #tpu.memory_space<vmem>>, %arg17: memref<1x32xf32, #tpu.memory_space<vmem>>, %arg18: memref<1x32xf32, #tpu.memory_space<vmem>>, %arg19: memref<32x128xbf16, #tpu.memory_space<vmem>>, %arg20: memref<2x128xf32, #tpu.memory_space<vmem>>, %arg21: memref<2x8x32xf32, #tpu.memory_space<vmem>>) attributes {dimension_semantics = [#tpu.dimension_semantics<arbitrary>], iteration_bounds = array<i64: 1>, scalar_prefetch = 1 : i64, scratch_operands = 0 : i64, tpu.core_type = #tpu.core_type<tc>, window_params = [{pipeline_mode = #tpu.pipeline_mode<synchronous>, transform_indices = @transform_0, window_bounds = array<i64: 2, 8, 32>}, {pipeline_mode = #tpu.pipeline_mode<synchronous>, transform_indices = @transform_1, window_bounds = array<i64: 8, 32>}, {pipeline_mode = #tpu.pipeline_mode<synchronous>, transform_indices = @transform_2, window_bounds = array<i64: 1, 8, 32>}, {pipeline_mode = #tpu.pipeline_mode<synchronous>, transform_indices = @transform_3, window_bounds = array<i64: 2, 32>}, {pipeline_mode = #tpu.pipeline_mode<synchronous>, transform_indices = @transform_4, window_bounds = array<i64: 2, 32>}, {pipeline_mode = #tpu.pipeline_mode<synchronous>, transform_indices = @transform_5, window_bounds = array<i64: 2, 32, 96>}, {pipeline_mode = #tpu.pipeline_mode<synchronous>, transform_indices = @transform_6, window_bounds = array<i64: 2, 96>}, {pipeline_mode = #tpu.pipeline_mode<synchronous>, transform_indices = @transform_7, window_bounds = array<i64: 2, 32, 32>}, {pipeline_mode = #tpu.pipeline_mode<synchronous>, transform_indices = @transform_8, window_bounds = array<i64: 2, 32>}, {pipeline_mode = #tpu.pipeline_mode<synchronous>, transform_indices = @transform_9, window_bounds = array<i64: 2, 32>}, {pipeline_mode = #tpu.pipeline_mode<synchronous>, transform_indices = @transform_10, window_bounds = array<i64: 2, 32>}, {pipeline_mode = #tpu.pipeline_mode<synchronous>, transform_indices = @transform_11, window_bounds = array<i64: 2, 32, 128>}, {pipeline_mode = #tpu.pipeline_mode<synchronous>, transform_indices = @transform_12, window_bounds = array<i64: 2, 128>}, {pipeline_mode = #tpu.pipeline_mode<synchronous>, transform_indices = @transform_13, window_bounds = array<i64: 2, 128, 32>}, {pipeline_mode = #tpu.pipeline_mode<synchronous>, transform_indices = @transform_14, window_bounds = array<i64: 2, 32>}, {pipeline_mode = #tpu.pipeline_mode<synchronous>, transform_indices = @transform_15, window_bounds = array<i64: 1, 32>}, {pipeline_mode = #tpu.pipeline_mode<synchronous>, transform_indices = @transform_16, window_bounds = array<i64: 1, 32>}, {pipeline_mode = #tpu.pipeline_mode<synchronous>, transform_indices = @transform_17, window_bounds = array<i64: 32, 128>}, {pipeline_mode = #tpu.pipeline_mode<synchronous>, transform_indices = @transform_18, window_bounds = array<i64: 2, 128>}, {pipeline_mode = #tpu.pipeline_mode<synchronous>, transform_indices = @transform_19, window_bounds = array<i64: 2, 8, 32>}]} {
    %0 = tpu.iota {dimensions = array<i32: 0>} : vector<8x8xi32>
    %1 = tpu.iota {dimensions = array<i32: 1>} : vector<8x8xi32>
    %2 = arith.cmpi sgt, %1, %0 : vector<8x8xi32>
    %cst = arith.constant -1.000000e+30 : f32
    %cst_0 = arith.constant 0.000000e+00 : f32
    %3 = vector.broadcast %cst : f32 to vector<8x8xf32>
    %4 = vector.broadcast %cst_0 : f32 to vector<8x8xf32>
    %5 = arith.select %2, %3, %4 : vector<8x8xi1>, vector<8x8xf32>
    %6 = tpu.iota {dimensions = array<i32: 0>} : vector<8x1xi32>
    %c1_i32 = arith.constant 1 : i32
    %7 = vector.broadcast %c1_i32 : i32 to vector<8x1xi32>
    %8 = arith.cmpi sge, %6, %7 : vector<8x1xi32>
    %c3_i32 = arith.constant 3 : i32
    %9 = vector.broadcast %c3_i32 : i32 to vector<8x1xi32>
    %10 = arith.cmpi slt, %6, %9 : vector<8x1xi32>
    %11 = arith.andi %8, %10 : vector<8x1xi1>
    %c0 = arith.constant 0 : index
    %c0_1 = arith.constant 0 : index
    %c0_2 = arith.constant 0 : index
    %12 = vector.load %arg2[%c0, %c0_1, %c0_2] : memref<2x8x32xf32, #tpu.memory_space<vmem>>, vector<2x8x32xf32>
    %c0_3 = arith.constant 0 : index
    %c0_4 = arith.constant 0 : index
    %13 = vector.load %arg3[%c0_3, %c0_4] : memref<8x32xf32, #tpu.memory_space<vmem>>, vector<8x32xf32>
    %14 = vector.shape_cast %13 : vector<8x32xf32> to vector<1x8x32xf32>
    %15 = vector.broadcast %14 : vector<1x8x32xf32> to vector<2x8x32xf32>
    %16 = arith.addf %12, %15 : vector<2x8x32xf32>
    %c0_5 = arith.constant 0 : index
    %c0_6 = arith.constant 0 : index
    %17 = vector.load %arg5[%c0_5, %c0_6] : memref<2x32xf32, #tpu.memory_space<vmem>>, vector<1x32xf32>
    %18 = vector.shape_cast %17 : vector<1x32xf32> to vector<32xf32>
    %c0_7 = arith.constant 0 : index
    %c0_8 = arith.constant 0 : index
    %19 = vector.load %arg6[%c0_7, %c0_8] : memref<2x32xf32, #tpu.memory_space<vmem>>, vector<1x32xf32>
    %20 = vector.shape_cast %19 : vector<1x32xf32> to vector<32xf32>
    %cst_9 = arith.constant dense<0.000000e+00> : vector<2x8xf32>
    %21 = vector.multi_reduction <add>, %16, %cst_9 [2] : vector<2x8x32xf32> to vector<2x8xf32>
    %22 = vector.shape_cast %21 : vector<2x8xf32> to vector<2x8x1xf32>
    %cst_10 = arith.constant 3.200000e+01 : f32
    %23 = vector.broadcast %cst_10 : f32 to vector<2x8x1xf32>
    %24 = arith.divf %22, %23 : vector<2x8x1xf32>
    %25 = vector.broadcast %24 : vector<2x8x1xf32> to vector<2x8x32xf32>
    %26 = arith.subf %16, %25 : vector<2x8x32xf32>
    %27 = arith.mulf %26, %26 : vector<2x8x32xf32>
    %cst_11 = arith.constant dense<0.000000e+00> : vector<2x8xf32>
    %28 = vector.multi_reduction <add>, %27, %cst_11 [2] : vector<2x8x32xf32> to vector<2x8xf32>
    %29 = vector.shape_cast %28 : vector<2x8xf32> to vector<2x8x1xf32>
    %cst_12 = arith.constant 3.200000e+01 : f32
    %30 = vector.broadcast %cst_12 : f32 to vector<2x8x1xf32>
    %31 = arith.divf %29, %30 : vector<2x8x1xf32>
    %32 = vector.broadcast %24 : vector<2x8x1xf32> to vector<2x8x32xf32>
    %33 = arith.subf %16, %32 : vector<2x8x32xf32>
    %cst_13 = arith.constant 9.99999974E-6 : f32
    %34 = vector.broadcast %cst_13 : f32 to vector<2x8x1xf32>
    %35 = arith.addf %31, %34 : vector<2x8x1xf32>
    %36 = math.rsqrt %35 : vector<2x8x1xf32>
    %37 = vector.broadcast %36 : vector<2x8x1xf32> to vector<2x8x32xf32>
    %38 = arith.mulf %33, %37 : vector<2x8x32xf32>
    %39 = vector.shape_cast %18 : vector<32xf32> to vector<1x1x32xf32>
    %40 = vector.broadcast %39 : vector<1x1x32xf32> to vector<2x8x32xf32>
    %41 = arith.mulf %38, %40 : vector<2x8x32xf32>
    %42 = vector.shape_cast %20 : vector<32xf32> to vector<1x1x32xf32>
    %43 = vector.broadcast %42 : vector<1x1x32xf32> to vector<2x8x32xf32>
    %44 = arith.addf %41, %43 : vector<2x8x32xf32>
    %45 = vector.shape_cast %44 : vector<2x8x32xf32> to vector<16x32xf32>
    %46 = arith.truncf %45 : vector<16x32xf32> to vector<16x32xbf16>
    %c0_14 = arith.constant 0 : index
    %c0_15 = arith.constant 0 : index
    %c0_16 = arith.constant 0 : index
    %47 = vector.load %arg7[%c0_14, %c0_15, %c0_16] : memref<2x32x96xbf16, #tpu.memory_space<vmem>>, vector<1x32x96xbf16>
    %48 = vector.shape_cast %47 : vector<1x32x96xbf16> to vector<32x96xbf16>
    %cst_17 = arith.constant dense<0.000000e+00> : vector<16x96xf32>
    %49 = tpu.matmul %46, %48, %cst_17 {dimension_numbers = #tpu.dot_dimension_numbers<[1], [0], [0], [1], [0, 0, 1, 1], [], []>} : vector<16x32xbf16>, vector<32x96xbf16>, vector<16x96xf32> -> vector<16x96xf32>
    %c0_18 = arith.constant 0 : index
    %c0_19 = arith.constant 0 : index
    %50 = vector.load %arg8[%c0_18, %c0_19] : memref<2x96xf32, #tpu.memory_space<vmem>>, vector<1x96xf32>
    %51 = vector.shape_cast %50 : vector<1x96xf32> to vector<96xf32>
    %52 = vector.shape_cast %51 : vector<96xf32> to vector<1x96xf32>
    %53 = vector.broadcast %52 : vector<1x96xf32> to vector<16x96xf32>
    %54 = arith.addf %49, %53 : vector<16x96xf32>
    %55 = vector.extract_strided_slice %54 {offsets = [0, 0], sizes = [16, 32], strides = [1, 1]} : vector<16x96xf32> to vector<16x32xf32>
    %56 = vector.shape_cast %55 : vector<16x32xf32> to vector<2x8x32xf32>
    %57 = vector.extract_strided_slice %54 {offsets = [0, 32], sizes = [16, 32], strides = [1, 1]} : vector<16x96xf32> to vector<16x32xf32>
    %58 = vector.shape_cast %57 : vector<16x32xf32> to vector<2x8x32xf32>
    %59 = vector.extract_strided_slice %54 {offsets = [0, 64], sizes = [16, 32], strides = [1, 1]} : vector<16x96xf32> to vector<16x32xf32>
    %60 = vector.shape_cast %59 : vector<16x32xf32> to vector<2x8x32xf32>
    %61 = vector.extract_strided_slice %56 {offsets = [0, 0, 0], sizes = [2, 8, 8], strides = [1, 1, 1]} : vector<2x8x32xf32> to vector<2x8x8xf32>
    %62 = arith.truncf %61 : vector<2x8x8xf32> to vector<2x8x8xbf16>
    %63 = vector.extract_strided_slice %58 {offsets = [0, 0, 0], sizes = [2, 8, 8], strides = [1, 1, 1]} : vector<2x8x32xf32> to vector<2x8x8xf32>
    %64 = arith.truncf %63 : vector<2x8x8xf32> to vector<2x8x8xbf16>
    %65 = vector.extract_strided_slice %60 {offsets = [0, 0, 0], sizes = [2, 8, 8], strides = [1, 1, 1]} : vector<2x8x32xf32> to vector<2x8x8xf32>
    %66 = arith.truncf %65 : vector<2x8x8xf32> to vector<2x8x8xbf16>
    "tpu.trace_start"() <{level = 10 : i32, message = "bqd,bkd->bqk"}> : () -> ()
    %cst_20 = arith.constant dense<0.000000e+00> : vector<2x8x8xf32>
    %67 = tpu.matmul %62, %64, %cst_20 {dimension_numbers = #tpu.dot_dimension_numbers<[2], [2], [1], [1], [0, 0, 0, 1, 1, 1], [0], [0]>} : vector<2x8x8xbf16>, vector<2x8x8xbf16>, vector<2x8x8xf32> -> vector<2x8x8xf32>
    "tpu.trace_stop"() : () -> ()
    %cst_21 = arith.constant 0.353553385 : f32
    %68 = vector.broadcast %cst_21 : f32 to vector<2x8x8xf32>
    %69 = arith.mulf %67, %68 : vector<2x8x8xf32>
    %70 = vector.shape_cast %5 : vector<8x8xf32> to vector<1x8x8xf32>
    %71 = vector.broadcast %70 : vector<1x8x8xf32> to vector<2x8x8xf32>
    %72 = arith.addf %69, %71 : vector<2x8x8xf32>
    %cst_22 = arith.constant dense<0xFF800000> : vector<2x8xf32>
    %73 = vector.multi_reduction <maximumf>, %72, %cst_22 [2] : vector<2x8x8xf32> to vector<2x8xf32>
    %74 = vector.shape_cast %73 : vector<2x8xf32> to vector<2x8x1xf32>
    %75 = vector.broadcast %74 : vector<2x8x1xf32> to vector<2x8x8xf32>
    %76 = arith.subf %72, %75 : vector<2x8x8xf32>
    %77 = math.exp %76 : vector<2x8x8xf32>
    %cst_23 = arith.constant dense<0.000000e+00> : vector<2x8xf32>
    %78 = vector.multi_reduction <add>, %77, %cst_23 [2] : vector<2x8x8xf32> to vector<2x8xf32>
    %79 = vector.shape_cast %78 : vector<2x8xf32> to vector<2x8x1xf32>
    %80 = tpu.reciprocal %79 {approx = true} : vector<2x8x1xf32> -> vector<2x8x1xf32>
    %81 = vector.broadcast %80 : vector<2x8x1xf32> to vector<2x8x8xf32>
    %82 = arith.mulf %77, %81 : vector<2x8x8xf32>
    %83 = arith.truncf %82 : vector<2x8x8xf32> to vector<2x8x8xbf16>
    "tpu.trace_start"() <{level = 10 : i32, message = "bqk,bkd->bqd"}> : () -> ()
    %cst_24 = arith.constant dense<0.000000e+00> : vector<2x8x8xf32>
    %84 = tpu.matmul %83, %66, %cst_24 {dimension_numbers = #tpu.dot_dimension_numbers<[2], [1], [1], [2], [0, 0, 0, 1, 1, 2], [0], [0]>} : vector<2x8x8xbf16>, vector<2x8x8xbf16>, vector<2x8x8xf32> -> vector<2x8x8xf32>
    "tpu.trace_stop"() : () -> ()
    %85 = vector.extract_strided_slice %56 {offsets = [0, 0, 8], sizes = [2, 8, 8], strides = [1, 1, 1]} : vector<2x8x32xf32> to vector<2x8x8xf32>
    %86 = arith.truncf %85 : vector<2x8x8xf32> to vector<2x8x8xbf16>
    %87 = vector.extract_strided_slice %58 {offsets = [0, 0, 8], sizes = [2, 8, 8], strides = [1, 1, 1]} : vector<2x8x32xf32> to vector<2x8x8xf32>
    %88 = arith.truncf %87 : vector<2x8x8xf32> to vector<2x8x8xbf16>
    %89 = vector.extract_strided_slice %60 {offsets = [0, 0, 8], sizes = [2, 8, 8], strides = [1, 1, 1]} : vector<2x8x32xf32> to vector<2x8x8xf32>
    %90 = arith.truncf %89 : vector<2x8x8xf32> to vector<2x8x8xbf16>
    "tpu.trace_start"() <{level = 10 : i32, message = "bqd,bkd->bqk"}> : () -> ()
    %cst_25 = arith.constant dense<0.000000e+00> : vector<2x8x8xf32>
    %91 = tpu.matmul %86, %88, %cst_25 {dimension_numbers = #tpu.dot_dimension_numbers<[2], [2], [1], [1], [0, 0, 0, 1, 1, 1], [0], [0]>} : vector<2x8x8xbf16>, vector<2x8x8xbf16>, vector<2x8x8xf32> -> vector<2x8x8xf32>
    "tpu.trace_stop"() : () -> ()
    %cst_26 = arith.constant 0.353553385 : f32
    %92 = vector.broadcast %cst_26 : f32 to vector<2x8x8xf32>
    %93 = arith.mulf %91, %92 : vector<2x8x8xf32>
    %94 = vector.shape_cast %5 : vector<8x8xf32> to vector<1x8x8xf32>
    %95 = vector.broadcast %94 : vector<1x8x8xf32> to vector<2x8x8xf32>
    %96 = arith.addf %93, %95 : vector<2x8x8xf32>
    %cst_27 = arith.constant dense<0xFF800000> : vector<2x8xf32>
    %97 = vector.multi_reduction <maximumf>, %96, %cst_27 [2] : vector<2x8x8xf32> to vector<2x8xf32>
    %98 = vector.shape_cast %97 : vector<2x8xf32> to vector<2x8x1xf32>
    %99 = vector.broadcast %98 : vector<2x8x1xf32> to vector<2x8x8xf32>
    %100 = arith.subf %96, %99 : vector<2x8x8xf32>
    %101 = math.exp %100 : vector<2x8x8xf32>
    %cst_28 = arith.constant dense<0.000000e+00> : vector<2x8xf32>
    %102 = vector.multi_reduction <add>, %101, %cst_28 [2] : vector<2x8x8xf32> to vector<2x8xf32>
    %103 = vector.shape_cast %102 : vector<2x8xf32> to vector<2x8x1xf32>
    %104 = tpu.reciprocal %103 {approx = true} : vector<2x8x1xf32> -> vector<2x8x1xf32>
    %105 = vector.broadcast %104 : vector<2x8x1xf32> to vector<2x8x8xf32>
    %106 = arith.mulf %101, %105 : vector<2x8x8xf32>
    %107 = arith.truncf %106 : vector<2x8x8xf32> to vector<2x8x8xbf16>
    "tpu.trace_start"() <{level = 10 : i32, message = "bqk,bkd->bqd"}> : () -> ()
    %cst_29 = arith.constant dense<0.000000e+00> : vector<2x8x8xf32>
    %108 = tpu.matmul %107, %90, %cst_29 {dimension_numbers = #tpu.dot_dimension_numbers<[2], [1], [1], [2], [0, 0, 0, 1, 1, 2], [0], [0]>} : vector<2x8x8xbf16>, vector<2x8x8xbf16>, vector<2x8x8xf32> -> vector<2x8x8xf32>
    "tpu.trace_stop"() : () -> ()
    %109 = vector.extract_strided_slice %56 {offsets = [0, 0, 16], sizes = [2, 8, 8], strides = [1, 1, 1]} : vector<2x8x32xf32> to vector<2x8x8xf32>
    %110 = arith.truncf %109 : vector<2x8x8xf32> to vector<2x8x8xbf16>
    %111 = vector.extract_strided_slice %58 {offsets = [0, 0, 16], sizes = [2, 8, 8], strides = [1, 1, 1]} : vector<2x8x32xf32> to vector<2x8x8xf32>
    %112 = arith.truncf %111 : vector<2x8x8xf32> to vector<2x8x8xbf16>
    %113 = vector.extract_strided_slice %60 {offsets = [0, 0, 16], sizes = [2, 8, 8], strides = [1, 1, 1]} : vector<2x8x32xf32> to vector<2x8x8xf32>
    %114 = arith.truncf %113 : vector<2x8x8xf32> to vector<2x8x8xbf16>
    "tpu.trace_start"() <{level = 10 : i32, message = "bqd,bkd->bqk"}> : () -> ()
    %cst_30 = arith.constant dense<0.000000e+00> : vector<2x8x8xf32>
    %115 = tpu.matmul %110, %112, %cst_30 {dimension_numbers = #tpu.dot_dimension_numbers<[2], [2], [1], [1], [0, 0, 0, 1, 1, 1], [0], [0]>} : vector<2x8x8xbf16>, vector<2x8x8xbf16>, vector<2x8x8xf32> -> vector<2x8x8xf32>
    "tpu.trace_stop"() : () -> ()
    %cst_31 = arith.constant 0.353553385 : f32
    %116 = vector.broadcast %cst_31 : f32 to vector<2x8x8xf32>
    %117 = arith.mulf %115, %116 : vector<2x8x8xf32>
    %118 = vector.shape_cast %5 : vector<8x8xf32> to vector<1x8x8xf32>
    %119 = vector.broadcast %118 : vector<1x8x8xf32> to vector<2x8x8xf32>
    %120 = arith.addf %117, %119 : vector<2x8x8xf32>
    %cst_32 = arith.constant dense<0xFF800000> : vector<2x8xf32>
    %121 = vector.multi_reduction <maximumf>, %120, %cst_32 [2] : vector<2x8x8xf32> to vector<2x8xf32>
    %122 = vector.shape_cast %121 : vector<2x8xf32> to vector<2x8x1xf32>
    %123 = vector.broadcast %122 : vector<2x8x1xf32> to vector<2x8x8xf32>
    %124 = arith.subf %120, %123 : vector<2x8x8xf32>
    %125 = math.exp %124 : vector<2x8x8xf32>
    %cst_33 = arith.constant dense<0.000000e+00> : vector<2x8xf32>
    %126 = vector.multi_reduction <add>, %125, %cst_33 [2] : vector<2x8x8xf32> to vector<2x8xf32>
    %127 = vector.shape_cast %126 : vector<2x8xf32> to vector<2x8x1xf32>
    %128 = tpu.reciprocal %127 {approx = true} : vector<2x8x1xf32> -> vector<2x8x1xf32>
    %129 = vector.broadcast %128 : vector<2x8x1xf32> to vector<2x8x8xf32>
    %130 = arith.mulf %125, %129 : vector<2x8x8xf32>
    %131 = arith.truncf %130 : vector<2x8x8xf32> to vector<2x8x8xbf16>
    "tpu.trace_start"() <{level = 10 : i32, message = "bqk,bkd->bqd"}> : () -> ()
    %cst_34 = arith.constant dense<0.000000e+00> : vector<2x8x8xf32>
    %132 = tpu.matmul %131, %114, %cst_34 {dimension_numbers = #tpu.dot_dimension_numbers<[2], [1], [1], [2], [0, 0, 0, 1, 1, 2], [0], [0]>} : vector<2x8x8xbf16>, vector<2x8x8xbf16>, vector<2x8x8xf32> -> vector<2x8x8xf32>
    "tpu.trace_stop"() : () -> ()
    %133 = vector.extract_strided_slice %56 {offsets = [0, 0, 24], sizes = [2, 8, 8], strides = [1, 1, 1]} : vector<2x8x32xf32> to vector<2x8x8xf32>
    %134 = arith.truncf %133 : vector<2x8x8xf32> to vector<2x8x8xbf16>
    %135 = vector.extract_strided_slice %58 {offsets = [0, 0, 24], sizes = [2, 8, 8], strides = [1, 1, 1]} : vector<2x8x32xf32> to vector<2x8x8xf32>
    %136 = arith.truncf %135 : vector<2x8x8xf32> to vector<2x8x8xbf16>
    %137 = vector.extract_strided_slice %60 {offsets = [0, 0, 24], sizes = [2, 8, 8], strides = [1, 1, 1]} : vector<2x8x32xf32> to vector<2x8x8xf32>
    %138 = arith.truncf %137 : vector<2x8x8xf32> to vector<2x8x8xbf16>
    "tpu.trace_start"() <{level = 10 : i32, message = "bqd,bkd->bqk"}> : () -> ()
    %cst_35 = arith.constant dense<0.000000e+00> : vector<2x8x8xf32>
    %139 = tpu.matmul %134, %136, %cst_35 {dimension_numbers = #tpu.dot_dimension_numbers<[2], [2], [1], [1], [0, 0, 0, 1, 1, 1], [0], [0]>} : vector<2x8x8xbf16>, vector<2x8x8xbf16>, vector<2x8x8xf32> -> vector<2x8x8xf32>
    "tpu.trace_stop"() : () -> ()
    %cst_36 = arith.constant 0.353553385 : f32
    %140 = vector.broadcast %cst_36 : f32 to vector<2x8x8xf32>
    %141 = arith.mulf %139, %140 : vector<2x8x8xf32>
    %142 = vector.shape_cast %5 : vector<8x8xf32> to vector<1x8x8xf32>
    %143 = vector.broadcast %142 : vector<1x8x8xf32> to vector<2x8x8xf32>
    %144 = arith.addf %141, %143 : vector<2x8x8xf32>
    %cst_37 = arith.constant dense<0xFF800000> : vector<2x8xf32>
    %145 = vector.multi_reduction <maximumf>, %144, %cst_37 [2] : vector<2x8x8xf32> to vector<2x8xf32>
    %146 = vector.shape_cast %145 : vector<2x8xf32> to vector<2x8x1xf32>
    %147 = vector.broadcast %146 : vector<2x8x1xf32> to vector<2x8x8xf32>
    %148 = arith.subf %144, %147 : vector<2x8x8xf32>
    %149 = math.exp %148 : vector<2x8x8xf32>
    %cst_38 = arith.constant dense<0.000000e+00> : vector<2x8xf32>
    %150 = vector.multi_reduction <add>, %149, %cst_38 [2] : vector<2x8x8xf32> to vector<2x8xf32>
    %151 = vector.shape_cast %150 : vector<2x8xf32> to vector<2x8x1xf32>
    %152 = tpu.reciprocal %151 {approx = true} : vector<2x8x1xf32> -> vector<2x8x1xf32>
    %153 = vector.broadcast %152 : vector<2x8x1xf32> to vector<2x8x8xf32>
    %154 = arith.mulf %149, %153 : vector<2x8x8xf32>
    %155 = arith.truncf %154 : vector<2x8x8xf32> to vector<2x8x8xbf16>
    "tpu.trace_start"() <{level = 10 : i32, message = "bqk,bkd->bqd"}> : () -> ()
    %cst_39 = arith.constant dense<0.000000e+00> : vector<2x8x8xf32>
    %156 = tpu.matmul %155, %138, %cst_39 {dimension_numbers = #tpu.dot_dimension_numbers<[2], [1], [1], [2], [0, 0, 0, 1, 1, 2], [0], [0]>} : vector<2x8x8xbf16>, vector<2x8x8xbf16>, vector<2x8x8xf32> -> vector<2x8x8xf32>
    "tpu.trace_stop"() : () -> ()
    %157 = tpu.concatenate %84, %108, %132, %156 in 2 : vector<2x8x8xf32>, vector<2x8x8xf32>, vector<2x8x8xf32>, vector<2x8x8xf32> -> vector<2x8x32xf32>
    %158 = vector.shape_cast %157 : vector<2x8x32xf32> to vector<16x32xf32>
    %159 = arith.truncf %158 : vector<16x32xf32> to vector<16x32xbf16>
    %c0_40 = arith.constant 0 : index
    %c0_41 = arith.constant 0 : index
    %c0_42 = arith.constant 0 : index
    %160 = vector.load %arg9[%c0_40, %c0_41, %c0_42] : memref<2x32x32xbf16, #tpu.memory_space<vmem>>, vector<1x32x32xbf16>
    %161 = vector.shape_cast %160 : vector<1x32x32xbf16> to vector<32x32xbf16>
    %cst_43 = arith.constant dense<0.000000e+00> : vector<16x32xf32>
    %162 = tpu.matmul %159, %161, %cst_43 {dimension_numbers = #tpu.dot_dimension_numbers<[1], [0], [0], [1], [0, 0, 1, 1], [], []>} : vector<16x32xbf16>, vector<32x32xbf16>, vector<16x32xf32> -> vector<16x32xf32>
    %c0_44 = arith.constant 0 : index
    %c0_45 = arith.constant 0 : index
    %163 = vector.load %arg10[%c0_44, %c0_45] : memref<2x32xf32, #tpu.memory_space<vmem>>, vector<1x32xf32>
    %164 = vector.shape_cast %163 : vector<1x32xf32> to vector<32xf32>
    %165 = vector.shape_cast %164 : vector<32xf32> to vector<1x32xf32>
    %166 = vector.broadcast %165 : vector<1x32xf32> to vector<16x32xf32>
    %167 = arith.addf %162, %166 : vector<16x32xf32>
    %168 = vector.shape_cast %167 : vector<16x32xf32> to vector<2x8x32xf32>
    %169 = arith.addf %16, %168 : vector<2x8x32xf32>
    %c0_46 = arith.constant 0 : index
    %c0_47 = arith.constant 0 : index
    %170 = vector.load %arg11[%c0_46, %c0_47] : memref<2x32xf32, #tpu.memory_space<vmem>>, vector<1x32xf32>
    %171 = vector.shape_cast %170 : vector<1x32xf32> to vector<32xf32>
    %c0_48 = arith.constant 0 : index
    %c0_49 = arith.constant 0 : index
    %172 = vector.load %arg12[%c0_48, %c0_49] : memref<2x32xf32, #tpu.memory_space<vmem>>, vector<1x32xf32>
    %173 = vector.shape_cast %172 : vector<1x32xf32> to vector<32xf32>
    %cst_50 = arith.constant dense<0.000000e+00> : vector<2x8xf32>
    %174 = vector.multi_reduction <add>, %169, %cst_50 [2] : vector<2x8x32xf32> to vector<2x8xf32>
    %175 = vector.shape_cast %174 : vector<2x8xf32> to vector<2x8x1xf32>
    %cst_51 = arith.constant 3.200000e+01 : f32
    %176 = vector.broadcast %cst_51 : f32 to vector<2x8x1xf32>
    %177 = arith.divf %175, %176 : vector<2x8x1xf32>
    %178 = vector.broadcast %177 : vector<2x8x1xf32> to vector<2x8x32xf32>
    %179 = arith.subf %169, %178 : vector<2x8x32xf32>
    %180 = arith.mulf %179, %179 : vector<2x8x32xf32>
    %cst_52 = arith.constant dense<0.000000e+00> : vector<2x8xf32>
    %181 = vector.multi_reduction <add>, %180, %cst_52 [2] : vector<2x8x32xf32> to vector<2x8xf32>
    %182 = vector.shape_cast %181 : vector<2x8xf32> to vector<2x8x1xf32>
    %cst_53 = arith.constant 3.200000e+01 : f32
    %183 = vector.broadcast %cst_53 : f32 to vector<2x8x1xf32>
    %184 = arith.divf %182, %183 : vector<2x8x1xf32>
    %185 = vector.broadcast %177 : vector<2x8x1xf32> to vector<2x8x32xf32>
    %186 = arith.subf %169, %185 : vector<2x8x32xf32>
    %cst_54 = arith.constant 9.99999974E-6 : f32
    %187 = vector.broadcast %cst_54 : f32 to vector<2x8x1xf32>
    %188 = arith.addf %184, %187 : vector<2x8x1xf32>
    %189 = math.rsqrt %188 : vector<2x8x1xf32>
    %190 = vector.broadcast %189 : vector<2x8x1xf32> to vector<2x8x32xf32>
    %191 = arith.mulf %186, %190 : vector<2x8x32xf32>
    %192 = vector.shape_cast %171 : vector<32xf32> to vector<1x1x32xf32>
    %193 = vector.broadcast %192 : vector<1x1x32xf32> to vector<2x8x32xf32>
    %194 = arith.mulf %191, %193 : vector<2x8x32xf32>
    %195 = vector.shape_cast %173 : vector<32xf32> to vector<1x1x32xf32>
    %196 = vector.broadcast %195 : vector<1x1x32xf32> to vector<2x8x32xf32>
    %197 = arith.addf %194, %196 : vector<2x8x32xf32>
    %198 = vector.shape_cast %197 : vector<2x8x32xf32> to vector<16x32xf32>
    %199 = arith.truncf %198 : vector<16x32xf32> to vector<16x32xbf16>
    %c0_55 = arith.constant 0 : index
    %c0_56 = arith.constant 0 : index
    %c0_57 = arith.constant 0 : index
    %200 = vector.load %arg13[%c0_55, %c0_56, %c0_57] : memref<2x32x128xbf16, #tpu.memory_space<vmem>>, vector<1x32x128xbf16>
    %201 = vector.shape_cast %200 : vector<1x32x128xbf16> to vector<32x128xbf16>
    %cst_58 = arith.constant dense<0.000000e+00> : vector<16x128xf32>
    %202 = tpu.matmul %199, %201, %cst_58 {dimension_numbers = #tpu.dot_dimension_numbers<[1], [0], [0], [1], [0, 0, 1, 1], [], []>} : vector<16x32xbf16>, vector<32x128xbf16>, vector<16x128xf32> -> vector<16x128xf32>
    %c0_59 = arith.constant 0 : index
    %c0_60 = arith.constant 0 : index
    %203 = vector.load %arg14[%c0_59, %c0_60] : memref<2x128xf32, #tpu.memory_space<vmem>>, vector<1x128xf32>
    %204 = vector.shape_cast %203 : vector<1x128xf32> to vector<128xf32>
    %205 = vector.shape_cast %204 : vector<128xf32> to vector<1x128xf32>
    %206 = vector.broadcast %205 : vector<1x128xf32> to vector<16x128xf32>
    %207 = arith.addf %202, %206 : vector<16x128xf32>
    %cst_61 = arith.constant 1.702000e+00 : f32
    %208 = vector.broadcast %cst_61 : f32 to vector<16x128xf32>
    %209 = arith.mulf %208, %207 : vector<16x128xf32>
    %210 = arith.negf %209 : vector<16x128xf32>
    %211 = math.exp %210 : vector<16x128xf32>
    %cst_62 = arith.constant 1.000000e+00 : f32
    %212 = vector.broadcast %cst_62 : f32 to vector<16x128xf32>
    %213 = arith.addf %212, %211 : vector<16x128xf32>
    %214 = arith.divf %212, %213 : vector<16x128xf32>
    %215 = arith.mulf %207, %214 : vector<16x128xf32>
    %216 = arith.truncf %215 : vector<16x128xf32> to vector<16x128xbf16>
    %c0_63 = arith.constant 0 : index
    %c0_64 = arith.constant 0 : index
    %c0_65 = arith.constant 0 : index
    %217 = vector.load %arg15[%c0_63, %c0_64, %c0_65] : memref<2x128x32xbf16, #tpu.memory_space<vmem>>, vector<1x128x32xbf16>
    %218 = vector.shape_cast %217 : vector<1x128x32xbf16> to vector<128x32xbf16>
    %cst_66 = arith.constant dense<0.000000e+00> : vector<16x32xf32>
    %219 = tpu.matmul %216, %218, %cst_66 {dimension_numbers = #tpu.dot_dimension_numbers<[1], [0], [0], [1], [0, 0, 1, 1], [], []>} : vector<16x128xbf16>, vector<128x32xbf16>, vector<16x32xf32> -> vector<16x32xf32>
    %c0_67 = arith.constant 0 : index
    %c0_68 = arith.constant 0 : index
    %220 = vector.load %arg16[%c0_67, %c0_68] : memref<2x32xf32, #tpu.memory_space<vmem>>, vector<1x32xf32>
    %221 = vector.shape_cast %220 : vector<1x32xf32> to vector<32xf32>
    %222 = vector.shape_cast %221 : vector<32xf32> to vector<1x32xf32>
    %223 = vector.broadcast %222 : vector<1x32xf32> to vector<16x32xf32>
    %224 = arith.addf %219, %223 : vector<16x32xf32>
    %225 = vector.shape_cast %224 : vector<16x32xf32> to vector<2x8x32xf32>
    %226 = arith.addf %169, %225 : vector<2x8x32xf32>
    %227 = vector.shape_cast %11 : vector<8x1xi1> to vector<1x8x1xi1>
    %c0_69 = arith.constant 0 : index
    %c0_70 = arith.constant 0 : index
    %c0_71 = arith.constant 0 : index
    %228 = vector.load %arg4[%c0_69, %c0_70, %c0_71] : memref<1x8x32xf32, #tpu.memory_space<vmem>>, vector<1x8x32xf32>
    %229 = vector.shape_cast %228 : vector<1x8x32xf32> to vector<8x32xf32>
    %230 = vector.shape_cast %229 : vector<8x32xf32> to vector<1x8x32xf32>
    %231 = vector.shape_cast %227 : vector<1x8x1xi1> to vector<1x8x1xi1>
    %232 = vector.broadcast %231 : vector<1x8x1xi1> to vector<2x8x32xi1>
    %233 = vector.shape_cast %230 : vector<1x8x32xf32> to vector<1x8x32xf32>
    %234 = vector.broadcast %233 : vector<1x8x32xf32> to vector<2x8x32xf32>
    %235 = arith.select %232, %234, %226 : vector<2x8x32xi1>, vector<2x8x32xf32>
    %c1 = arith.constant 1 : index
    %c0_72 = arith.constant 0 : index
    %236 = vector.load %arg5[%c1, %c0_72] : memref<2x32xf32, #tpu.memory_space<vmem>>, vector<1x32xf32>
    %237 = vector.shape_cast %236 : vector<1x32xf32> to vector<32xf32>
    %c1_73 = arith.constant 1 : index
    %c0_74 = arith.constant 0 : index
    %238 = vector.load %arg6[%c1_73, %c0_74] : memref<2x32xf32, #tpu.memory_space<vmem>>, vector<1x32xf32>
    %239 = vector.shape_cast %238 : vector<1x32xf32> to vector<32xf32>
    %cst_75 = arith.constant dense<0.000000e+00> : vector<2x8xf32>
    %240 = vector.multi_reduction <add>, %235, %cst_75 [2] : vector<2x8x32xf32> to vector<2x8xf32>
    %241 = vector.shape_cast %240 : vector<2x8xf32> to vector<2x8x1xf32>
    %cst_76 = arith.constant 3.200000e+01 : f32
    %242 = vector.broadcast %cst_76 : f32 to vector<2x8x1xf32>
    %243 = arith.divf %241, %242 : vector<2x8x1xf32>
    %244 = vector.broadcast %243 : vector<2x8x1xf32> to vector<2x8x32xf32>
    %245 = arith.subf %235, %244 : vector<2x8x32xf32>
    %246 = arith.mulf %245, %245 : vector<2x8x32xf32>
    %cst_77 = arith.constant dense<0.000000e+00> : vector<2x8xf32>
    %247 = vector.multi_reduction <add>, %246, %cst_77 [2] : vector<2x8x32xf32> to vector<2x8xf32>
    %248 = vector.shape_cast %247 : vector<2x8xf32> to vector<2x8x1xf32>
    %cst_78 = arith.constant 3.200000e+01 : f32
    %249 = vector.broadcast %cst_78 : f32 to vector<2x8x1xf32>
    %250 = arith.divf %248, %249 : vector<2x8x1xf32>
    %251 = vector.broadcast %243 : vector<2x8x1xf32> to vector<2x8x32xf32>
    %252 = arith.subf %235, %251 : vector<2x8x32xf32>
    %cst_79 = arith.constant 9.99999974E-6 : f32
    %253 = vector.broadcast %cst_79 : f32 to vector<2x8x1xf32>
    %254 = arith.addf %250, %253 : vector<2x8x1xf32>
    %255 = math.rsqrt %254 : vector<2x8x1xf32>
    %256 = vector.broadcast %255 : vector<2x8x1xf32> to vector<2x8x32xf32>
    %257 = arith.mulf %252, %256 : vector<2x8x32xf32>
    %258 = vector.shape_cast %237 : vector<32xf32> to vector<1x1x32xf32>
    %259 = vector.broadcast %258 : vector<1x1x32xf32> to vector<2x8x32xf32>
    %260 = arith.mulf %257, %259 : vector<2x8x32xf32>
    %261 = vector.shape_cast %239 : vector<32xf32> to vector<1x1x32xf32>
    %262 = vector.broadcast %261 : vector<1x1x32xf32> to vector<2x8x32xf32>
    %263 = arith.addf %260, %262 : vector<2x8x32xf32>
    %264 = vector.shape_cast %263 : vector<2x8x32xf32> to vector<16x32xf32>
    %265 = arith.truncf %264 : vector<16x32xf32> to vector<16x32xbf16>
    %c1_80 = arith.constant 1 : index
    %c0_81 = arith.constant 0 : index
    %c0_82 = arith.constant 0 : index
    %266 = vector.load %arg7[%c1_80, %c0_81, %c0_82] : memref<2x32x96xbf16, #tpu.memory_space<vmem>>, vector<1x32x96xbf16>
    %267 = vector.shape_cast %266 : vector<1x32x96xbf16> to vector<32x96xbf16>
    %cst_83 = arith.constant dense<0.000000e+00> : vector<16x96xf32>
    %268 = tpu.matmul %265, %267, %cst_83 {dimension_numbers = #tpu.dot_dimension_numbers<[1], [0], [0], [1], [0, 0, 1, 1], [], []>} : vector<16x32xbf16>, vector<32x96xbf16>, vector<16x96xf32> -> vector<16x96xf32>
    %c1_84 = arith.constant 1 : index
    %c0_85 = arith.constant 0 : index
    %269 = vector.load %arg8[%c1_84, %c0_85] : memref<2x96xf32, #tpu.memory_space<vmem>>, vector<1x96xf32>
    %270 = vector.shape_cast %269 : vector<1x96xf32> to vector<96xf32>
    %271 = vector.shape_cast %270 : vector<96xf32> to vector<1x96xf32>
    %272 = vector.broadcast %271 : vector<1x96xf32> to vector<16x96xf32>
    %273 = arith.addf %268, %272 : vector<16x96xf32>
    %274 = vector.extract_strided_slice %273 {offsets = [0, 0], sizes = [16, 32], strides = [1, 1]} : vector<16x96xf32> to vector<16x32xf32>
    %275 = vector.shape_cast %274 : vector<16x32xf32> to vector<2x8x32xf32>
    %276 = vector.extract_strided_slice %273 {offsets = [0, 32], sizes = [16, 32], strides = [1, 1]} : vector<16x96xf32> to vector<16x32xf32>
    %277 = vector.shape_cast %276 : vector<16x32xf32> to vector<2x8x32xf32>
    %278 = vector.extract_strided_slice %273 {offsets = [0, 64], sizes = [16, 32], strides = [1, 1]} : vector<16x96xf32> to vector<16x32xf32>
    %279 = vector.shape_cast %278 : vector<16x32xf32> to vector<2x8x32xf32>
    %280 = vector.extract_strided_slice %275 {offsets = [0, 0, 0], sizes = [2, 8, 8], strides = [1, 1, 1]} : vector<2x8x32xf32> to vector<2x8x8xf32>
    %281 = arith.truncf %280 : vector<2x8x8xf32> to vector<2x8x8xbf16>
    %282 = vector.extract_strided_slice %277 {offsets = [0, 0, 0], sizes = [2, 8, 8], strides = [1, 1, 1]} : vector<2x8x32xf32> to vector<2x8x8xf32>
    %283 = arith.truncf %282 : vector<2x8x8xf32> to vector<2x8x8xbf16>
    %284 = vector.extract_strided_slice %279 {offsets = [0, 0, 0], sizes = [2, 8, 8], strides = [1, 1, 1]} : vector<2x8x32xf32> to vector<2x8x8xf32>
    %285 = arith.truncf %284 : vector<2x8x8xf32> to vector<2x8x8xbf16>
    "tpu.trace_start"() <{level = 10 : i32, message = "bqd,bkd->bqk"}> : () -> ()
    %cst_86 = arith.constant dense<0.000000e+00> : vector<2x8x8xf32>
    %286 = tpu.matmul %281, %283, %cst_86 {dimension_numbers = #tpu.dot_dimension_numbers<[2], [2], [1], [1], [0, 0, 0, 1, 1, 1], [0], [0]>} : vector<2x8x8xbf16>, vector<2x8x8xbf16>, vector<2x8x8xf32> -> vector<2x8x8xf32>
    "tpu.trace_stop"() : () -> ()
    %cst_87 = arith.constant 0.353553385 : f32
    %287 = vector.broadcast %cst_87 : f32 to vector<2x8x8xf32>
    %288 = arith.mulf %286, %287 : vector<2x8x8xf32>
    %289 = vector.shape_cast %5 : vector<8x8xf32> to vector<1x8x8xf32>
    %290 = vector.broadcast %289 : vector<1x8x8xf32> to vector<2x8x8xf32>
    %291 = arith.addf %288, %290 : vector<2x8x8xf32>
    %cst_88 = arith.constant dense<0xFF800000> : vector<2x8xf32>
    %292 = vector.multi_reduction <maximumf>, %291, %cst_88 [2] : vector<2x8x8xf32> to vector<2x8xf32>
    %293 = vector.shape_cast %292 : vector<2x8xf32> to vector<2x8x1xf32>
    %294 = vector.broadcast %293 : vector<2x8x1xf32> to vector<2x8x8xf32>
    %295 = arith.subf %291, %294 : vector<2x8x8xf32>
    %296 = math.exp %295 : vector<2x8x8xf32>
    %cst_89 = arith.constant dense<0.000000e+00> : vector<2x8xf32>
    %297 = vector.multi_reduction <add>, %296, %cst_89 [2] : vector<2x8x8xf32> to vector<2x8xf32>
    %298 = vector.shape_cast %297 : vector<2x8xf32> to vector<2x8x1xf32>
    %299 = tpu.reciprocal %298 {approx = true} : vector<2x8x1xf32> -> vector<2x8x1xf32>
    %300 = vector.broadcast %299 : vector<2x8x1xf32> to vector<2x8x8xf32>
    %301 = arith.mulf %296, %300 : vector<2x8x8xf32>
    %302 = arith.truncf %301 : vector<2x8x8xf32> to vector<2x8x8xbf16>
    "tpu.trace_start"() <{level = 10 : i32, message = "bqk,bkd->bqd"}> : () -> ()
    %cst_90 = arith.constant dense<0.000000e+00> : vector<2x8x8xf32>
    %303 = tpu.matmul %302, %285, %cst_90 {dimension_numbers = #tpu.dot_dimension_numbers<[2], [1], [1], [2], [0, 0, 0, 1, 1, 2], [0], [0]>} : vector<2x8x8xbf16>, vector<2x8x8xbf16>, vector<2x8x8xf32> -> vector<2x8x8xf32>
    "tpu.trace_stop"() : () -> ()
    %304 = vector.extract_strided_slice %275 {offsets = [0, 0, 8], sizes = [2, 8, 8], strides = [1, 1, 1]} : vector<2x8x32xf32> to vector<2x8x8xf32>
    %305 = arith.truncf %304 : vector<2x8x8xf32> to vector<2x8x8xbf16>
    %306 = vector.extract_strided_slice %277 {offsets = [0, 0, 8], sizes = [2, 8, 8], strides = [1, 1, 1]} : vector<2x8x32xf32> to vector<2x8x8xf32>
    %307 = arith.truncf %306 : vector<2x8x8xf32> to vector<2x8x8xbf16>
    %308 = vector.extract_strided_slice %279 {offsets = [0, 0, 8], sizes = [2, 8, 8], strides = [1, 1, 1]} : vector<2x8x32xf32> to vector<2x8x8xf32>
    %309 = arith.truncf %308 : vector<2x8x8xf32> to vector<2x8x8xbf16>
    "tpu.trace_start"() <{level = 10 : i32, message = "bqd,bkd->bqk"}> : () -> ()
    %cst_91 = arith.constant dense<0.000000e+00> : vector<2x8x8xf32>
    %310 = tpu.matmul %305, %307, %cst_91 {dimension_numbers = #tpu.dot_dimension_numbers<[2], [2], [1], [1], [0, 0, 0, 1, 1, 1], [0], [0]>} : vector<2x8x8xbf16>, vector<2x8x8xbf16>, vector<2x8x8xf32> -> vector<2x8x8xf32>
    "tpu.trace_stop"() : () -> ()
    %cst_92 = arith.constant 0.353553385 : f32
    %311 = vector.broadcast %cst_92 : f32 to vector<2x8x8xf32>
    %312 = arith.mulf %310, %311 : vector<2x8x8xf32>
    %313 = vector.shape_cast %5 : vector<8x8xf32> to vector<1x8x8xf32>
    %314 = vector.broadcast %313 : vector<1x8x8xf32> to vector<2x8x8xf32>
    %315 = arith.addf %312, %314 : vector<2x8x8xf32>
    %cst_93 = arith.constant dense<0xFF800000> : vector<2x8xf32>
    %316 = vector.multi_reduction <maximumf>, %315, %cst_93 [2] : vector<2x8x8xf32> to vector<2x8xf32>
    %317 = vector.shape_cast %316 : vector<2x8xf32> to vector<2x8x1xf32>
    %318 = vector.broadcast %317 : vector<2x8x1xf32> to vector<2x8x8xf32>
    %319 = arith.subf %315, %318 : vector<2x8x8xf32>
    %320 = math.exp %319 : vector<2x8x8xf32>
    %cst_94 = arith.constant dense<0.000000e+00> : vector<2x8xf32>
    %321 = vector.multi_reduction <add>, %320, %cst_94 [2] : vector<2x8x8xf32> to vector<2x8xf32>
    %322 = vector.shape_cast %321 : vector<2x8xf32> to vector<2x8x1xf32>
    %323 = tpu.reciprocal %322 {approx = true} : vector<2x8x1xf32> -> vector<2x8x1xf32>
    %324 = vector.broadcast %323 : vector<2x8x1xf32> to vector<2x8x8xf32>
    %325 = arith.mulf %320, %324 : vector<2x8x8xf32>
    %326 = arith.truncf %325 : vector<2x8x8xf32> to vector<2x8x8xbf16>
    "tpu.trace_start"() <{level = 10 : i32, message = "bqk,bkd->bqd"}> : () -> ()
    %cst_95 = arith.constant dense<0.000000e+00> : vector<2x8x8xf32>
    %327 = tpu.matmul %326, %309, %cst_95 {dimension_numbers = #tpu.dot_dimension_numbers<[2], [1], [1], [2], [0, 0, 0, 1, 1, 2], [0], [0]>} : vector<2x8x8xbf16>, vector<2x8x8xbf16>, vector<2x8x8xf32> -> vector<2x8x8xf32>
    "tpu.trace_stop"() : () -> ()
    %328 = vector.extract_strided_slice %275 {offsets = [0, 0, 16], sizes = [2, 8, 8], strides = [1, 1, 1]} : vector<2x8x32xf32> to vector<2x8x8xf32>
    %329 = arith.truncf %328 : vector<2x8x8xf32> to vector<2x8x8xbf16>
    %330 = vector.extract_strided_slice %277 {offsets = [0, 0, 16], sizes = [2, 8, 8], strides = [1, 1, 1]} : vector<2x8x32xf32> to vector<2x8x8xf32>
    %331 = arith.truncf %330 : vector<2x8x8xf32> to vector<2x8x8xbf16>
    %332 = vector.extract_strided_slice %279 {offsets = [0, 0, 16], sizes = [2, 8, 8], strides = [1, 1, 1]} : vector<2x8x32xf32> to vector<2x8x8xf32>
    %333 = arith.truncf %332 : vector<2x8x8xf32> to vector<2x8x8xbf16>
    "tpu.trace_start"() <{level = 10 : i32, message = "bqd,bkd->bqk"}> : () -> ()
    %cst_96 = arith.constant dense<0.000000e+00> : vector<2x8x8xf32>
    %334 = tpu.matmul %329, %331, %cst_96 {dimension_numbers = #tpu.dot_dimension_numbers<[2], [2], [1], [1], [0, 0, 0, 1, 1, 1], [0], [0]>} : vector<2x8x8xbf16>, vector<2x8x8xbf16>, vector<2x8x8xf32> -> vector<2x8x8xf32>
    "tpu.trace_stop"() : () -> ()
    %cst_97 = arith.constant 0.353553385 : f32
    %335 = vector.broadcast %cst_97 : f32 to vector<2x8x8xf32>
    %336 = arith.mulf %334, %335 : vector<2x8x8xf32>
    %337 = vector.shape_cast %5 : vector<8x8xf32> to vector<1x8x8xf32>
    %338 = vector.broadcast %337 : vector<1x8x8xf32> to vector<2x8x8xf32>
    %339 = arith.addf %336, %338 : vector<2x8x8xf32>
    %cst_98 = arith.constant dense<0xFF800000> : vector<2x8xf32>
    %340 = vector.multi_reduction <maximumf>, %339, %cst_98 [2] : vector<2x8x8xf32> to vector<2x8xf32>
    %341 = vector.shape_cast %340 : vector<2x8xf32> to vector<2x8x1xf32>
    %342 = vector.broadcast %341 : vector<2x8x1xf32> to vector<2x8x8xf32>
    %343 = arith.subf %339, %342 : vector<2x8x8xf32>
    %344 = math.exp %343 : vector<2x8x8xf32>
    %cst_99 = arith.constant dense<0.000000e+00> : vector<2x8xf32>
    %345 = vector.multi_reduction <add>, %344, %cst_99 [2] : vector<2x8x8xf32> to vector<2x8xf32>
    %346 = vector.shape_cast %345 : vector<2x8xf32> to vector<2x8x1xf32>
    %347 = tpu.reciprocal %346 {approx = true} : vector<2x8x1xf32> -> vector<2x8x1xf32>
    %348 = vector.broadcast %347 : vector<2x8x1xf32> to vector<2x8x8xf32>
    %349 = arith.mulf %344, %348 : vector<2x8x8xf32>
    %350 = arith.truncf %349 : vector<2x8x8xf32> to vector<2x8x8xbf16>
    "tpu.trace_start"() <{level = 10 : i32, message = "bqk,bkd->bqd"}> : () -> ()
    %cst_100 = arith.constant dense<0.000000e+00> : vector<2x8x8xf32>
    %351 = tpu.matmul %350, %333, %cst_100 {dimension_numbers = #tpu.dot_dimension_numbers<[2], [1], [1], [2], [0, 0, 0, 1, 1, 2], [0], [0]>} : vector<2x8x8xbf16>, vector<2x8x8xbf16>, vector<2x8x8xf32> -> vector<2x8x8xf32>
    "tpu.trace_stop"() : () -> ()
    %352 = vector.extract_strided_slice %275 {offsets = [0, 0, 24], sizes = [2, 8, 8], strides = [1, 1, 1]} : vector<2x8x32xf32> to vector<2x8x8xf32>
    %353 = arith.truncf %352 : vector<2x8x8xf32> to vector<2x8x8xbf16>
    %354 = vector.extract_strided_slice %277 {offsets = [0, 0, 24], sizes = [2, 8, 8], strides = [1, 1, 1]} : vector<2x8x32xf32> to vector<2x8x8xf32>
    %355 = arith.truncf %354 : vector<2x8x8xf32> to vector<2x8x8xbf16>
    %356 = vector.extract_strided_slice %279 {offsets = [0, 0, 24], sizes = [2, 8, 8], strides = [1, 1, 1]} : vector<2x8x32xf32> to vector<2x8x8xf32>
    %357 = arith.truncf %356 : vector<2x8x8xf32> to vector<2x8x8xbf16>
    "tpu.trace_start"() <{level = 10 : i32, message = "bqd,bkd->bqk"}> : () -> ()
    %cst_101 = arith.constant dense<0.000000e+00> : vector<2x8x8xf32>
    %358 = tpu.matmul %353, %355, %cst_101 {dimension_numbers = #tpu.dot_dimension_numbers<[2], [2], [1], [1], [0, 0, 0, 1, 1, 1], [0], [0]>} : vector<2x8x8xbf16>, vector<2x8x8xbf16>, vector<2x8x8xf32> -> vector<2x8x8xf32>
    "tpu.trace_stop"() : () -> ()
    %cst_102 = arith.constant 0.353553385 : f32
    %359 = vector.broadcast %cst_102 : f32 to vector<2x8x8xf32>
    %360 = arith.mulf %358, %359 : vector<2x8x8xf32>
    %361 = vector.shape_cast %5 : vector<8x8xf32> to vector<1x8x8xf32>
    %362 = vector.broadcast %361 : vector<1x8x8xf32> to vector<2x8x8xf32>
    %363 = arith.addf %360, %362 : vector<2x8x8xf32>
    %cst_103 = arith.constant dense<0xFF800000> : vector<2x8xf32>
    %364 = vector.multi_reduction <maximumf>, %363, %cst_103 [2] : vector<2x8x8xf32> to vector<2x8xf32>
    %365 = vector.shape_cast %364 : vector<2x8xf32> to vector<2x8x1xf32>
    %366 = vector.broadcast %365 : vector<2x8x1xf32> to vector<2x8x8xf32>
    %367 = arith.subf %363, %366 : vector<2x8x8xf32>
    %368 = math.exp %367 : vector<2x8x8xf32>
    %cst_104 = arith.constant dense<0.000000e+00> : vector<2x8xf32>
    %369 = vector.multi_reduction <add>, %368, %cst_104 [2] : vector<2x8x8xf32> to vector<2x8xf32>
    %370 = vector.shape_cast %369 : vector<2x8xf32> to vector<2x8x1xf32>
    %371 = tpu.reciprocal %370 {approx = true} : vector<2x8x1xf32> -> vector<2x8x1xf32>
    %372 = vector.broadcast %371 : vector<2x8x1xf32> to vector<2x8x8xf32>
    %373 = arith.mulf %368, %372 : vector<2x8x8xf32>
    %374 = arith.truncf %373 : vector<2x8x8xf32> to vector<2x8x8xbf16>
    "tpu.trace_start"() <{level = 10 : i32, message = "bqk,bkd->bqd"}> : () -> ()
    %cst_105 = arith.constant dense<0.000000e+00> : vector<2x8x8xf32>
    %375 = tpu.matmul %374, %357, %cst_105 {dimension_numbers = #tpu.dot_dimension_numbers<[2], [1], [1], [2], [0, 0, 0, 1, 1, 2], [0], [0]>} : vector<2x8x8xbf16>, vector<2x8x8xbf16>, vector<2x8x8xf32> -> vector<2x8x8xf32>
    "tpu.trace_stop"() : () -> ()
    %376 = tpu.concatenate %303, %327, %351, %375 in 2 : vector<2x8x8xf32>, vector<2x8x8xf32>, vector<2x8x8xf32>, vector<2x8x8xf32> -> vector<2x8x32xf32>
    %377 = vector.shape_cast %376 : vector<2x8x32xf32> to vector<16x32xf32>
    %378 = arith.truncf %377 : vector<16x32xf32> to vector<16x32xbf16>
    %c1_106 = arith.constant 1 : index
    %c0_107 = arith.constant 0 : index
    %c0_108 = arith.constant 0 : index
    %379 = vector.load %arg9[%c1_106, %c0_107, %c0_108] : memref<2x32x32xbf16, #tpu.memory_space<vmem>>, vector<1x32x32xbf16>
    %380 = vector.shape_cast %379 : vector<1x32x32xbf16> to vector<32x32xbf16>
    %cst_109 = arith.constant dense<0.000000e+00> : vector<16x32xf32>
    %381 = tpu.matmul %378, %380, %cst_109 {dimension_numbers = #tpu.dot_dimension_numbers<[1], [0], [0], [1], [0, 0, 1, 1], [], []>} : vector<16x32xbf16>, vector<32x32xbf16>, vector<16x32xf32> -> vector<16x32xf32>
    %c1_110 = arith.constant 1 : index
    %c0_111 = arith.constant 0 : index
    %382 = vector.load %arg10[%c1_110, %c0_111] : memref<2x32xf32, #tpu.memory_space<vmem>>, vector<1x32xf32>
    %383 = vector.shape_cast %382 : vector<1x32xf32> to vector<32xf32>
    %384 = vector.shape_cast %383 : vector<32xf32> to vector<1x32xf32>
    %385 = vector.broadcast %384 : vector<1x32xf32> to vector<16x32xf32>
    %386 = arith.addf %381, %385 : vector<16x32xf32>
    %387 = vector.shape_cast %386 : vector<16x32xf32> to vector<2x8x32xf32>
    %388 = arith.addf %235, %387 : vector<2x8x32xf32>
    %c1_112 = arith.constant 1 : index
    %c0_113 = arith.constant 0 : index
    %389 = vector.load %arg11[%c1_112, %c0_113] : memref<2x32xf32, #tpu.memory_space<vmem>>, vector<1x32xf32>
    %390 = vector.shape_cast %389 : vector<1x32xf32> to vector<32xf32>
    %c1_114 = arith.constant 1 : index
    %c0_115 = arith.constant 0 : index
    %391 = vector.load %arg12[%c1_114, %c0_115] : memref<2x32xf32, #tpu.memory_space<vmem>>, vector<1x32xf32>
    %392 = vector.shape_cast %391 : vector<1x32xf32> to vector<32xf32>
    %cst_116 = arith.constant dense<0.000000e+00> : vector<2x8xf32>
    %393 = vector.multi_reduction <add>, %388, %cst_116 [2] : vector<2x8x32xf32> to vector<2x8xf32>
    %394 = vector.shape_cast %393 : vector<2x8xf32> to vector<2x8x1xf32>
    %cst_117 = arith.constant 3.200000e+01 : f32
    %395 = vector.broadcast %cst_117 : f32 to vector<2x8x1xf32>
    %396 = arith.divf %394, %395 : vector<2x8x1xf32>
    %397 = vector.broadcast %396 : vector<2x8x1xf32> to vector<2x8x32xf32>
    %398 = arith.subf %388, %397 : vector<2x8x32xf32>
    %399 = arith.mulf %398, %398 : vector<2x8x32xf32>
    %cst_118 = arith.constant dense<0.000000e+00> : vector<2x8xf32>
    %400 = vector.multi_reduction <add>, %399, %cst_118 [2] : vector<2x8x32xf32> to vector<2x8xf32>
    %401 = vector.shape_cast %400 : vector<2x8xf32> to vector<2x8x1xf32>
    %cst_119 = arith.constant 3.200000e+01 : f32
    %402 = vector.broadcast %cst_119 : f32 to vector<2x8x1xf32>
    %403 = arith.divf %401, %402 : vector<2x8x1xf32>
    %404 = vector.broadcast %396 : vector<2x8x1xf32> to vector<2x8x32xf32>
    %405 = arith.subf %388, %404 : vector<2x8x32xf32>
    %cst_120 = arith.constant 9.99999974E-6 : f32
    %406 = vector.broadcast %cst_120 : f32 to vector<2x8x1xf32>
    %407 = arith.addf %403, %406 : vector<2x8x1xf32>
    %408 = math.rsqrt %407 : vector<2x8x1xf32>
    %409 = vector.broadcast %408 : vector<2x8x1xf32> to vector<2x8x32xf32>
    %410 = arith.mulf %405, %409 : vector<2x8x32xf32>
    %411 = vector.shape_cast %390 : vector<32xf32> to vector<1x1x32xf32>
    %412 = vector.broadcast %411 : vector<1x1x32xf32> to vector<2x8x32xf32>
    %413 = arith.mulf %410, %412 : vector<2x8x32xf32>
    %414 = vector.shape_cast %392 : vector<32xf32> to vector<1x1x32xf32>
    %415 = vector.broadcast %414 : vector<1x1x32xf32> to vector<2x8x32xf32>
    %416 = arith.addf %413, %415 : vector<2x8x32xf32>
    %417 = vector.shape_cast %416 : vector<2x8x32xf32> to vector<16x32xf32>
    %418 = arith.truncf %417 : vector<16x32xf32> to vector<16x32xbf16>
    %c1_121 = arith.constant 1 : index
    %c0_122 = arith.constant 0 : index
    %c0_123 = arith.constant 0 : index
    %419 = vector.load %arg13[%c1_121, %c0_122, %c0_123] : memref<2x32x128xbf16, #tpu.memory_space<vmem>>, vector<1x32x128xbf16>
    %420 = vector.shape_cast %419 : vector<1x32x128xbf16> to vector<32x128xbf16>
    %cst_124 = arith.constant dense<0.000000e+00> : vector<16x128xf32>
    %421 = tpu.matmul %418, %420, %cst_124 {dimension_numbers = #tpu.dot_dimension_numbers<[1], [0], [0], [1], [0, 0, 1, 1], [], []>} : vector<16x32xbf16>, vector<32x128xbf16>, vector<16x128xf32> -> vector<16x128xf32>
    %c1_125 = arith.constant 1 : index
    %c0_126 = arith.constant 0 : index
    %422 = vector.load %arg14[%c1_125, %c0_126] : memref<2x128xf32, #tpu.memory_space<vmem>>, vector<1x128xf32>
    %423 = vector.shape_cast %422 : vector<1x128xf32> to vector<128xf32>
    %424 = vector.shape_cast %423 : vector<128xf32> to vector<1x128xf32>
    %425 = vector.broadcast %424 : vector<1x128xf32> to vector<16x128xf32>
    %426 = arith.addf %421, %425 : vector<16x128xf32>
    %cst_127 = arith.constant 1.702000e+00 : f32
    %427 = vector.broadcast %cst_127 : f32 to vector<16x128xf32>
    %428 = arith.mulf %427, %426 : vector<16x128xf32>
    %429 = arith.negf %428 : vector<16x128xf32>
    %430 = math.exp %429 : vector<16x128xf32>
    %cst_128 = arith.constant 1.000000e+00 : f32
    %431 = vector.broadcast %cst_128 : f32 to vector<16x128xf32>
    %432 = arith.addf %431, %430 : vector<16x128xf32>
    %433 = arith.divf %431, %432 : vector<16x128xf32>
    %434 = arith.mulf %426, %433 : vector<16x128xf32>
    %435 = arith.truncf %434 : vector<16x128xf32> to vector<16x128xbf16>
    %c1_129 = arith.constant 1 : index
    %c0_130 = arith.constant 0 : index
    %c0_131 = arith.constant 0 : index
    %436 = vector.load %arg15[%c1_129, %c0_130, %c0_131] : memref<2x128x32xbf16, #tpu.memory_space<vmem>>, vector<1x128x32xbf16>
    %437 = vector.shape_cast %436 : vector<1x128x32xbf16> to vector<128x32xbf16>
    %cst_132 = arith.constant dense<0.000000e+00> : vector<16x32xf32>
    %438 = tpu.matmul %435, %437, %cst_132 {dimension_numbers = #tpu.dot_dimension_numbers<[1], [0], [0], [1], [0, 0, 1, 1], [], []>} : vector<16x128xbf16>, vector<128x32xbf16>, vector<16x32xf32> -> vector<16x32xf32>
    %c1_133 = arith.constant 1 : index
    %c0_134 = arith.constant 0 : index
    %439 = vector.load %arg16[%c1_133, %c0_134] : memref<2x32xf32, #tpu.memory_space<vmem>>, vector<1x32xf32>
    %440 = vector.shape_cast %439 : vector<1x32xf32> to vector<32xf32>
    %441 = vector.shape_cast %440 : vector<32xf32> to vector<1x32xf32>
    %442 = vector.broadcast %441 : vector<1x32xf32> to vector<16x32xf32>
    %443 = arith.addf %438, %442 : vector<16x32xf32>
    %444 = vector.shape_cast %443 : vector<16x32xf32> to vector<2x8x32xf32>
    %445 = arith.addf %388, %444 : vector<2x8x32xf32>
    %c0_135 = arith.constant 0 : index
    %c0_136 = arith.constant 0 : index
    %446 = vector.load %arg17[%c0_135, %c0_136] : memref<1x32xf32, #tpu.memory_space<vmem>>, vector<1x32xf32>
    %447 = vector.shape_cast %446 : vector<1x32xf32> to vector<32xf32>
    %c0_137 = arith.constant 0 : index
    %c0_138 = arith.constant 0 : index
    %448 = vector.load %arg18[%c0_137, %c0_138] : memref<1x32xf32, #tpu.memory_space<vmem>>, vector<1x32xf32>
    %449 = vector.shape_cast %448 : vector<1x32xf32> to vector<32xf32>
    %cst_139 = arith.constant dense<0.000000e+00> : vector<2x8xf32>
    %450 = vector.multi_reduction <add>, %445, %cst_139 [2] : vector<2x8x32xf32> to vector<2x8xf32>
    %451 = vector.shape_cast %450 : vector<2x8xf32> to vector<2x8x1xf32>
    %cst_140 = arith.constant 3.200000e+01 : f32
    %452 = vector.broadcast %cst_140 : f32 to vector<2x8x1xf32>
    %453 = arith.divf %451, %452 : vector<2x8x1xf32>
    %454 = vector.broadcast %453 : vector<2x8x1xf32> to vector<2x8x32xf32>
    %455 = arith.subf %445, %454 : vector<2x8x32xf32>
    %456 = arith.mulf %455, %455 : vector<2x8x32xf32>
    %cst_141 = arith.constant dense<0.000000e+00> : vector<2x8xf32>
    %457 = vector.multi_reduction <add>, %456, %cst_141 [2] : vector<2x8x32xf32> to vector<2x8xf32>
    %458 = vector.shape_cast %457 : vector<2x8xf32> to vector<2x8x1xf32>
    %cst_142 = arith.constant 3.200000e+01 : f32
    %459 = vector.broadcast %cst_142 : f32 to vector<2x8x1xf32>
    %460 = arith.divf %458, %459 : vector<2x8x1xf32>
    %461 = vector.broadcast %453 : vector<2x8x1xf32> to vector<2x8x32xf32>
    %462 = arith.subf %445, %461 : vector<2x8x32xf32>
    %cst_143 = arith.constant 9.99999974E-6 : f32
    %463 = vector.broadcast %cst_143 : f32 to vector<2x8x1xf32>
    %464 = arith.addf %460, %463 : vector<2x8x1xf32>
    %465 = math.rsqrt %464 : vector<2x8x1xf32>
    %466 = vector.broadcast %465 : vector<2x8x1xf32> to vector<2x8x32xf32>
    %467 = arith.mulf %462, %466 : vector<2x8x32xf32>
    %468 = vector.shape_cast %447 : vector<32xf32> to vector<1x1x32xf32>
    %469 = vector.broadcast %468 : vector<1x1x32xf32> to vector<2x8x32xf32>
    %470 = arith.mulf %467, %469 : vector<2x8x32xf32>
    %471 = vector.shape_cast %449 : vector<32xf32> to vector<1x1x32xf32>
    %472 = vector.broadcast %471 : vector<1x1x32xf32> to vector<2x8x32xf32>
    %473 = arith.addf %470, %472 : vector<2x8x32xf32>
    %c0_144 = arith.constant 0 : index
    %c0_145 = arith.constant 0 : index
    %c0_146 = arith.constant 0 : index
    %474 = vector.load %arg21[%c0_144, %c0_145, %c0_146] : memref<2x8x32xf32, #tpu.memory_space<vmem>>, vector<2x8x32xf32>
    tpu.vector_store %arg21[%c0_144, %c0_145, %c0_146], %473 {strides = array<i32>} : memref<2x8x32xf32, #tpu.memory_space<vmem>>, vector<2x8x32xf32>,
    %c0_147 = arith.constant 0 : index
    %475 = memref.load %arg1[%c0_147] : memref<2xi32, #tpu.memory_space<smem>>
    %c0_148 = arith.constant 0 : index
    %476 = arith.index_cast %475 : i32 to index
    %c0_149 = arith.constant 0 : index
    %477 = vector.load %arg21[%c0_148, %476, %c0_149] : memref<2x8x32xf32, #tpu.memory_space<vmem>>, vector<1x1x32xf32>
    %478 = vector.shape_cast %477 : vector<1x1x32xf32> to vector<1x32xf32>
    %c1_150 = arith.constant 1 : index
    %479 = memref.load %arg1[%c1_150] : memref<2xi32, #tpu.memory_space<smem>>
    %c1_151 = arith.constant 1 : index
    %480 = arith.index_cast %479 : i32 to index
    %c0_152 = arith.constant 0 : index
    %481 = vector.load %arg21[%c1_151, %480, %c0_152] : memref<2x8x32xf32, #tpu.memory_space<vmem>>, vector<1x1x32xf32>
    %482 = vector.shape_cast %481 : vector<1x1x32xf32> to vector<1x32xf32>
    %483 = tpu.concatenate %478, %482 in 0 : vector<1x32xf32>, vector<1x32xf32> -> vector<2x32xf32>
    %484 = arith.truncf %483 : vector<2x32xf32> to vector<2x32xbf16>
    %c0_153 = arith.constant 0 : index
    %c0_154 = arith.constant 0 : index
    %485 = vector.load %arg19[%c0_153, %c0_154] : memref<32x128xbf16, #tpu.memory_space<vmem>>, vector<32x128xbf16>
    %cst_155 = arith.constant dense<0.000000e+00> : vector<2x128xf32>
    %486 = tpu.matmul %484, %485, %cst_155 {dimension_numbers = #tpu.dot_dimension_numbers<[1], [0], [0], [1], [0, 0, 1, 1], [], []>} : vector<2x32xbf16>, vector<32x128xbf16>, vector<2x128xf32> -> vector<2x128xf32>
    %c0_156 = arith.constant 0 : index
    %c0_157 = arith.constant 0 : index
    %487 = vector.load %arg20[%c0_156, %c0_157] : memref<2x128xf32, #tpu.memory_space<vmem>>, vector<2x128xf32>
    tpu.vector_store %arg20[%c0_156, %c0_157], %486 {strides = array<i32>} : memref<2x128xf32, #tpu.memory_space<vmem>>, vector<2x128xf32>,
    return
  }
  func.func @transform_0(%arg0: i32, %arg1: memref<2xi32, #tpu.memory_space<smem>>) -> (i32, i32, i32) {
    %c0_i32 = arith.constant 0 : i32
    %c0_i32_0 = arith.constant 0 : i32
    %c0_i32_1 = arith.constant 0 : i32
    %c0_i32_2 = arith.constant 0 : i32
    return %c0_i32, %c0_i32_0, %c0_i32_1 : i32, i32, i32
  }
  func.func @transform_1(%arg0: i32, %arg1: memref<2xi32, #tpu.memory_space<smem>>) -> (i32, i32) {
    %c0_i32 = arith.constant 0 : i32
    %c0_i32_0 = arith.constant 0 : i32
    %c0_i32_1 = arith.constant 0 : i32
    return %c0_i32, %c0_i32_0 : i32, i32
  }
  func.func @transform_2(%arg0: i32, %arg1: memref<2xi32, #tpu.memory_space<smem>>) -> (i32, i32, i32) {
    %c0_i32 = arith.constant 0 : i32
    %c0_i32_0 = arith.constant 0 : i32
    %c0_i32_1 = arith.constant 0 : i32
    %c0_i32_2 = arith.constant 0 : i32
    return %c0_i32, %c0_i32_0, %c0_i32_1 : i32, i32, i32
  }
  func.func @transform_3(%arg0: i32, %arg1: memref<2xi32, #tpu.memory_space<smem>>) -> (i32, i32) {
    %c0_i32 = arith.constant 0 : i32
    %c0_i32_0 = arith.constant 0 : i32
    %c0_i32_1 = arith.constant 0 : i32
    return %c0_i32, %c0_i32_0 : i32, i32
  }
  func.func @transform_4(%arg0: i32, %arg1: memref<2xi32, #tpu.memory_space<smem>>) -> (i32, i32) {
    %c0_i32 = arith.constant 0 : i32
    %c0_i32_0 = arith.constant 0 : i32
    %c0_i32_1 = arith.constant 0 : i32
    return %c0_i32, %c0_i32_0 : i32, i32
  }
  func.func @transform_5(%arg0: i32, %arg1: memref<2xi32, #tpu.memory_space<smem>>) -> (i32, i32, i32) {
    %c0_i32 = arith.constant 0 : i32
    %c0_i32_0 = arith.constant 0 : i32
    %c0_i32_1 = arith.constant 0 : i32
    %c0_i32_2 = arith.constant 0 : i32
    return %c0_i32, %c0_i32_0, %c0_i32_1 : i32, i32, i32
  }
  func.func @transform_6(%arg0: i32, %arg1: memref<2xi32, #tpu.memory_space<smem>>) -> (i32, i32) {
    %c0_i32 = arith.constant 0 : i32
    %c0_i32_0 = arith.constant 0 : i32
    %c0_i32_1 = arith.constant 0 : i32
    return %c0_i32, %c0_i32_0 : i32, i32
  }
  func.func @transform_7(%arg0: i32, %arg1: memref<2xi32, #tpu.memory_space<smem>>) -> (i32, i32, i32) {
    %c0_i32 = arith.constant 0 : i32
    %c0_i32_0 = arith.constant 0 : i32
    %c0_i32_1 = arith.constant 0 : i32
    %c0_i32_2 = arith.constant 0 : i32
    return %c0_i32, %c0_i32_0, %c0_i32_1 : i32, i32, i32
  }
  func.func @transform_8(%arg0: i32, %arg1: memref<2xi32, #tpu.memory_space<smem>>) -> (i32, i32) {
    %c0_i32 = arith.constant 0 : i32
    %c0_i32_0 = arith.constant 0 : i32
    %c0_i32_1 = arith.constant 0 : i32
    return %c0_i32, %c0_i32_0 : i32, i32
  }
  func.func @transform_9(%arg0: i32, %arg1: memref<2xi32, #tpu.memory_space<smem>>) -> (i32, i32) {
    %c0_i32 = arith.constant 0 : i32
    %c0_i32_0 = arith.constant 0 : i32
    %c0_i32_1 = arith.constant 0 : i32
    return %c0_i32, %c0_i32_0 : i32, i32
  }
  func.func @transform_10(%arg0: i32, %arg1: memref<2xi32, #tpu.memory_space<smem>>) -> (i32, i32) {
    %c0_i32 = arith.constant 0 : i32
    %c0_i32_0 = arith.constant 0 : i32
    %c0_i32_1 = arith.constant 0 : i32
    return %c0_i32, %c0_i32_0 : i32, i32
  }
  func.func @transform_11(%arg0: i32, %arg1: memref<2xi32, #tpu.memory_space<smem>>) -> (i32, i32, i32) {
    %c0_i32 = arith.constant 0 : i32
    %c0_i32_0 = arith.constant 0 : i32
    %c0_i32_1 = arith.constant 0 : i32
    %c0_i32_2 = arith.constant 0 : i32
    return %c0_i32, %c0_i32_0, %c0_i32_1 : i32, i32, i32
  }
  func.func @transform_12(%arg0: i32, %arg1: memref<2xi32, #tpu.memory_space<smem>>) -> (i32, i32) {
    %c0_i32 = arith.constant 0 : i32
    %c0_i32_0 = arith.constant 0 : i32
    %c0_i32_1 = arith.constant 0 : i32
    return %c0_i32, %c0_i32_0 : i32, i32
  }
  func.func @transform_13(%arg0: i32, %arg1: memref<2xi32, #tpu.memory_space<smem>>) -> (i32, i32, i32) {
    %c0_i32 = arith.constant 0 : i32
    %c0_i32_0 = arith.constant 0 : i32
    %c0_i32_1 = arith.constant 0 : i32
    %c0_i32_2 = arith.constant 0 : i32
    return %c0_i32, %c0_i32_0, %c0_i32_1 : i32, i32, i32
  }
  func.func @transform_14(%arg0: i32, %arg1: memref<2xi32, #tpu.memory_space<smem>>) -> (i32, i32) {
    %c0_i32 = arith.constant 0 : i32
    %c0_i32_0 = arith.constant 0 : i32
    %c0_i32_1 = arith.constant 0 : i32
    return %c0_i32, %c0_i32_0 : i32, i32
  }
  func.func @transform_15(%arg0: i32, %arg1: memref<2xi32, #tpu.memory_space<smem>>) -> (i32, i32) {
    %c0_i32 = arith.constant 0 : i32
    %c0_i32_0 = arith.constant 0 : i32
    %c0_i32_1 = arith.constant 0 : i32
    return %c0_i32, %c0_i32_0 : i32, i32
  }
  func.func @transform_16(%arg0: i32, %arg1: memref<2xi32, #tpu.memory_space<smem>>) -> (i32, i32) {
    %c0_i32 = arith.constant 0 : i32
    %c0_i32_0 = arith.constant 0 : i32
    %c0_i32_1 = arith.constant 0 : i32
    return %c0_i32, %c0_i32_0 : i32, i32
  }
  func.func @transform_17(%arg0: i32, %arg1: memref<2xi32, #tpu.memory_space<smem>>) -> (i32, i32) {
    %c0_i32 = arith.constant 0 : i32
    %c0_i32_0 = arith.constant 0 : i32
    %c0_i32_1 = arith.constant 0 : i32
    return %c0_i32, %c0_i32_0 : i32, i32
  }
  func.func @transform_18(%arg0: i32, %arg1: memref<2xi32, #tpu.memory_space<smem>>) -> (i32, i32) {
    %c0_i32 = arith.constant 0 : i32
    %c0_i32_0 = arith.constant 0 : i32
    %c0_i32_1 = arith.constant 0 : i32
    return %c0_i32, %c0_i32_0 : i32, i32
  }
  func.func @transform_19(%arg0: i32, %arg1: memref<2xi32, #tpu.memory_space<smem>>) -> (i32, i32, i32) {
    %c0_i32 = arith.constant 0 : i32
    %c0_i32_0 = arith.constant 0 : i32
    %c0_i32_1 = arith.constant 0 : i32
    %c0_i32_2 = arith.constant 0 : i32
    return %c0_i32, %c0_i32_0, %c0_i32_1 : i32, i32, i32
  }
}

</mosaic_0001>

<bundles_post_ra>
// kernel: tpu_custom_call.1
= control target key start
LH: loop header
LB: loop body
LE: loop exit
PB: predicated region body
PF: predicated region fallthrough
CT: control target
= control target key end

     0   :  { %s4471_s0 = inlined_call_operand.hbm [shape: s32[2], index: 0, kind: input, shape index: {}]   ;;  %s4472_s1 = inlined_call_operand.vmem [shape: f32[2,8,32], index: 1, kind: input, shape index: {}]   ;;  %s4473_s2 = inlined_call_operand.vmem [shape: f32[8,32], index: 2, kind: input, shape index: {}]   ;;  %s4474_s3 = inlined_call_operand.vmem [shape: f32[1,8,32], index: 3, kind: input, shape index: {}]   ;;  %s4475_s4 = inlined_call_operand.vmem [shape: f32[2,32], index: 4, kind: input, shape index: {}]   ;;  %s4476_s5 = inlined_call_operand.vmem [shape: f32[2,32], index: 5, kind: input, shape index: {}]   ;;  %s4477_s6 = inlined_call_operand.vmem [shape: bf16[2,32,96], index: 6, kind: input, shape index: {}]   ;;  %s4478_s7 = inlined_call_operand.vmem [shape: f32[2,96], index: 7, kind: input, shape index: {}]   ;;  %s4479_s8 = inlined_call_operand.vmem [shape: bf16[2,32,32], index: 8, kind: input, shape index: {}]   ;;  %s4480_s9 = inlined_call_operand.vmem [shape: f32[2,32], index: 9, kind: input, shape index: {}]   ;;  %s4481_s10 = inlined_call_operand.vmem [shape: f32[2,32], index: 10, kind: input, shape index: {}]   ;;  %s4482_s11 = inlined_call_operand.vmem [shape: f32[2,32], index: 11, kind: input, shape index: {}]   ;;  %s4483_s12 = inlined_call_operand.vmem [shape: bf16[2,32,128], index: 12, kind: input, shape index: {}]   ;;  %s4484_s13 = inlined_call_operand.vmem [shape: f32[2,128], index: 13, kind: input, shape index: {}]   ;;  %s4485_s14 = inlined_call_operand.vmem [shape: bf16[2,128,32], index: 14, kind: input, shape index: {}]   ;;  %s4486_s15 = inlined_call_operand.vmem [shape: f32[2,32], index: 15, kind: input, shape index: {}]   ;;  %s4487_s16 = inlined_call_operand.vmem [shape: f32[1,32], index: 16, kind: input, shape index: {}]   ;;  %s4488_s17 = inlined_call_operand.vmem [shape: f32[1,32], index: 17, kind: input, shape index: {}]   ;;  %s4489_s18 = inlined_call_operand.vmem [shape: bf16[32,128], index: 18, kind: input, shape index: {}]   ;;  %s4490_s19 = inlined_call_operand.hbm [shape: f32[2,128], index: 19, kind: output, shape index: {0}]   ;;  %s4491_s20 = inlined_call_operand.hbm [shape: f32[2,8,32], index: 20, kind: output, shape index: {1}]  }
   0x1   :  { %4506 = sst [smem:[#allocation11_spill]] %s4471_s0 }
   0x2   :  { %4507 = sst [smem:[#allocation12_spill]] %s4472_s1  ;;  %s4512_s23 = sld [smem:[#allocation11_spill]] }
   0x3   :  { %4508 = sst [smem:[#allocation13_spill]] %s4473_s2 }
   0x4   :  { %4509 = sst [smem:[#allocation14_spill]] %s4474_s3 }
   0x5   :  { %4510 = sst [smem:[#allocation15_spill]] %s4475_s4 }
   0x6   :  { %4511 = sst [smem:[#allocation16_spill]] %s4484_s13 }
   0x8   :  { %s3612_s13 = scalar_lea.hbm %s4512_s23, 16 }
   0x9   :  { %p3613_p0 = scmp.ne.s32.totalorder %s4512_s23, %s3612_s13  ;;  %p3616_p1 = scmp.lt.u32.totalorder %s3612_s13, %s4512_s23 }
   0xb   :  { %p3618_p2 = pnand %p3616_p1, %p3613_p0 }
   0xd   :  { %3621 = shalt.err (!%p3618_p2)  }
   0xe   :  { %s3672_s26 = smov [#allocation3]  }
   0xf   :  { %27 = dma.hbm_to_smem %s4512_s23, 16, %s3672_s26, [#allocation2] }
  0x10   :  { %3666 = dma.done.wait [#allocation2], 16 }
  0x11   :  { %3667 = vsyncadd [#allocation2], 4294967280 }
  0x12   :  { %29 = sfence }
  0x13   :  { %30 = vsyncpa [#allocation5], 0  ;;  %s4513_s30 = sld [smem:[#allocation12_spill]]  ;;  %s4514_s1 = sld [smem:[#allocation13_spill]]  ;;  %vm85_vm0 = vcmask 261120  }
  0x19   :  { %v78_v0 = vld [vmem:[%s4513_s30] sm:$0xff]  ;;  %v79_v2 = vld [vmem:[%s4513_s30 + $0x8] sm:$0xff] }
  0x1a   :  { %v80_v1 = vld [vmem:[%s4514_s1] sm:$0xff] }
  0x1b   :  { %v3818_v3 = vadd.f32 %v80_v1, %v78_v0  ;;  %v3820_v4 = vadd.f32 %v80_v1, %v79_v2 }
  0x1d   :  { %v86_v5 = vsel %vm85_vm0, %v3818_v3, 0.0  ;;  %v89_v6 = vsel %vm85_vm0, %v3820_v4, 0.0 }
  0x1e   :  { %87 = vadd.xlane.f32.xlu0 %v86_v5 }
  0x22   :  { %90 = vadd.xlane.f32.xlu0 %v89_v6 }
  0x23   :  { %31 = vsyncpa [#allocation7], 0  ;;  %v3482_v17 = vld [vmem:[%s4477_s6] sm:$0xff]   ;;  %v3673_v18 = vmov 0.0   ;;  %vm3674_vm1 = vmmov 0   ;;  %v3483_v19 = vld [vmem:[%s4477_s6 + $0x8] sm:$0xff]   ;;  %v69_v50 = vlaneseq }
  0x24   :  { %3144 = vmatprep.subr.bf16.mxu1 %v3673_v18  ;;  %3148 = vmatprep.mubr.msk.bf16.mxu1 %vm3674_vm1, %v3673_v18  ;;  %s4515_s27 = sld [smem:[#allocation15_spill]]  ;;  %v2921_v32 = vld [vmem:[%s4476_s5] ss:$0 sm:$0xff]  ;;  %s3675_s0 = smov 96   ;;  %vm196_vm2 = vcmask 64512   ;;  %vm325_vm4 = vcmask 1043456  }
  0x25   :  { %3145 = vmatpush3.bf16.msra.mxu1 %v3482_v17  ;;  %3158 = vmatprep.subr.bf16.mxu0 %v3673_v18  ;;  %v2922_v37 = vld [vmem:[%s4478_s7] ss:$0 sm:$0xff]  ;;  %v3876_v51 = vshrl.u32 %v69_v50, 7  ;;  %v72_v52 = vand.u32 127, %v69_v50  ;;  %s3676_s21 = smov 64   ;;  %s3677_s1 = smov 88  }
  0x26   :  { %3146 = vmatprep.subr.bf16.mxu1 %v3673_v18  ;;  %3160 = vmatprep.mubr.msk.bf16.mxu0 %vm3674_vm1, %v3673_v18  ;;  %s3678_s13 = smov 120   ;;  %s3679_s22 = smov 56   ;;  %vm1115_vm5 = vcmask 130048   ;;  %vm1118_vm6 = vcmask 195584   ;;  %vm2824_vm10 = vcmask 1040384  }
  0x27   :  { %vm73_vm3 = vcmp.gt.s32.totalorder %v72_v52, %v3876_v51  ;;  %s3680_s23 = smov 80   ;;  %s3681_s24 = smov 112   ;;  %vm75_vm7 = vcmp.ge.s32.totalorder %v3876_v51, 1  ;;  %vm76_vm8 = vcmp.lt.s32.totalorder %v3876_v51, 3 }
  0x28   :  { %v3880_v54 = vsel %vm73_vm3, -1e+30, %v3673_v18  ;;  %s3682_s2 = smov 48   ;;  %s4504_s25 = smov 72   ;;  %vm77_vm9 = vmand %vm75_vm7, %vm76_vm8 }
  0x29   :  { %3147 = vmatpush3.bf16.msra.mxu1 %v3483_v19  ;;  %s4502_s3 = smov 104   ;;  %s4500_s26 = smov 40  }
  0x2a   :  { %3152 = vmatprep.subr.bf16.mxu1 %v3673_v18  ;;  %v2920_v28 = vld [vmem:[%s4515_s27] ss:$0 sm:$0xff]  ;;  %s4497_s28 = smov 8   ;;  %s4496_s4 = smov 16  }
  0x2b   :  { %s4499_s29 = smov 24   ;;  %s4517_s30 = sld [smem:[#allocation14_spill]] }
  0xab   :  { %v88_v7 = vpop.xlane.xlu0 %87 }
  0xac   :  { %v93_v8 = vmul.f32 0.03125, %v88_v7 }
  0xae   :  { %v95_v9 = vsub.f32 %v3818_v3, %v93_v8 }
  0xaf   :  { %v91_v10 = vpop.xlane.xlu0 %90 }
  0xb0   :  { %v94_v11 = vmul.f32 0.03125, %v91_v10  ;;  %v97_v12 = vmul.f32 %v95_v9, %v95_v9 }
  0xb2   :  { %v96_v13 = vsub.f32 %v3820_v4, %v94_v11  ;;  %v99_v14 = vsel %vm85_vm0, %v97_v12, 0.0 }
  0xb3   :  { %100 = vadd.xlane.f32.xlu1 %v99_v14 }
  0xb4   :  { %v98_v15 = vmul.f32 %v96_v13, %v96_v13 }
  0xb6   :  { %v102_v16 = vsel %vm85_vm0, %v98_v15, 0.0 }
  0xb7   :  { %103 = vadd.xlane.f32.xlu1 %v102_v16 }
 0x140   :  { %v101_v20 = vpop.xlane.xlu1 %100 }
 0x141   :  { %v105_v21 = vmul.f32 0.03125, %v101_v20 }
 0x143   :  { %v107_v22 = vadd.f32 1e-05, %v105_v21 }
 0x144   :  { %v104_v23 = vpop.xlane.xlu1 %103 }
 0x145   :  { %3512 = vrsqrt.f32 %v107_v22  ;;  %v106_v24 = vmul.f32 0.03125, %v104_v23 }
 0x147   :  { %v108_v25 = vadd.f32 1e-05, %v106_v24 }
 0x149   :  { %3514 = vrsqrt.f32 %v108_v25 }
 0x14f   :  { %v3513_v26 = vpop.eup %3512 }
 0x150   :  { %v111_v27 = vmul.f32 %v3513_v26, %v95_v9 }
 0x152   :  { %v117_v31 = vmul.f32 %v2920_v28, %v111_v27 }
 0x153   :  { %v3515_v29 = vpop.eup %3514 }
 0x154   :  { %v112_v30 = vmul.f32 %v3515_v29, %v96_v13  ;;  %v123_v34 = vadd.f32 %v2921_v32, %v117_v31 }
 0x156   :  { %v118_v33 = vmul.f32 %v2920_v28, %v112_v30 }
 0x158   :  { %v124_v35 = vadd.f32 %v2921_v32, %v118_v33 }
 0x15a   :  { %v125_v36 = vpack.c.bf16 %v124_v35, %v123_v34 }
 0x15c   :  { %3149 = vmatmul.mubr.msk.bf16.vlgmr.msra.gmra.mrb[0].mxu1 %vm85_vm0, %v125_v36 }
 0x15d   :  { %3154 = vmatprep.mubr.msk.bf16.mxu1 %vm3674_vm1, %v3673_v18 }
 0x22f   :  { %v184_v38 = vpop.f32.mrb[0].mxu1 }
 0x230   :  { %v185_v39 = vadd.f32 %v2922_v37, %v184_v38  ;;  %v3150_v40 = vpop.f32.mrb[1].mxu1 }
 0x231   :  { %v187_v41 = vpop.f32.mrb[2].mxu1 }
 0x232   :  { %v3856_v42 = vpack.c.bf16 %v185_v39, %v185_v39  ;;  %v188_v43 = vadd.f32 %v2922_v37, %v187_v41  ;;  %v3151_v44 = vpop.f32.mrb[3].mxu1 }
 0x234   :  { %v3858_v45 = vpack.c.bf16 %v188_v43, %v188_v43  ;;  %194 = vrot.lane.b32.xlu0 %v3856_v42, %s3675_s0 }
 0x236   :  { %244 = vrot.lane.b32.xlu1 %v3858_v45, %s3675_s0 }
 0x2a6   :  { %v195_v46 = vpop.permute.xlu0 %194 }
 0x2a7   :  { %v201_v47 = vsel %vm196_vm2, %v195_v46, 0 }
 0x2a8   :  { %3153 = vmatpush3.bf16.xpose.msra.mxu1 %v201_v47  ;;  %v245_v48 = vpop.permute.xlu1 %244 }
 0x2a9   :  { %v250_v49 = vsel %vm196_vm2, %v245_v48, 0  ;;  %3164 = vmatprep.subr.bf16.mxu1 %v3673_v18 }
 0x2aa   :  { %3159 = vmatpush3.bf16.xpose.msra.mxu0 %v250_v49 }
 0x2ab   :  { %3170 = vmatprep.subr.bf16.mxu0 %v3673_v18 }
 0x2af   :  { %3155 = vmatmul.mubr.msk.bf16.vlgmr.msra.gmra.mrb[4].mxu1 %vm196_vm2, %v3856_v42 }
 0x2b0   :  { %3166 = vmatprep.mubr.msk.bf16.mxu1 %vm3674_vm1, %v3673_v18 }
 0x2b1   :  { %3161 = vmatmul.mubr.msk.bf16.vlgmr.msra.gmra.mrb[0].mxu0 %vm196_vm2, %v3858_v45 }
 0x2b2   :  { %3172 = vmatprep.mubr.msk.bf16.mxu0 %vm3674_vm1, %v3673_v18 }
 0x382   :  { %v237_v53 = vpop.f32.mrb[4].mxu1 }
 0x383   :  { %v292_v55 = vmul.f32 0.35355338, %v237_v53  ;;  %v3156_v56 = vpop.f32.mrb[5].mxu1 }
 0x384   :  { %v240_v57 = vpop.f32.mrb[6].mxu1  ;;  %v286_v58 = vpop.f32.mrb[0].mxu0 }
 0x385   :  { %v293_v59 = vmul.f32 0.35355338, %v286_v58  ;;  %v3157_v60 = vpop.f32.mrb[7].mxu1  ;;  %v3162_v61 = vpop.f32.mrb[1].mxu0  ;;  %v294_v62 = vadd.f32 %v292_v55, %v3880_v54 }
 0x386   :  { %v289_v63 = vpop.f32.mrb[2].mxu0 }
 0x387   :  { %v3163_v0 = vpop.f32.mrb[3].mxu0  ;;  %v296_v1 = vsel %vm196_vm2, %v294_v62, -inf  ;;  %v295_v2 = vadd.f32 %v293_v59, %v3880_v54 }
 0x388   :  { %297 = vmax.xlane.f32.xlu1 %v296_v1 }
 0x389   :  { %v299_v5 = vsel %vm196_vm2, %v295_v2, -inf }
 0x38a   :  { %300 = vmax.xlane.f32.xlu0 %v299_v5 }
 0x399   :  { %369 = vrot.lane.b32.xlu1 %v3858_v45, %s3676_s21 }
 0x39d   :  { %419 = vrot.lane.b32.xlu1 %v3856_v42, %s3677_s1 }
 0x415   :  { %v298_v6 = vpop.xlane.xlu1 %297 }
 0x416   :  { %v302_v7 = vsub.f32 %v294_v62, %v298_v6 }
 0x417   :  { %v301_v8 = vpop.xlane.xlu0 %300 }
 0x418   :  { %v304_v9 = vmul.f32 1.442695, %v302_v7  ;;  %v303_v10 = vsub.f32 %v295_v2, %v301_v8 }
 0x419   :  { %v370_v11 = vpop.permute.xlu1 %369 }
 0x41a   :  { %3516 = vpow2.f32 %v304_v9  ;;  %v306_v12 = vmul.f32 1.442695, %v303_v10  ;;  %v375_v13 = vsel %vm325_vm4, %v370_v11, 0 }
 0x41b   :  { %3171 = vmatpush3.bf16.msra.mxu0 %v375_v13 }
 0x41c   :  { %3518 = vpow2.f32 %v306_v12  ;;  %3182 = vmatprep.subr.bf16.mxu0 %v3673_v18 }
 0x41d   :  { %v420_v19 = vpop.permute.xlu1 %419 }
 0x41e   :  { %v425_v30 = vsel %vm196_vm2, %v420_v19, 0 }
 0x424   :  { %v3517_v14 = vpop.eup %3516 }
 0x425   :  { %v308_v15 = vsel %vm196_vm2, %v3517_v14, 0.0 }
 0x426   :  { %v3519_v16 = vpop.eup %3518  ;;  %309 = vadd.xlane.f32.xlu0 %v308_v15 }
 0x427   :  { %v311_v17 = vsel %vm196_vm2, %v3519_v16, 0.0 }
 0x428   :  { %312 = vadd.xlane.f32.xlu1 %v311_v17 }
 0x439   :  { %469 = vrot.lane.b32.xlu1 %v3858_v45, %s3677_s1 }
 0x43c   :  { %320 = vrot.lane.b32.xlu0 %v3856_v42, %s3676_s21 }
 0x43d   :  { %467 = vrot.lane.b32.xlu1 %v3858_v45, %s3678_s13 }
 0x440   :  { %417 = vrot.lane.b32.xlu0 %v3856_v42, %s3678_s13 }
 0x4b3   :  { %v310_v20 = vpop.xlane.xlu0 %309 }
 0x4b4   :  { %3520 = vrcp.f32 %v310_v20 }
 0x4b5   :  { %v313_v21 = vpop.xlane.xlu1 %312 }
 0x4b6   :  { %3522 = vrcp.f32 %v313_v21 }
 0x4b7   :  { %v321_v22 = vpop.permute.xlu0 %320 }
 0x4b8   :  { %v327_v23 = vsel %vm325_vm4, %v321_v22, 0 }
 0x4b9   :  { %3165 = vmatpush3.bf16.msra.mxu1 %v327_v23  ;;  %v470_v29 = vpop.permute.xlu1 %469 }
 0x4ba   :  { %3176 = vmatprep.subr.bf16.mxu1 %v3673_v18  ;;  %v475_v32 = vsel %vm196_vm2, %v470_v29, 0 }
 0x4bb   :  { %v418_v33 = vpop.permute.xlu0 %417 }
 0x4bd   :  { %v468_v34 = vpop.permute.xlu1 %467 }
 0x4be   :  { %v3521_v24 = vpop.eup %3520 }
 0x4bf   :  { %v316_v25 = vmul.f32 %v3521_v24, %v3517_v14 }
 0x4c0   :  { %v3523_v26 = vpop.eup %3522 }
 0x4c1   :  { %v317_v27 = vmul.f32 %v3523_v26, %v3519_v16  ;;  %v318_v28 = vpack.c.bf16 %v316_v25, %v316_v25 }
 0x4c3   :  { %3167 = vmatmul.mubr.msk.bf16.vlgmr.msra.gmra.mrb[8].mxu1 %vm196_vm2, %v318_v28  ;;  %v319_v31 = vpack.c.bf16 %v317_v27, %v317_v27 }
 0x4c4   :  { %3177 = vmatpush3.bf16.xpose.msra.mxu1 %v425_v30  ;;  %3178 = vmatprep.mubr.msk.bf16.mxu1 %vm3674_vm1, %v3673_v18 }
 0x4c5   :  { %3173 = vmatmul.mubr.msk.bf16.vlgmr.msra.gmra.mrb[4].mxu0 %vm196_vm2, %v319_v31  ;;  %3188 = vmatprep.subr.bf16.mxu1 %v3673_v18 }
 0x4c6   :  { %3183 = vmatpush3.bf16.xpose.msra.mxu0 %v475_v32  ;;  %3184 = vmatprep.mubr.msk.bf16.mxu0 %vm3674_vm1, %v3673_v18 }
 0x4c7   :  { %3194 = vmatprep.subr.bf16.mxu0 %v3673_v18 }
 0x4cb   :  { %3179 = vmatmul.mubr.msk.bf16.vlgmr.msra.gmra.mrb[12].mxu1 %vm196_vm2, %v418_v33 }
 0x4cc   :  { %3190 = vmatprep.mubr.msk.bf16.mxu1 %vm3674_vm1, %v3673_v18 }
 0x4cd   :  { %3185 = vmatmul.mubr.msk.bf16.vlgmr.msra.gmra.mrb[8].mxu0 %vm196_vm2, %v468_v34 }
 0x4ce   :  { %3196 = vmatprep.mubr.msk.bf16.mxu0 %vm3674_vm1, %v3673_v18 }
 0x596   :  { %v3920_v35 = vpop.f32.mrb[8].mxu1 }
 0x597   :  { %v3168_v36 = vpop.f32.mrb[9].mxu1 }
 0x598   :  { %v366_v37 = vpop.f32.mrb[10].mxu1  ;;  %v3922_v38 = vpop.f32.mrb[4].mxu0 }
 0x599   :  { %v3169_v39 = vpop.f32.mrb[11].mxu1  ;;  %v3174_v40 = vpop.f32.mrb[5].mxu0 }
 0x59a   :  { %v414_v41 = vpop.f32.mrb[6].mxu0 }
 0x59b   :  { %v3175_v43 = vpop.f32.mrb[7].mxu0 }
 0x59e   :  { %v461_v44 = vpop.f32.mrb[12].mxu1 }
 0x59f   :  { %v517_v46 = vmul.f32 0.35355338, %v461_v44  ;;  %v3180_v47 = vpop.f32.mrb[13].mxu1 }
 0x5a0   :  { %v464_v48 = vpop.f32.mrb[14].mxu1  ;;  %v511_v49 = vpop.f32.mrb[8].mxu0 }
 0x5a1   :  { %v518_v50 = vmul.f32 0.35355338, %v511_v49  ;;  %v3181_v52 = vpop.f32.mrb[15].mxu1  ;;  %v3186_v53 = vpop.f32.mrb[9].mxu0  ;;  %v519_v55 = vadd.f32 %v517_v46, %v3880_v54 }
 0x5a2   :  { %v514_v56 = vpop.f32.mrb[10].mxu0 }
 0x5a3   :  { %v3187_v57 = vpop.f32.mrb[11].mxu0  ;;  %v521_v58 = vsel %vm196_vm2, %v519_v55, -inf  ;;  %v520_v59 = vadd.f32 %v518_v50, %v3880_v54 }
 0x5a4   :  { %522 = vmax.xlane.f32.xlu0 %v521_v58 }
 0x5a5   :  { %v524_v60 = vsel %vm196_vm2, %v520_v59, -inf }
 0x5a6   :  { %525 = vmax.xlane.f32.xlu1 %v524_v60 }
 0x5b7   :  { %593 = vrot.lane.b32.xlu1 %v3858_v45, %s3679_s22 }
 0x5bb   :  { %643 = vrot.lane.b32.xlu1 %v3856_v42, %s3680_s23 }
 0x5bf   :  { %693 = vrot.lane.b32.xlu1 %v3858_v45, %s3680_s23 }
 0x5c3   :  { %691 = vrot.lane.b32.xlu1 %v3858_v45, %s3681_s24 }
 0x631   :  { %v523_v61 = vpop.xlane.xlu0 %522 }
 0x632   :  { %v527_v62 = vsub.f32 %v519_v55, %v523_v61 }
 0x633   :  { %v526_v63 = vpop.xlane.xlu1 %525 }
 0x634   :  { %v529_v0 = vmul.f32 1.442695, %v527_v62  ;;  %v528_v1 = vsub.f32 %v520_v59, %v526_v63 }
 0x636   :  { %3524 = vpow2.f32 %v529_v0  ;;  %v531_v2 = vmul.f32 1.442695, %v528_v1 }
 0x637   :  { %v594_v5 = vpop.permute.xlu1 %593 }
 0x638   :  { %3526 = vpow2.f32 %v531_v2  ;;  %v599_v6 = vsel %vm325_vm4, %v594_v5, 0 }
 0x639   :  { %3195 = vmatpush3.bf16.msra.mxu0 %v599_v6 }
 0x63a   :  { %3206 = vmatprep.subr.bf16.mxu0 %v3673_v18 }
 0x63b   :  { %v644_v16 = vpop.permute.xlu1 %643 }
 0x63c   :  { %v649_v23 = vsel %vm196_vm2, %v644_v16, 0 }
 0x63f   :  { %v694_v22 = vpop.permute.xlu1 %693 }
 0x640   :  { %v3525_v7 = vpop.eup %3524  ;;  %v699_v25 = vsel %vm196_vm2, %v694_v22, 0 }
 0x641   :  { %v533_v8 = vsel %vm196_vm2, %v3525_v7, 0.0 }
 0x642   :  { %v3527_v9 = vpop.eup %3526  ;;  %534 = vadd.xlane.f32.xlu0 %v533_v8 }
 0x643   :  { %v536_v10 = vsel %vm196_vm2, %v3527_v9, 0.0  ;;  %v692_v27 = vpop.permute.xlu1 %691 }
 0x646   :  { %537 = vadd.xlane.f32.xlu0 %v536_v10 }
 0x65c   :  { %545 = vrot.lane.b32.xlu0 %v3856_v42, %s3679_s22 }
 0x660   :  { %641 = vrot.lane.b32.xlu0 %v3856_v42, %s3681_s24 }
 0x6cf   :  { %v535_v11 = vpop.xlane.xlu0 %534 }
 0x6d0   :  { %3528 = vrcp.f32 %v535_v11 }
 0x6d3   :  { %v538_v12 = vpop.xlane.xlu0 %537 }
 0x6d4   :  { %3530 = vrcp.f32 %v538_v12 }
 0x6d7   :  { %v546_v13 = vpop.permute.xlu0 %545 }
 0x6d8   :  { %v551_v14 = vsel %vm325_vm4, %v546_v13, 0 }
 0x6d9   :  { %3189 = vmatpush3.bf16.msra.mxu1 %v551_v14 }
 0x6da   :  { %v3529_v15 = vpop.eup %3528  ;;  %3200 = vmatprep.subr.bf16.mxu1 %v3673_v18 }
 0x6db   :  { %v541_v17 = vmul.f32 %v3529_v15, %v3525_v7  ;;  %v642_v26 = vpop.permute.xlu0 %641 }
 0x6dd   :  { %v543_v19 = vpack.c.bf16 %v541_v17, %v541_v17 }
 0x6de   :  { %v3531_v20 = vpop.eup %3530 }
 0x6df   :  { %v542_v21 = vmul.f32 %v3531_v20, %v3527_v9  ;;  %3191 = vmatmul.mubr.msk.bf16.vlgmr.msra.gmra.mrb[16].mxu1 %vm196_vm2, %v543_v19 }
 0x6e0   :  { %3202 = vmatprep.mubr.msk.bf16.mxu1 %vm3674_vm1, %v3673_v18 }
 0x6e1   :  { %v544_v24 = vpack.c.bf16 %v542_v21, %v542_v21 }
 0x6e2   :  { %3201 = vmatpush3.bf16.xpose.msra.mxu1 %v649_v23 }
 0x6e3   :  { %3197 = vmatmul.mubr.msk.bf16.vlgmr.msra.gmra.mrb[12].mxu0 %vm196_vm2, %v544_v24  ;;  %3212 = vmatprep.subr.bf16.mxu1 %v3673_v18 }
 0x6e4   :  { %3207 = vmatpush3.bf16.xpose.msra.mxu0 %v699_v25  ;;  %3208 = vmatprep.mubr.msk.bf16.mxu0 %vm3674_vm1, %v3673_v18 }
 0x6e5   :  { %3218 = vmatprep.subr.bf16.mxu0 %v3673_v18 }
 0x6e9   :  { %3203 = vmatmul.mubr.msk.bf16.vlgmr.msra.gmra.mrb[20].mxu1 %vm196_vm2, %v642_v26 }
 0x6ea   :  { %3214 = vmatprep.mubr.msk.bf16.mxu1 %vm3674_vm1, %v3673_v18 }
 0x6eb   :  { %3209 = vmatmul.mubr.msk.bf16.vlgmr.msra.gmra.mrb[16].mxu0 %vm196_vm2, %v692_v27 }
 0x6ec   :  { %3220 = vmatprep.mubr.msk.bf16.mxu0 %vm3674_vm1, %v3673_v18 }
 0x7b2   :  { %v3962_v28 = vpop.f32.mrb[16].mxu1 }
 0x7b3   :  { %v3192_v29 = vpop.f32.mrb[17].mxu1 }
 0x7b4   :  { %v590_v30 = vpop.f32.mrb[18].mxu1 }
 0x7b5   :  { %v3193_v31 = vpop.f32.mrb[19].mxu1 }
 0x7b6   :  { %v3964_v32 = vpop.f32.mrb[12].mxu0 }
 0x7b7   :  { %v3452_v33 = vpack.i.bf16 %v3964_v32, %v3962_v28  ;;  %v3198_v34 = vpop.f32.mrb[13].mxu0 }
 0x7b8   :  { %v638_v36 = vpop.f32.mrb[14].mxu0 }
 0x7b9   :  { %v3199_v37 = vpop.f32.mrb[15].mxu0 }
 0x7bc   :  { %v685_v39 = vpop.f32.mrb[20].mxu1 }
 0x7bd   :  { %v741_v40 = vmul.f32 0.35355338, %v685_v39  ;;  %v3204_v41 = vpop.f32.mrb[21].mxu1 }
 0x7be   :  { %v688_v43 = vpop.f32.mrb[22].mxu1  ;;  %v735_v44 = vpop.f32.mrb[16].mxu0 }
 0x7bf   :  { %v742_v46 = vmul.f32 0.35355338, %v735_v44  ;;  %v3205_v47 = vpop.f32.mrb[23].mxu1  ;;  %v3210_v48 = vpop.f32.mrb[17].mxu0  ;;  %v743_v49 = vadd.f32 %v741_v40, %v3880_v54 }
 0x7c0   :  { %v738_v50 = vpop.f32.mrb[18].mxu0 }
 0x7c1   :  { %v3211_v52 = vpop.f32.mrb[19].mxu0  ;;  %v745_v53 = vsel %vm196_vm2, %v743_v49, -inf  ;;  %v744_v55 = vadd.f32 %v742_v46, %v3880_v54 }
 0x7c2   :  { %746 = vmax.xlane.f32.xlu0 %v745_v53 }
 0x7c3   :  { %v748_v56 = vsel %vm196_vm2, %v744_v55, -inf }
 0x7c4   :  { %749 = vmax.xlane.f32.xlu1 %v748_v56 }
 0x7d5   :  { %817 = vrot.lane.b32.xlu1 %v3858_v45, %s3682_s2 }
 0x7d9   :  { %867 = vrot.lane.b32.xlu1 %v3856_v42, %s4504_s25 }
 0x7dd   :  { %917 = vrot.lane.b32.xlu1 %v3858_v45, %s4504_s25 }
 0x7e1   :  { %915 = vrot.lane.b32.xlu1 %v3858_v45, %s4502_s3 }
 0x84f   :  { %v747_v57 = vpop.xlane.xlu0 %746 }
 0x850   :  { %v751_v58 = vsub.f32 %v743_v49, %v747_v57 }
 0x851   :  { %v750_v59 = vpop.xlane.xlu1 %749 }
 0x852   :  { %v753_v60 = vmul.f32 1.442695, %v751_v58  ;;  %v752_v61 = vsub.f32 %v744_v55, %v750_v59 }
 0x854   :  { %3532 = vpow2.f32 %v753_v60  ;;  %v755_v62 = vmul.f32 1.442695, %v752_v61 }
 0x855   :  { %v818_v63 = vpop.permute.xlu1 %817 }
 0x856   :  { %3534 = vpow2.f32 %v755_v62  ;;  %v823_v0 = vsel %vm325_vm4, %v818_v63, 0 }
 0x857   :  { %3219 = vmatpush3.bf16.msra.mxu0 %v823_v0 }
 0x858   :  { %3230 = vmatprep.subr.bf16.mxu0 %v3673_v18 }
 0x859   :  { %v868_v12 = vpop.permute.xlu1 %867 }
 0x85a   :  { %v873_v19 = vsel %vm196_vm2, %v868_v12, 0  ;;  %v3485_v12 = vld [vmem:[%s4479_s8 + $0x8] sm:$0xff]  }
 0x85d   :  { %v918_v17 = vpop.permute.xlu1 %917 }
 0x85e   :  { %v3533_v1 = vpop.eup %3532  ;;  %v923_v21 = vsel %vm196_vm2, %v918_v17, 0 }
 0x85f   :  { %v757_v2 = vsel %vm196_vm2, %v3533_v1, 0.0 }
 0x860   :  { %v3535_v5 = vpop.eup %3534  ;;  %758 = vadd.xlane.f32.xlu0 %v757_v2 }
 0x861   :  { %v760_v6 = vsel %vm196_vm2, %v3535_v5, 0.0  ;;  %v916_v23 = vpop.permute.xlu1 %915 }
 0x864   :  { %761 = vadd.xlane.f32.xlu0 %v760_v6 }
 0x87a   :  { %769 = vrot.lane.b32.xlu0 %v3856_v42, %s3682_s2 }
 0x87e   :  { %865 = vrot.lane.b32.xlu0 %v3856_v42, %s4502_s3 }
 0x8ed   :  { %v759_v7 = vpop.xlane.xlu0 %758 }
 0x8ee   :  { %3536 = vrcp.f32 %v759_v7 }
 0x8f1   :  { %v762_v8 = vpop.xlane.xlu0 %761 }
 0x8f2   :  { %3538 = vrcp.f32 %v762_v8 }
 0x8f5   :  { %v770_v9 = vpop.permute.xlu0 %769 }
 0x8f6   :  { %v775_v10 = vsel %vm325_vm4, %v770_v9, 0 }
 0x8f7   :  { %3213 = vmatpush3.bf16.msra.mxu1 %v775_v10 }
 0x8f8   :  { %v3537_v11 = vpop.eup %3536  ;;  %3224 = vmatprep.subr.bf16.mxu1 %v3673_v18 }
 0x8f9   :  { %v765_v13 = vmul.f32 %v3537_v11, %v3533_v1  ;;  %v866_v22 = vpop.permute.xlu0 %865  ;;  %v3484_v11 = vld [vmem:[%s4479_s8] sm:$0xff]  }
 0x8fb   :  { %v767_v14 = vpack.c.bf16 %v765_v13, %v765_v13 }
 0x8fc   :  { %v3539_v15 = vpop.eup %3538 }
 0x8fd   :  { %v766_v16 = vmul.f32 %v3539_v15, %v3535_v5  ;;  %3215 = vmatmul.mubr.msk.bf16.vlgmr.msra.gmra.mrb[24].mxu1 %vm196_vm2, %v767_v14 }
 0x8fe   :  { %3226 = vmatprep.mubr.msk.bf16.mxu1 %vm3674_vm1, %v3673_v18 }
 0x8ff   :  { %v768_v20 = vpack.c.bf16 %v766_v16, %v766_v16 }
 0x900   :  { %3225 = vmatpush3.bf16.xpose.msra.mxu1 %v873_v19 }
 0x901   :  { %3221 = vmatmul.mubr.msk.bf16.vlgmr.msra.gmra.mrb[20].mxu0 %vm196_vm2, %v768_v20  ;;  %3236 = vmatprep.subr.bf16.mxu1 %v3673_v18 }
 0x902   :  { %3231 = vmatpush3.bf16.xpose.msra.mxu0 %v923_v21  ;;  %3232 = vmatprep.mubr.msk.bf16.mxu0 %vm3674_vm1, %v3673_v18 }
 0x903   :  { %3242 = vmatprep.subr.bf16.mxu0 %v3673_v18 }
 0x907   :  { %3227 = vmatmul.mubr.msk.bf16.vlgmr.msra.gmra.mrb[28].mxu1 %vm196_vm2, %v866_v22 }
 0x908   :  { %3238 = vmatprep.mubr.msk.bf16.mxu1 %vm3674_vm1, %v3673_v18 }
 0x909   :  { %3233 = vmatmul.mubr.msk.bf16.vlgmr.msra.gmra.mrb[24].mxu0 %vm196_vm2, %v916_v23 }
 0x90a   :  { %3244 = vmatprep.mubr.msk.bf16.mxu0 %vm3674_vm1, %v3673_v18 }
 0x9d0   :  { %v811_v24 = vpop.f32.mrb[24].mxu1 }
 0x9d1   :  { %v3216_v25 = vpop.f32.mrb[25].mxu1 }
 0x9d2   :  { %v814_v26 = vpop.f32.mrb[26].mxu1 }
 0x9d3   :  { %v3217_v27 = vpop.f32.mrb[27].mxu1 }
 0x9d4   :  { %v859_v29 = vpop.f32.mrb[20].mxu0 }
 0x9d5   :  { %v3457_v30 = vpack.i.bf16 %v859_v29, %v811_v24  ;;  %v3222_v31 = vpop.f32.mrb[21].mxu0 }
 0x9d6   :  { %v862_v34 = vpop.f32.mrb[22].mxu0 }
 0x9d7   :  { %v3223_v36 = vpop.f32.mrb[23].mxu0 }
 0x9da   :  { %v909_v37 = vpop.f32.mrb[28].mxu1 }
 0x9db   :  { %v965_v39 = vmul.f32 0.35355338, %v909_v37  ;;  %v3228_v40 = vpop.f32.mrb[29].mxu1 }
 0x9dc   :  { %v912_v41 = vpop.f32.mrb[30].mxu1  ;;  %v959_v43 = vpop.f32.mrb[24].mxu0 }
 0x9dd   :  { %v966_v44 = vmul.f32 0.35355338, %v959_v43  ;;  %v3229_v46 = vpop.f32.mrb[31].mxu1  ;;  %v3234_v47 = vpop.f32.mrb[25].mxu0  ;;  %v967_v48 = vadd.f32 %v965_v39, %v3880_v54 }
 0x9de   :  { %v962_v49 = vpop.f32.mrb[26].mxu0 }
 0x9df   :  { %v3235_v50 = vpop.f32.mrb[27].mxu0  ;;  %v969_v52 = vsel %vm196_vm2, %v967_v48, -inf  ;;  %v968_v53 = vadd.f32 %v966_v44, %v3880_v54 }
 0x9e0   :  { %970 = vmax.xlane.f32.xlu0 %v969_v52 }
 0x9e1   :  { %v972_v55 = vsel %vm196_vm2, %v968_v53, -inf }
 0x9e2   :  { %973 = vmax.xlane.f32.xlu1 %v972_v55 }
 0x9f3   :  { %1041 = vrot.lane.b32.xlu1 %v3858_v45, %s4500_s26 }
 0x9f7   :  { %3453 = vrot.lane.b32.xlu1 %v3452_v33, %s4497_s28 }
 0x9fb   :  { %3458 = vrot.lane.b32.xlu1 %v3457_v30, %s4496_s4 }
 0xa6d   :  { %v971_v56 = vpop.xlane.xlu0 %970 }
 0xa6e   :  { %v975_v57 = vsub.f32 %v967_v48, %v971_v56 }
 0xa6f   :  { %v974_v58 = vpop.xlane.xlu1 %973 }
 0xa70   :  { %v977_v59 = vmul.f32 1.442695, %v975_v57  ;;  %v976_v60 = vsub.f32 %v968_v53, %v974_v58 }
 0xa72   :  { %3540 = vpow2.f32 %v977_v59  ;;  %v979_v61 = vmul.f32 1.442695, %v976_v60 }
 0xa73   :  { %v1042_v62 = vpop.permute.xlu1 %1041 }
 0xa74   :  { %3542 = vpow2.f32 %v979_v61  ;;  %v1047_v45 = vsel %vm325_vm4, %v1042_v62, 0 }
 0xa75   :  { %3243 = vmatpush3.bf16.msra.mxu0 %v1047_v45 }
 0xa76   :  { %3256 = vmatprep.subr.bf16.mxu0 %v3673_v18 }
 0xa77   :  { %v3454_v23 = vpop.permute.xlu1 %3453 }
 0xa78   :  { %v3456_v25 = vunpack.i.h.bf16 %v3454_v23  ;;  %v3455_v26 = vunpack.i.l.bf16 %v3454_v23  ;;  %v3493_v23 = vld [vmem:[%s4485_s14 + $0x28] sm:$0xff]  }
 0xa7a   :  { %v1114_v31 = vsel %vm196_vm2, %v3922_v38, %v3456_v25  ;;  %v1113_v34 = vsel %vm196_vm2, %v3920_v35, %v3455_v26  ;;  %v2942_v35 = vld [vmem:[%s4480_s9] ss:$0 sm:$0xff]  ;;  %v3495_v25 = vld [vmem:[%s4485_s14 + $0x38] sm:$0xff]  }
 0xa7b   :  { %v3459_v24 = vpop.permute.xlu1 %3458 }
 0xa7c   :  { %v3541_v63 = vpop.eup %3540  ;;  %v3461_v27 = vunpack.i.h.bf16 %v3459_v24  ;;  %v3460_v29 = vunpack.i.l.bf16 %v3459_v24  ;;  %v3494_v24 = vld [vmem:[%s4485_s14 + $0x30] sm:$0xff]  }
 0xa7d   :  { %v981_v28 = vsel %vm196_vm2, %v3541_v63, 0.0 }
 0xa7e   :  { %v3543_v32 = vpop.eup %3542  ;;  %982 = vadd.xlane.f32.xlu0 %v981_v28  ;;  %v1116_v39 = vsel %vm1115_vm5, %v1113_v34, %v3460_v29  ;;  %v1117_v40 = vsel %vm1115_vm5, %v1114_v31, %v3461_v27  ;;  %v3486_v28 = vld [vmem:[%s4483_s12] sm:$0xff]  }
 0xa7f   :  { %v984_v33 = vsel %vm196_vm2, %v3543_v32, 0.0 }
 0xa82   :  { %985 = vadd.xlane.f32.xlu0 %v984_v33 }
 0xa98   :  { %993 = vrot.lane.b32.xlu0 %v3856_v42, %s4500_s26 }
 0xb0b   :  { %v983_v0 = vpop.xlane.xlu0 %982 }
 0xb0c   :  { %3544 = vrcp.f32 %v983_v0 }
 0xb0f   :  { %v986_v1 = vpop.xlane.xlu0 %985 }
 0xb10   :  { %3546 = vrcp.f32 %v986_v1 }
 0xb13   :  { %v994_v2 = vpop.permute.xlu0 %993 }
 0xb14   :  { %v999_v5 = vsel %vm325_vm4, %v994_v2, 0 }
 0xb15   :  { %3237 = vmatpush3.bf16.msra.mxu1 %v999_v5 }
 0xb16   :  { %v3545_v6 = vpop.eup %3544  ;;  %3248 = vmatprep.subr.bf16.mxu1 %v3673_v18 }
 0xb17   :  { %v989_v7 = vmul.f32 %v3545_v6, %v3541_v63 }
 0xb19   :  { %v991_v8 = vpack.c.bf16 %v989_v7, %v989_v7 }
 0xb1a   :  { %v3547_v9 = vpop.eup %3546 }
 0xb1b   :  { %v990_v10 = vmul.f32 %v3547_v9, %v3543_v32  ;;  %3239 = vmatmul.mubr.msk.bf16.vlgmr.msra.gmra.mrb[32].mxu1 %vm196_vm2, %v991_v8  ;;  %v3487_v32 = vld [vmem:[%s4483_s12 + $0x8] sm:$0xff]   ;;  %v2946_v9 = vld [vmem:[%s4481_s10] ss:$0 sm:$0xff] }
 0xb1c   :  { %3252 = vmatprep.mubr.msk.bf16.mxu1 %vm3674_vm1, %v3673_v18  ;;  %3249 = vmatpush3.bf16.msra.mxu1 %v3484_v11 }
 0xb1d   :  { %v992_v42 = vpack.c.bf16 %v990_v10, %v990_v10  ;;  %3250 = vmatprep.subr.bf16.mxu1 %v3673_v18 }
 0xb1f   :  { %3245 = vmatmul.mubr.msk.bf16.vlgmr.msra.gmra.mrb[28].mxu0 %vm196_vm2, %v992_v42 }
 0xb20   :  { %3260 = vmatprep.mubr.msk.bf16.mxu0 %vm3674_vm1, %v3673_v18  ;;  %3251 = vmatpush3.bf16.msra.mxu1 %v3485_v12  ;;  %v2947_v12 = vld [vmem:[%s4482_s11] ss:$0 sm:$0xff] }
 0xb21   :  { %3264 = vmatprep.subr.bf16.mxu1 %v3673_v18  ;;  %3257 = vmatpush3.bf16.msra.mxu0 %v3486_v28 }
 0xb22   :  { %3258 = vmatprep.subr.bf16.mxu0 %v3673_v18 }
 0xb25   :  { %3259 = vmatpush3.bf16.msra.mxu0 %v3487_v32 }
 0xb26   :  { %3284 = vmatprep.subr.bf16.mxu0 %v3673_v18 }
 0xbee   :  { %v1035_v13 = vpop.f32.mrb[32].mxu1 }
 0xbef   :  { %v3240_v14 = vpop.f32.mrb[33].mxu1 }
 0xbf0   :  { %v1038_v15 = vpop.f32.mrb[34].mxu1 }
 0xbf1   :  { %v3241_v16 = vpop.f32.mrb[35].mxu1 }
 0xbf2   :  { %v1083_v17 = vpop.f32.mrb[28].mxu0 }
 0xbf3   :  { %v3462_v19 = vpack.i.bf16 %v1083_v17, %v1035_v13  ;;  %v3246_v20 = vpop.f32.mrb[29].mxu0  ;;  %v3488_v17 = vld [vmem:[%s4485_s14] sm:$0xff]  }
 0xbf4   :  { %v1086_v21 = vpop.f32.mrb[30].mxu0  ;;  %v3490_v20 = vld [vmem:[%s4485_s14 + $0x10] sm:$0xff]  }
 0xbf5   :  { %3463 = vrot.lane.b32.xlu0 %v3462_v19, %s4499_s29  ;;  %v3247_v22 = vpop.f32.mrb[31].mxu0  ;;  %v3489_v19 = vld [vmem:[%s4485_s14 + $0x8] sm:$0xff]   ;;  %v3491_v21 = vld [vmem:[%s4485_s14 + $0x18] sm:$0xff]   ;;  %s4516_s29 = sld [smem:[#allocation16_spill]] }
 0xbf6   :  { %v3492_v22 = vld [vmem:[%s4485_s14 + $0x20] sm:$0xff]  }
 0xbfb   :  { %v2948_v26 = vld [vmem:[%s4516_s29] ss:$0 sm:$0xff] }
 0xc67   :  { %v3464_v30 = vpop.permute.xlu0 %3463 }
 0xc68   :  { %v3466_v36 = vunpack.i.h.bf16 %v3464_v30  ;;  %v3465_v37 = vunpack.i.l.bf16 %v3464_v30 }
 0xc6a   :  { %v1120_v41 = vsel %vm1118_vm6, %v1117_v40, %v3466_v36  ;;  %v1119_v43 = vsel %vm1118_vm6, %v1116_v39, %v3465_v37 }
 0xc6b   :  { %v1121_v44 = vpack.c.bf16 %v1120_v41, %v1119_v43 }
 0xc6d   :  { %3253 = vmatmul.mubr.msk.bf16.vlgmr.msra.gmra.mrb[36].mxu1 %vm85_vm0, %v1121_v44 }
 0xc6e   :  { %3280 = vmatprep.mubr.msk.bf16.mxu1 %vm3674_vm1, %v3673_v18  ;;  %3265 = vmatpush3.bf16.msra.mxu1 %v3488_v17 }
 0xc6f   :  { %3266 = vmatprep.subr.bf16.mxu1 %v3673_v18 }
 0xc72   :  { %3267 = vmatpush3.bf16.msra.mxu1 %v3489_v19 }
 0xc73   :  { %3268 = vmatprep.subr.bf16.mxu1 %v3673_v18 }
 0xc76   :  { %3269 = vmatpush3.bf16.msra.mxu1 %v3490_v20 }
 0xc77   :  { %3270 = vmatprep.subr.bf16.mxu1 %v3673_v18 }
 0xc7a   :  { %3271 = vmatpush3.bf16.msra.mxu1 %v3491_v21 }
 0xc7b   :  { %3272 = vmatprep.subr.bf16.mxu1 %v3673_v18 }
 0xc7e   :  { %3273 = vmatpush3.bf16.msra.mxu1 %v3492_v22  ;;  %v2964_v22 = vld [vmem:[%s4476_s5 + $0x1] ss:$0 sm:$0xff]  ;;  %s4518_s5 = smov 72  }
 0xc7f   :  { %3274 = vmatprep.subr.bf16.mxu1 %v3673_v18 }
 0xc82   :  { %3275 = vmatpush3.bf16.msra.mxu1 %v3493_v23 }
 0xc83   :  { %3276 = vmatprep.subr.bf16.mxu1 %v3673_v18 }
 0xc86   :  { %3277 = vmatpush3.bf16.msra.mxu1 %v3494_v24 }
 0xc87   :  { %3278 = vmatprep.subr.bf16.mxu1 %v3673_v18 }
 0xc8a   :  { %3279 = vmatpush3.bf16.msra.mxu1 %v3495_v25 }
 0xc8b   :  { %3310 = vmatprep.subr.bf16.mxu1 %v3673_v18 }
 0xd40   :  { %v1180_v38 = vpop.f32.mrb[36].mxu1 }
 0xd41   :  { %v1181_v46 = vadd.f32 %v2942_v35, %v1180_v38  ;;  %v3254_v47 = vpop.f32.mrb[37].mxu1 }
 0xd42   :  { %v1183_v48 = vpop.f32.mrb[38].mxu1 }
 0xd43   :  { %v4055_v49 = vadd.f32 %v1181_v46, %v3818_v3  ;;  %v1184_v50 = vadd.f32 %v2942_v35, %v1183_v48  ;;  %v3255_v52 = vpop.f32.mrb[39].mxu1 }
 0xd45   :  { %v4058_v53 = vadd.f32 %v1184_v50, %v3820_v4  ;;  %v1191_v55 = vsel %vm85_vm0, %v4055_v49, 0.0 }
 0xd46   :  { %1192 = vadd.xlane.f32.xlu1 %v1191_v55  ;;  %v2954_v55 = vld [vmem:[%s4486_s15] ss:$0 sm:$0xff] }
 0xd47   :  { %v1194_v56 = vsel %vm85_vm0, %v4058_v53, 0.0 }
 0xd48   :  { %1195 = vadd.xlane.f32.xlu0 %v1194_v56 }
 0xdd3   :  { %v1193_v57 = vpop.xlane.xlu1 %1192 }
 0xdd4   :  { %v1197_v58 = vmul.f32 0.03125, %v1193_v57 }
 0xdd5   :  { %v1196_v59 = vpop.xlane.xlu0 %1195 }
 0xdd6   :  { %v1199_v60 = vsub.f32 %v4055_v49, %v1197_v58  ;;  %v1198_v3 = vmul.f32 0.03125, %v1196_v59 }
 0xdd8   :  { %v1200_v61 = vsub.f32 %v4058_v53, %v1198_v3  ;;  %v1201_v62 = vmul.f32 %v1199_v60, %v1199_v60 }
 0xdda   :  { %v1203_v4 = vsel %vm85_vm0, %v1201_v62, 0.0  ;;  %v1202_v45 = vmul.f32 %v1200_v61, %v1200_v61 }
 0xddb   :  { %1204 = vadd.xlane.f32.xlu0 %v1203_v4 }
 0xddc   :  { %v1206_v63 = vsel %vm85_vm0, %v1202_v45, 0.0 }
 0xddf   :  { %1207 = vadd.xlane.f32.xlu0 %v1206_v63 }
 0xe68   :  { %v1205_v33 = vpop.xlane.xlu0 %1204 }
 0xe69   :  { %v1209_v0 = vmul.f32 0.03125, %v1205_v33 }
 0xe6b   :  { %v1211_v1 = vadd.f32 1e-05, %v1209_v0 }
 0xe6c   :  { %v1208_v2 = vpop.xlane.xlu0 %1207 }
 0xe6d   :  { %3548 = vrsqrt.f32 %v1211_v1  ;;  %v1210_v5 = vmul.f32 0.03125, %v1208_v2 }
 0xe6f   :  { %v1212_v6 = vadd.f32 1e-05, %v1210_v5 }
 0xe71   :  { %3550 = vrsqrt.f32 %v1212_v6 }
 0xe77   :  { %v3549_v7 = vpop.eup %3548 }
 0xe78   :  { %v1215_v8 = vmul.f32 %v3549_v7, %v1199_v60  ;;  %v1424_v60 = vld [vmem:[%s4517_s30] sm:$0xff] }
 0xe7a   :  { %v1221_v42 = vmul.f32 %v2946_v9, %v1215_v8  ;;  %v3496_v8 = vld [vmem:[%s4477_s6 + $0x10] sm:$0xff]  }
 0xe7b   :  { %v3551_v10 = vpop.eup %3550 }
 0xe7c   :  { %v1216_v11 = vmul.f32 %v3551_v10, %v1200_v61  ;;  %v1227_v14 = vadd.f32 %v2947_v12, %v1221_v42 }
 0xe7e   :  { %v1222_v13 = vmul.f32 %v2946_v9, %v1216_v11  ;;  %v3497_v9 = vld [vmem:[%s4477_s6 + $0x18] sm:$0xff]  }
 0xe80   :  { %v1228_v15 = vadd.f32 %v2947_v12, %v1222_v13 }
 0xe82   :  { %v1229_v16 = vpack.c.bf16 %v1228_v15, %v1227_v14 }
 0xe84   :  { %3261 = vmatmul.mubr.msk.bf16.vlgmr.msra.gmra.mrb[32].mxu0 %vm85_vm0, %v1229_v16  ;;  %v2963_v16 = vld [vmem:[%s4515_s27 + $0x1] ss:$0 sm:$0xff]  ;;  %s4520_s27 = smov 40  }
 0xe85   :  { %3288 = vmatprep.mubr.msk.bf16.mxu0 %vm3674_vm1, %v3673_v18  ;;  %3285 = vmatpush3.bf16.msra.mxu0 %v3496_v8 }
 0xe86   :  { %3286 = vmatprep.subr.bf16.mxu0 %v3673_v18 }
 0xe89   :  { %3287 = vmatpush3.bf16.msra.mxu0 %v3497_v9 }
 0xe8a   :  { %3292 = vmatprep.subr.bf16.mxu0 %v3673_v18 }
 0xf57   :  { %v1288_v27 = vpop.f32.mrb[32].mxu0 }
 0xf58   :  { %v1289_v29 = vadd.f32 %v2948_v26, %v1288_v27  ;;  %v3262_v30 = vpop.f32.mrb[33].mxu0  ;;  %v2969_v27 = vld [vmem:[%s4478_s7 + $0x1] ss:$0 sm:$0xff]  ;;  %s4519_s7 = smov 104  }
 0xf59   :  { %v1291_v31 = vpop.f32.mrb[34].mxu0 }
 0xf5a   :  { %v2952_v34 = vmul.f32 -1.702, %v1289_v29  ;;  %v1292_v36 = vadd.f32 %v2948_v26, %v1291_v31  ;;  %v3263_v37 = vpop.f32.mrb[35].mxu0 }
 0xf5c   :  { %v1299_v39 = vmul.f32 1.442695, %v2952_v34  ;;  %v2953_v40 = vmul.f32 -1.702, %v1292_v36 }
 0xf5e   :  { %3552 = vpow2.f32 %v1299_v39  ;;  %v1301_v41 = vmul.f32 1.442695, %v2953_v40 }
 0xf60   :  { %3554 = vpow2.f32 %v1301_v41 }
 0xf68   :  { %v3553_v43 = vpop.eup %3552 }
 0xf69   :  { %v1303_v44 = vadd.f32 1.0, %v3553_v43 }
 0xf6a   :  { %v3555_v35 = vpop.eup %3554 }
 0xf6b   :  { %3556 = vrcp.f32 %v1303_v44  ;;  %v1304_v38 = vadd.f32 1.0, %v3555_v35 }
 0xf6d   :  { %3558 = vrcp.f32 %v1304_v38 }
 0xf75   :  { %v3557_v46 = vpop.eup %3556 }
 0xf76   :  { %v1309_v48 = vmul.f32 %v3557_v46, %v1289_v29 }
 0xf77   :  { %v3559_v47 = vpop.eup %3558 }
 0xf78   :  { %v1310_v50 = vmul.f32 %v3559_v47, %v1292_v36 }
 0xf7a   :  { %v1311_v52 = vpack.c.bf16 %v1310_v50, %v1309_v48 }
 0xf7c   :  { %3281 = vmatmul.mubr.bf16.vlgmr.msra.gmra.mrb[40].mxu1 %v1311_v52 }
 0xf7d   :  { %3312 = vmatprep.mubr.msk.bf16.mxu1 %vm3674_vm1, %v3673_v18 }
0x104f   :  { %v1415_v56 = vpop.f32.mrb[40].mxu1 }
0x1050   :  { %v1416_v57 = vadd.f32 %v2954_v55, %v1415_v56  ;;  %v3282_v58 = vpop.f32.mrb[41].mxu1 }
0x1051   :  { %v1418_v59 = vpop.f32.mrb[42].mxu1 }
0x1052   :  { %v1422_v3 = vadd.f32 %v1416_v57, %v4055_v49  ;;  %v1419_v61 = vadd.f32 %v2954_v55, %v1418_v59  ;;  %v3283_v62 = vpop.f32.mrb[43].mxu1 }
0x1054   :  { %v1423_v4 = vadd.f32 %v1419_v61, %v4058_v53  ;;  %v4132_v45 = vsel %vm77_vm9, %v1424_v60, %v1422_v3 }
0x1055   :  { %v1431_v51 = vsel %vm85_vm0, %v4132_v45, 0.0 }
0x1056   :  { %1432 = vadd.xlane.f32.xlu1 %v1431_v51  ;;  %v4136_v63 = vsel %vm77_vm9, %v1424_v60, %v1423_v4 }
0x1057   :  { %v1434_v28 = vsel %vm85_vm0, %v4136_v63, 0.0 }
0x1058   :  { %1435 = vadd.xlane.f32.xlu0 %v1434_v28 }
0x10e3   :  { %v1433_v32 = vpop.xlane.xlu1 %1432 }
0x10e4   :  { %v1437_v33 = vmul.f32 0.03125, %v1433_v32 }
0x10e5   :  { %v1436_v0 = vpop.xlane.xlu0 %1435 }
0x10e6   :  { %v1439_v49 = vsub.f32 %v4132_v45, %v1437_v33  ;;  %v1438_v1 = vmul.f32 0.03125, %v1436_v0 }
0x10e8   :  { %v1440_v53 = vsub.f32 %v4136_v63, %v1438_v1  ;;  %v1441_v2 = vmul.f32 %v1439_v49, %v1439_v49 }
0x10ea   :  { %v1443_v5 = vsel %vm85_vm0, %v1441_v2, 0.0  ;;  %v1442_v6 = vmul.f32 %v1440_v53, %v1440_v53 }
0x10eb   :  { %1444 = vadd.xlane.f32.xlu1 %v1443_v5 }
0x10ec   :  { %v1446_v7 = vsel %vm85_vm0, %v1442_v6, 0.0 }
0x10ed   :  { %1447 = vadd.xlane.f32.xlu0 %v1446_v7 }
0x1178   :  { %v1445_v10 = vpop.xlane.xlu1 %1444 }
0x1179   :  { %v1449_v42 = vmul.f32 0.03125, %v1445_v10 }
0x117a   :  { %v1448_v11 = vpop.xlane.xlu0 %1447 }
0x117b   :  { %v1451_v12 = vadd.f32 1e-05, %v1449_v42  ;;  %v1450_v13 = vmul.f32 0.03125, %v1448_v11 }
0x117d   :  { %3560 = vrsqrt.f32 %v1451_v12  ;;  %v1452_v14 = vadd.f32 1e-05, %v1450_v13 }
0x117f   :  { %3562 = vrsqrt.f32 %v1452_v14 }
0x1187   :  { %v3561_v15 = vpop.eup %3560 }
0x1188   :  { %v1455_v17 = vmul.f32 %v3561_v15, %v1439_v49 }
0x1189   :  { %v3563_v19 = vpop.eup %3562 }
0x118a   :  { %v1461_v20 = vmul.f32 %v2963_v16, %v1455_v17  ;;  %v1456_v21 = vmul.f32 %v3563_v19, %v1440_v53 }
0x118c   :  { %v1462_v23 = vmul.f32 %v2963_v16, %v1456_v21  ;;  %v1467_v24 = vadd.f32 %v2964_v22, %v1461_v20 }
0x118e   :  { %v1468_v25 = vadd.f32 %v2964_v22, %v1462_v23 }
0x1190   :  { %v1469_v26 = vpack.c.bf16 %v1468_v25, %v1467_v24 }
0x1192   :  { %3289 = vmatmul.mubr.msk.bf16.vlgmr.msra.gmra.mrb[36].mxu0 %vm85_vm0, %v1469_v26 }
0x1193   :  { %3294 = vmatprep.mubr.msk.bf16.mxu0 %vm3674_vm1, %v3673_v18 }
0x1265   :  { %v1529_v29 = vpop.f32.mrb[36].mxu0 }
0x1266   :  { %v1530_v30 = vadd.f32 %v2969_v27, %v1529_v29  ;;  %v3290_v31 = vpop.f32.mrb[37].mxu0 }
0x1267   :  { %v1532_v34 = vpop.f32.mrb[38].mxu0 }
0x1268   :  { %v4164_v36 = vpack.c.bf16 %v1530_v30, %v1530_v30  ;;  %v1533_v37 = vadd.f32 %v2969_v27, %v1532_v34  ;;  %v3291_v39 = vpop.f32.mrb[39].mxu0 }
0x126a   :  { %v4166_v40 = vpack.c.bf16 %v1533_v37, %v1533_v37  ;;  %1539 = vrot.lane.b32.xlu1 %v4164_v36, %s3675_s0 }
0x126c   :  { %1588 = vrot.lane.b32.xlu0 %v4166_v40, %s3675_s0  ;;  %s4521_s0 = smov 8  }
0x12dc   :  { %v1540_v41 = vpop.permute.xlu1 %1539 }
0x12dd   :  { %v1545_v43 = vsel %vm196_vm2, %v1540_v41, 0 }
0x12de   :  { %3293 = vmatpush3.bf16.xpose.msra.mxu0 %v1545_v43  ;;  %v1589_v44 = vpop.permute.xlu0 %1588 }
0x12df   :  { %3298 = vmatprep.subr.bf16.mxu0 %v3673_v18  ;;  %v1594_v35 = vsel %vm196_vm2, %v1589_v44, 0 }
0x12e5   :  { %3295 = vmatmul.mubr.msk.bf16.vlgmr.msra.gmra.mrb[40].mxu0 %vm196_vm2, %v4164_v36 }
0x12e6   :  { %3299 = vmatpush3.bf16.xpose.msra.mxu0 %v1594_v35  ;;  %3300 = vmatprep.mubr.msk.bf16.mxu0 %vm3674_vm1, %v3673_v18 }
0x12e7   :  { %3304 = vmatprep.subr.bf16.mxu0 %v3673_v18 }
0x12ed   :  { %3301 = vmatmul.mubr.msk.bf16.vlgmr.msra.gmra.mrb[44].mxu0 %vm196_vm2, %v4166_v40 }
0x12ee   :  { %3306 = vmatprep.mubr.msk.bf16.mxu0 %vm3674_vm1, %v3673_v18 }
0x13b8   :  { %v1581_v38 = vpop.f32.mrb[40].mxu0 }
0x13b9   :  { %v1636_v46 = vmul.f32 0.35355338, %v1581_v38  ;;  %v3296_v47 = vpop.f32.mrb[41].mxu0 }
0x13ba   :  { %v1584_v48 = vpop.f32.mrb[42].mxu0 }
0x13bb   :  { %v3297_v50 = vpop.f32.mrb[43].mxu0  ;;  %v1638_v52 = vadd.f32 %v1636_v46, %v3880_v54 }
0x13bd   :  { %v1640_v55 = vsel %vm196_vm2, %v1638_v52, -inf }
0x13be   :  { %1641 = vmax.xlane.f32.xlu1 %v1640_v55 }
0x13c0   :  { %v1630_v56 = vpop.f32.mrb[44].mxu0 }
0x13c1   :  { %v1637_v57 = vmul.f32 0.35355338, %v1630_v56  ;;  %v3302_v58 = vpop.f32.mrb[45].mxu0 }
0x13c2   :  { %v1633_v59 = vpop.f32.mrb[46].mxu0 }
0x13c3   :  { %v3303_v60 = vpop.f32.mrb[47].mxu0  ;;  %v1639_v3 = vadd.f32 %v1637_v57, %v3880_v54 }
0x13c5   :  { %v1643_v61 = vsel %vm196_vm2, %v1639_v3, -inf }
0x13c6   :  { %1644 = vmax.xlane.f32.xlu0 %v1643_v61 }
0x13cf   :  { %1664 = vrot.lane.b32.xlu1 %v4164_v36, %s3676_s21 }
0x144b   :  { %v1642_v62 = vpop.xlane.xlu1 %1641 }
0x144c   :  { %v1646_v4 = vsub.f32 %v1638_v52, %v1642_v62 }
0x144e   :  { %v1648_v51 = vmul.f32 1.442695, %v1646_v4 }
0x144f   :  { %v1665_v28 = vpop.permute.xlu1 %1664 }
0x1450   :  { %3564 = vpow2.f32 %v1648_v51  ;;  %v1670_v32 = vsel %vm325_vm4, %v1665_v28, 0 }
0x1451   :  { %3305 = vmatpush3.bf16.msra.mxu0 %v1670_v32 }
0x1452   :  { %3316 = vmatprep.subr.bf16.mxu0 %v3673_v18 }
0x1453   :  { %v1645_v33 = vpop.xlane.xlu0 %1644 }
0x1454   :  { %v1647_v0 = vsub.f32 %v1639_v3, %v1645_v33 }
0x1456   :  { %v1650_v49 = vmul.f32 1.442695, %v1647_v0 }
0x1458   :  { %3566 = vpow2.f32 %v1650_v49 }
0x145a   :  { %v3565_v1 = vpop.eup %3564 }
0x145b   :  { %v1652_v53 = vsel %vm196_vm2, %v3565_v1, 0.0 }
0x145c   :  { %1653 = vadd.xlane.f32.xlu1 %v1652_v53 }
0x1462   :  { %v3567_v2 = vpop.eup %3566 }
0x1463   :  { %v1655_v5 = vsel %vm196_vm2, %v3567_v2, 0.0 }
0x1464   :  { %1656 = vadd.xlane.f32.xlu0 %v1655_v5 }
0x146d   :  { %1762 = vrot.lane.b32.xlu1 %v4164_v36, %s3677_s1 }
0x1471   :  { %1812 = vrot.lane.b32.xlu1 %v4166_v40, %s3677_s1 }
0x1475   :  { %1760 = vrot.lane.b32.xlu1 %v4164_v36, %s3678_s13 }
0x147a   :  { %1712 = vrot.lane.b32.xlu0 %v4166_v40, %s3676_s21  ;;  %s4522_s21 = smov 16  }
0x147e   :  { %1810 = vrot.lane.b32.xlu0 %v4166_v40, %s3678_s13 }
0x14e9   :  { %v1654_v6 = vpop.xlane.xlu1 %1653 }
0x14ea   :  { %3568 = vrcp.f32 %v1654_v6 }
0x14ed   :  { %v1763_v9 = vpop.permute.xlu1 %1762 }
0x14ee   :  { %v1768_v13 = vsel %vm196_vm2, %v1763_v9, 0 }
0x14f1   :  { %v1657_v7 = vpop.xlane.xlu0 %1656  ;;  %v1813_v14 = vpop.permute.xlu1 %1812 }
0x14f2   :  { %3570 = vrcp.f32 %v1657_v7  ;;  %v1818_v20 = vsel %vm196_vm2, %v1813_v14, 0 }
0x14f4   :  { %v3569_v8 = vpop.eup %3568 }
0x14f5   :  { %v1660_v10 = vmul.f32 %v3569_v8, %v3565_v1  ;;  %v1713_v42 = vpop.permute.xlu0 %1712  ;;  %v1761_v19 = vpop.permute.xlu1 %1760 }
0x14f6   :  { %v1718_v11 = vsel %vm325_vm4, %v1713_v42, 0 }
0x14f7   :  { %3311 = vmatpush3.bf16.msra.mxu1 %v1718_v11  ;;  %v1662_v12 = vpack.c.bf16 %v1660_v10, %v1660_v10 }
0x14f8   :  { %3322 = vmatprep.subr.bf16.mxu1 %v3673_v18 }
0x14f9   :  { %3307 = vmatmul.mubr.msk.bf16.vlgmr.msra.gmra.mrb[48].mxu0 %vm196_vm2, %v1662_v12  ;;  %v1811_v21 = vpop.permute.xlu0 %1810 }
0x14fa   :  { %3317 = vmatpush3.bf16.xpose.msra.mxu0 %v1768_v13  ;;  %3318 = vmatprep.mubr.msk.bf16.mxu0 %vm3674_vm1, %v3673_v18 }
0x14fb   :  { %3328 = vmatprep.subr.bf16.mxu0 %v3673_v18 }
0x14fc   :  { %v3571_v15 = vpop.eup %3570 }
0x14fd   :  { %v1661_v16 = vmul.f32 %v3571_v15, %v3567_v2 }
0x14ff   :  { %v1663_v17 = vpack.c.bf16 %v1661_v16, %v1661_v16 }
0x1501   :  { %3313 = vmatmul.mubr.msk.bf16.vlgmr.msra.gmra.mrb[44].mxu1 %vm196_vm2, %v1663_v17  ;;  %3319 = vmatmul.mubr.msk.bf16.vlgmr.msra.gmra.mrb[52].mxu0 %vm196_vm2, %v1761_v19 }
0x1502   :  { %3323 = vmatpush3.bf16.xpose.msra.mxu1 %v1818_v20  ;;  %3324 = vmatprep.mubr.msk.bf16.mxu1 %vm3674_vm1, %v3673_v18 }
0x1503   :  { %3334 = vmatprep.subr.bf16.mxu1 %v3673_v18  ;;  %3330 = vmatprep.mubr.msk.bf16.mxu0 %vm3674_vm1, %v3673_v18 }
0x1509   :  { %3325 = vmatmul.mubr.msk.bf16.vlgmr.msra.gmra.mrb[48].mxu1 %vm196_vm2, %v1811_v21 }
0x150a   :  { %3336 = vmatprep.mubr.msk.bf16.mxu1 %vm3674_vm1, %v3673_v18 }
0x15cc   :  { %v4222_v22 = vpop.f32.mrb[48].mxu0 }
0x15cd   :  { %v3308_v23 = vpop.f32.mrb[49].mxu0 }
0x15ce   :  { %v1709_v24 = vpop.f32.mrb[50].mxu0 }
0x15cf   :  { %v3309_v25 = vpop.f32.mrb[51].mxu0 }
0x15d4   :  { %v4224_v26 = vpop.f32.mrb[44].mxu1  ;;  %v1804_v27 = vpop.f32.mrb[52].mxu0 }
0x15d5   :  { %v1860_v29 = vmul.f32 0.35355338, %v1804_v27  ;;  %v3314_v30 = vpop.f32.mrb[45].mxu1  ;;  %v3320_v31 = vpop.f32.mrb[53].mxu0 }
0x15d6   :  { %v1757_v34 = vpop.f32.mrb[46].mxu1  ;;  %v1807_v37 = vpop.f32.mrb[54].mxu0 }
0x15d7   :  { %v3315_v39 = vpop.f32.mrb[47].mxu1  ;;  %v3321_v41 = vpop.f32.mrb[55].mxu0  ;;  %v1862_v43 = vadd.f32 %v1860_v29, %v3880_v54 }
0x15d9   :  { %v1864_v44 = vsel %vm196_vm2, %v1862_v43, -inf }
0x15da   :  { %1865 = vmax.xlane.f32.xlu1 %v1864_v44 }
0x15dc   :  { %v1854_v35 = vpop.f32.mrb[48].mxu1 }
0x15dd   :  { %v1861_v38 = vmul.f32 0.35355338, %v1854_v35  ;;  %v3326_v46 = vpop.f32.mrb[49].mxu1 }
0x15de   :  { %v1857_v47 = vpop.f32.mrb[50].mxu1 }
0x15df   :  { %v3327_v48 = vpop.f32.mrb[51].mxu1  ;;  %v1863_v50 = vadd.f32 %v1861_v38, %v3880_v54 }
0x15e1   :  { %v1867_v52 = vsel %vm196_vm2, %v1863_v50, -inf }
0x15e2   :  { %1868 = vmax.xlane.f32.xlu0 %v1867_v52 }
0x15eb   :  { %1888 = vrot.lane.b32.xlu1 %v4164_v36, %s3679_s22 }
0x15ef   :  { %1986 = vrot.lane.b32.xlu1 %v4164_v36, %s3680_s23 }
0x15f3   :  { %2036 = vrot.lane.b32.xlu1 %v4166_v40, %s3680_s23 }
0x15f7   :  { %1984 = vrot.lane.b32.xlu1 %v4164_v36, %s3681_s24 }
0x1667   :  { %v1866_v55 = vpop.xlane.xlu1 %1865 }
0x1668   :  { %v1870_v56 = vsub.f32 %v1862_v43, %v1866_v55 }
0x166a   :  { %v1872_v57 = vmul.f32 1.442695, %v1870_v56 }
0x166b   :  { %v1889_v58 = vpop.permute.xlu1 %1888 }
0x166c   :  { %3572 = vpow2.f32 %v1872_v57  ;;  %v1894_v59 = vsel %vm325_vm4, %v1889_v58, 0 }
0x166d   :  { %3329 = vmatpush3.bf16.msra.mxu0 %v1894_v59 }
0x166e   :  { %3340 = vmatprep.subr.bf16.mxu0 %v3673_v18 }
0x166f   :  { %v1869_v60 = vpop.xlane.xlu0 %1868  ;;  %v1987_v49 = vpop.permute.xlu1 %1986 }
0x1670   :  { %v1871_v3 = vsub.f32 %v1863_v50, %v1869_v60  ;;  %v1992_v6 = vsel %vm196_vm2, %v1987_v49, 0 }
0x1672   :  { %v1874_v61 = vmul.f32 1.442695, %v1871_v3 }
0x1673   :  { %v2037_v7 = vpop.permute.xlu1 %2036 }
0x1674   :  { %3574 = vpow2.f32 %v1874_v61  ;;  %v2042_v11 = vsel %vm196_vm2, %v2037_v7, 0 }
0x1676   :  { %v3573_v62 = vpop.eup %3572 }
0x1677   :  { %v1876_v4 = vsel %vm196_vm2, %v3573_v62, 0.0  ;;  %v1985_v42 = vpop.permute.xlu1 %1984 }
0x1678   :  { %1877 = vadd.xlane.f32.xlu0 %v1876_v4 }
0x167e   :  { %v3575_v51 = vpop.eup %3574 }
0x167f   :  { %v1879_v28 = vsel %vm196_vm2, %v3575_v51, 0.0 }
0x1680   :  { %1880 = vadd.xlane.f32.xlu0 %v1879_v28 }
0x1696   :  { %1936 = vrot.lane.b32.xlu0 %v4166_v40, %s3679_s22 }
0x169a   :  { %2034 = vrot.lane.b32.xlu0 %v4166_v40, %s3681_s24  ;;  %s4523_s24 = smov 24  }
0x1705   :  { %v1878_v32 = vpop.xlane.xlu0 %1877 }
0x1706   :  { %3576 = vrcp.f32 %v1878_v32 }
0x170d   :  { %v1881_v33 = vpop.xlane.xlu0 %1880 }
0x170e   :  { %3578 = vrcp.f32 %v1881_v33 }
0x1710   :  { %v3577_v0 = vpop.eup %3576 }
0x1711   :  { %v1884_v1 = vmul.f32 %v3577_v0, %v3573_v62  ;;  %v1937_v53 = vpop.permute.xlu0 %1936 }
0x1712   :  { %v1942_v2 = vsel %vm325_vm4, %v1937_v53, 0 }
0x1713   :  { %3335 = vmatpush3.bf16.msra.mxu1 %v1942_v2  ;;  %v1886_v5 = vpack.c.bf16 %v1884_v1, %v1884_v1 }
0x1714   :  { %3346 = vmatprep.subr.bf16.mxu1 %v3673_v18 }
0x1715   :  { %3331 = vmatmul.mubr.msk.bf16.vlgmr.msra.gmra.mrb[56].mxu0 %vm196_vm2, %v1886_v5  ;;  %v2035_v12 = vpop.permute.xlu0 %2034 }
0x1716   :  { %3341 = vmatpush3.bf16.xpose.msra.mxu0 %v1992_v6  ;;  %3342 = vmatprep.mubr.msk.bf16.mxu0 %vm3674_vm1, %v3673_v18 }
0x1717   :  { %3352 = vmatprep.subr.bf16.mxu0 %v3673_v18 }
0x1718   :  { %v3579_v8 = vpop.eup %3578 }
0x1719   :  { %v1885_v9 = vmul.f32 %v3579_v8, %v3575_v51 }
0x171b   :  { %v1887_v10 = vpack.c.bf16 %v1885_v9, %v1885_v9 }
0x171d   :  { %3337 = vmatmul.mubr.msk.bf16.vlgmr.msra.gmra.mrb[52].mxu1 %vm196_vm2, %v1887_v10  ;;  %3343 = vmatmul.mubr.msk.bf16.vlgmr.msra.gmra.mrb[60].mxu0 %vm196_vm2, %v1985_v42 }
0x171e   :  { %3347 = vmatpush3.bf16.xpose.msra.mxu1 %v2042_v11  ;;  %3348 = vmatprep.mubr.msk.bf16.mxu1 %vm3674_vm1, %v3673_v18 }
0x171f   :  { %3358 = vmatprep.subr.bf16.mxu1 %v3673_v18  ;;  %3354 = vmatprep.mubr.msk.bf16.mxu0 %vm3674_vm1, %v3673_v18 }
0x1725   :  { %3349 = vmatmul.mubr.msk.bf16.vlgmr.msra.gmra.mrb[56].mxu1 %vm196_vm2, %v2035_v12 }
0x1726   :  { %3360 = vmatprep.mubr.msk.bf16.mxu1 %vm3674_vm1, %v3673_v18 }
0x17e8   :  { %v4264_v13 = vpop.f32.mrb[56].mxu0 }
0x17e9   :  { %v3332_v14 = vpop.f32.mrb[57].mxu0 }
0x17ea   :  { %v1933_v15 = vpop.f32.mrb[58].mxu0 }
0x17eb   :  { %v3333_v16 = vpop.f32.mrb[59].mxu0 }
0x17f0   :  { %v4266_v17 = vpop.f32.mrb[52].mxu1  ;;  %v2028_v19 = vpop.f32.mrb[60].mxu0 }
0x17f1   :  { %v3467_v20 = vpack.i.bf16 %v4266_v17, %v4264_v13  ;;  %v2084_v21 = vmul.f32 0.35355338, %v2028_v19  ;;  %v3338_v23 = vpop.f32.mrb[53].mxu1  ;;  %v3344_v24 = vpop.f32.mrb[61].mxu0 }
0x17f2   :  { %v1981_v25 = vpop.f32.mrb[54].mxu1  ;;  %v2031_v27 = vpop.f32.mrb[62].mxu0 }
0x17f3   :  { %v3339_v29 = vpop.f32.mrb[55].mxu1  ;;  %v3345_v30 = vpop.f32.mrb[63].mxu0  ;;  %v2086_v31 = vadd.f32 %v2084_v21, %v3880_v54 }
0x17f5   :  { %v2088_v34 = vsel %vm196_vm2, %v2086_v31, -inf }
0x17f6   :  { %2089 = vmax.xlane.f32.xlu1 %v2088_v34 }
0x17f8   :  { %v2078_v37 = vpop.f32.mrb[56].mxu1 }
0x17f9   :  { %v2085_v39 = vmul.f32 0.35355338, %v2078_v37  ;;  %v3350_v41 = vpop.f32.mrb[57].mxu1 }
0x17fa   :  { %v2081_v43 = vpop.f32.mrb[58].mxu1 }
0x17fb   :  { %v3351_v44 = vpop.f32.mrb[59].mxu1  ;;  %v2087_v35 = vadd.f32 %v2085_v39, %v3880_v54 }
0x17fd   :  { %v2091_v38 = vsel %vm196_vm2, %v2087_v35, -inf }
0x17fe   :  { %2092 = vmax.xlane.f32.xlu0 %v2091_v38 }
0x1807   :  { %2112 = vrot.lane.b32.xlu1 %v4164_v36, %s3682_s2 }
0x180b   :  { %2210 = vrot.lane.b32.xlu1 %v4164_v36, %s4518_s5 }
0x180f   :  { %2260 = vrot.lane.b32.xlu1 %v4166_v40, %s4518_s5 }
0x1813   :  { %2208 = vrot.lane.b32.xlu1 %v4164_v36, %s4519_s7 }
0x1883   :  { %v2090_v46 = vpop.xlane.xlu1 %2089 }
0x1884   :  { %v2094_v47 = vsub.f32 %v2086_v31, %v2090_v46 }
0x1886   :  { %v2096_v48 = vmul.f32 1.442695, %v2094_v47 }
0x1887   :  { %v2113_v50 = vpop.permute.xlu1 %2112 }
0x1888   :  { %3580 = vpow2.f32 %v2096_v48  ;;  %v2118_v52 = vsel %vm325_vm4, %v2113_v50, 0 }
0x1889   :  { %3353 = vmatpush3.bf16.msra.mxu0 %v2118_v52 }
0x188a   :  { %3364 = vmatprep.subr.bf16.mxu0 %v3673_v18 }
0x188b   :  { %v2093_v55 = vpop.xlane.xlu0 %2092  ;;  %v2211_v51 = vpop.permute.xlu1 %2210 }
0x188c   :  { %v2095_v56 = vsub.f32 %v2087_v35, %v2093_v55  ;;  %v2216_v49 = vsel %vm196_vm2, %v2211_v51, 0  ;;  %v3499_v51 = vld [vmem:[%s4479_s8 + $0x18] sm:$0xff]  }
0x188e   :  { %v2098_v57 = vmul.f32 1.442695, %v2095_v56 }
0x188f   :  { %v2261_v1 = vpop.permute.xlu1 %2260 }
0x1890   :  { %3582 = vpow2.f32 %v2098_v57  ;;  %v2266_v7 = vsel %vm196_vm2, %v2261_v1, 0 }
0x1892   :  { %v3581_v58 = vpop.eup %3580 }
0x1893   :  { %v2100_v59 = vsel %vm196_vm2, %v3581_v58, 0.0  ;;  %v2209_v6 = vpop.permute.xlu1 %2208 }
0x1894   :  { %2101 = vadd.xlane.f32.xlu0 %v2100_v59 }
0x189a   :  { %v3583_v60 = vpop.eup %3582 }
0x189b   :  { %v2103_v3 = vsel %vm196_vm2, %v3583_v60, 0.0 }
0x189c   :  { %2104 = vadd.xlane.f32.xlu0 %v2103_v3 }
0x18b2   :  { %2160 = vrot.lane.b32.xlu0 %v4166_v40, %s3682_s2 }
0x18b6   :  { %2258 = vrot.lane.b32.xlu0 %v4166_v40, %s4519_s7  ;;  %s2814_s7 = sld [smem:[#allocation3]] }
0x1921   :  { %v2102_v61 = vpop.xlane.xlu0 %2101 }
0x1922   :  { %3584 = vrcp.f32 %v2102_v61 }
0x1929   :  { %v2105_v62 = vpop.xlane.xlu0 %2104 }
0x192a   :  { %3586 = vrcp.f32 %v2105_v62 }
0x192c   :  { %v3585_v4 = vpop.eup %3584 }
0x192d   :  { %v2108_v28 = vmul.f32 %v3585_v4, %v3581_v58  ;;  %v2161_v32 = vpop.permute.xlu0 %2160  ;;  %v3498_v4 = vld [vmem:[%s4479_s8 + $0x10] sm:$0xff]  }
0x192e   :  { %v2166_v33 = vsel %vm325_vm4, %v2161_v32, 0 }
0x192f   :  { %3359 = vmatpush3.bf16.msra.mxu1 %v2166_v33  ;;  %v2110_v0 = vpack.c.bf16 %v2108_v28, %v2108_v28 }
0x1930   :  { %3370 = vmatprep.subr.bf16.mxu1 %v3673_v18 }
0x1931   :  { %3355 = vmatmul.mubr.msk.bf16.vlgmr.msra.gmra.mrb[64].mxu0 %vm196_vm2, %v2110_v0  ;;  %v2259_v8 = vpop.permute.xlu0 %2258 }
0x1932   :  { %3365 = vmatpush3.bf16.xpose.msra.mxu0 %v2216_v49  ;;  %3366 = vmatprep.mubr.msk.bf16.mxu0 %vm3674_vm1, %v3673_v18 }
0x1933   :  { %3376 = vmatprep.subr.bf16.mxu0 %v3673_v18 }
0x1934   :  { %v3587_v53 = vpop.eup %3586 }
0x1935   :  { %v2109_v2 = vmul.f32 %v3587_v53, %v3583_v60 }
0x1937   :  { %v2111_v5 = vpack.c.bf16 %v2109_v2, %v2109_v2 }
0x1939   :  { %3361 = vmatmul.mubr.msk.bf16.vlgmr.msra.gmra.mrb[60].mxu1 %vm196_vm2, %v2111_v5  ;;  %3367 = vmatmul.mubr.msk.bf16.vlgmr.msra.gmra.mrb[68].mxu0 %vm196_vm2, %v2209_v6 }
0x193a   :  { %3371 = vmatpush3.bf16.xpose.msra.mxu1 %v2266_v7  ;;  %3372 = vmatprep.mubr.msk.bf16.mxu1 %vm3674_vm1, %v3673_v18 }
0x193b   :  { %3382 = vmatprep.subr.bf16.mxu1 %v3673_v18  ;;  %3378 = vmatprep.mubr.msk.bf16.mxu0 %vm3674_vm1, %v3673_v18 }
0x1941   :  { %3373 = vmatmul.mubr.msk.bf16.vlgmr.msra.gmra.mrb[64].mxu1 %vm196_vm2, %v2259_v8 }
0x1942   :  { %3384 = vmatprep.mubr.msk.bf16.mxu1 %vm3674_vm1, %v3673_v18 }
0x1a04   :  { %v2154_v9 = vpop.f32.mrb[64].mxu0 }
0x1a05   :  { %v3356_v10 = vpop.f32.mrb[65].mxu0 }
0x1a06   :  { %v2157_v42 = vpop.f32.mrb[66].mxu0 }
0x1a07   :  { %v3357_v11 = vpop.f32.mrb[67].mxu0 }
0x1a0c   :  { %v2202_v12 = vpop.f32.mrb[60].mxu1  ;;  %v2252_v14 = vpop.f32.mrb[68].mxu0 }
0x1a0d   :  { %v3472_v15 = vpack.i.bf16 %v2202_v12, %v2154_v9  ;;  %v2308_v16 = vmul.f32 0.35355338, %v2252_v14  ;;  %v3362_v19 = vpop.f32.mrb[61].mxu1  ;;  %v3368_v21 = vpop.f32.mrb[69].mxu0 }
0x1a0e   :  { %v2205_v23 = vpop.f32.mrb[62].mxu1  ;;  %v2255_v24 = vpop.f32.mrb[70].mxu0 }
0x1a0f   :  { %v3363_v25 = vpop.f32.mrb[63].mxu1  ;;  %v3369_v27 = vpop.f32.mrb[71].mxu0  ;;  %v2310_v29 = vadd.f32 %v2308_v16, %v3880_v54 }
0x1a11   :  { %v2312_v30 = vsel %vm196_vm2, %v2310_v29, -inf }
0x1a12   :  { %2313 = vmax.xlane.f32.xlu1 %v2312_v30 }
0x1a14   :  { %v2302_v31 = vpop.f32.mrb[64].mxu1 }
0x1a15   :  { %v2309_v34 = vmul.f32 0.35355338, %v2302_v31  ;;  %v3374_v37 = vpop.f32.mrb[65].mxu1 }
0x1a16   :  { %v2305_v39 = vpop.f32.mrb[66].mxu1 }
0x1a17   :  { %v3375_v41 = vpop.f32.mrb[67].mxu1  ;;  %v2311_v43 = vadd.f32 %v2309_v34, %v3880_v54 }
0x1a19   :  { %v2315_v44 = vsel %vm196_vm2, %v2311_v43, -inf }
0x1a1a   :  { %2316 = vmax.xlane.f32.xlu0 %v2315_v44 }
0x1a23   :  { %2336 = vrot.lane.b32.xlu1 %v4164_v36, %s4520_s27 }
0x1a27   :  { %3468 = vrot.lane.b32.xlu1 %v3467_v20, %s4521_s0 }
0x1a2b   :  { %3473 = vrot.lane.b32.xlu1 %v3472_v15, %s4522_s21 }
0x1a9f   :  { %v2314_v35 = vpop.xlane.xlu1 %2313 }
0x1aa0   :  { %v2318_v38 = vsub.f32 %v2310_v29, %v2314_v35 }
0x1aa2   :  { %v2320_v46 = vmul.f32 1.442695, %v2318_v38 }
0x1aa3   :  { %v2337_v47 = vpop.permute.xlu1 %2336 }
0x1aa4   :  { %3588 = vpow2.f32 %v2320_v46  ;;  %v2342_v54 = vsel %vm325_vm4, %v2337_v47, 0 }
0x1aa5   :  { %3377 = vmatpush3.bf16.msra.mxu0 %v2342_v54 }
0x1aa6   :  { %3388 = vmatprep.subr.bf16.mxu0 %v3673_v18 }
0x1aa7   :  { %v2317_v48 = vpop.xlane.xlu0 %2316  ;;  %v3469_v6 = vpop.permute.xlu1 %3468 }
0x1aa8   :  { %v2319_v50 = vsub.f32 %v2311_v43, %v2317_v48  ;;  %v3471_v8 = vunpack.i.h.bf16 %v3469_v6  ;;  %v3470_v9 = vunpack.i.l.bf16 %v3469_v6  ;;  %v3509_v6 = vld [vmem:[%s4485_s14 + $0x78] sm:$0xff]  }
0x1aaa   :  { %v2322_v36 = vmul.f32 1.442695, %v2319_v50  ;;  %v2457_v12 = vsel %vm196_vm2, %v4224_v26, %v3471_v8  ;;  %v2456_v14 = vsel %vm196_vm2, %v4222_v22, %v3470_v9  ;;  %v2993_v22 = vld [vmem:[%s4480_s9 + $0x1] ss:$0 sm:$0xff] }
0x1aab   :  { %v3474_v7 = vpop.permute.xlu1 %3473 }
0x1aac   :  { %3590 = vpow2.f32 %v2322_v36  ;;  %v3476_v10 = vunpack.i.h.bf16 %v3474_v7  ;;  %v3475_v42 = vunpack.i.l.bf16 %v3474_v7  ;;  %v3500_v36 = vld [vmem:[%s4483_s12 + $0x10] sm:$0xff]   ;;  %v3003_v7 = vld [vmem:[%s4516_s29 + $0x1] ss:$0 sm:$0xff] }
0x1aae   :  { %v3589_v52 = vpop.eup %3588  ;;  %v2458_v19 = vsel %vm1115_vm5, %v2456_v14, %v3475_v42  ;;  %v2459_v21 = vsel %vm1115_vm5, %v2457_v12, %v3476_v10 }
0x1aaf   :  { %v2324_v13 = vsel %vm196_vm2, %v3589_v52, 0.0 }
0x1ab0   :  { %2325 = vadd.xlane.f32.xlu0 %v2324_v13 }
0x1ab6   :  { %v3591_v17 = vpop.eup %3590 }
0x1ab7   :  { %v2327_v20 = vsel %vm196_vm2, %v3591_v17, 0.0 }
0x1ab8   :  { %2328 = vadd.xlane.f32.xlu0 %v2327_v20 }
0x1ace   :  { %2384 = vrot.lane.b32.xlu0 %v4166_v40, %s4520_s27 }
0x1b3d   :  { %v2326_v55 = vpop.xlane.xlu0 %2325 }
0x1b3e   :  { %3592 = vrcp.f32 %v2326_v55 }
0x1b45   :  { %v2329_v56 = vpop.xlane.xlu0 %2328 }
0x1b46   :  { %3594 = vrcp.f32 %v2329_v56 }
0x1b48   :  { %v3593_v57 = vpop.eup %3592 }
0x1b49   :  { %v2332_v58 = vmul.f32 %v3593_v57, %v3589_v52  ;;  %v2385_v59 = vpop.permute.xlu0 %2384  ;;  %v3501_v52 = vld [vmem:[%s4483_s12 + $0x18] sm:$0xff]  }
0x1b4a   :  { %v2390_v60 = vsel %vm325_vm4, %v2385_v59, 0 }
0x1b4b   :  { %3383 = vmatpush3.bf16.msra.mxu1 %v2390_v60  ;;  %v2334_v3 = vpack.c.bf16 %v2332_v58, %v2332_v58  ;;  %v2997_v60 = vld [vmem:[%s4481_s10 + $0x1] ss:$0 sm:$0xff]  ;;  %s3036_s10 = sld [smem:[#allocation3 + $0x1]] }
0x1b4c   :  { %3396 = vmatprep.subr.bf16.mxu1 %v3673_v18 }
0x1b4d   :  { %3379 = vmatmul.mubr.msk.bf16.vlgmr.msra.gmra.mrb[72].mxu0 %vm196_vm2, %v2334_v3 }
0x1b4e   :  { %3392 = vmatprep.mubr.msk.bf16.mxu0 %vm3674_vm1, %v3673_v18  ;;  %3389 = vmatpush3.bf16.msra.mxu0 %v3498_v4 }
0x1b4f   :  { %3390 = vmatprep.subr.bf16.mxu0 %v3673_v18 }
0x1b50   :  { %v3595_v61 = vpop.eup %3594 }
0x1b51   :  { %v2333_v40 = vmul.f32 %v3595_v61, %v3591_v17 }
0x1b52   :  { %3391 = vmatpush3.bf16.msra.mxu0 %v3499_v51 }
0x1b53   :  { %v2335_v62 = vpack.c.bf16 %v2333_v40, %v2333_v40  ;;  %3404 = vmatprep.subr.bf16.mxu0 %v3673_v18 }
0x1b55   :  { %3385 = vmatmul.mubr.msk.bf16.vlgmr.msra.gmra.mrb[68].mxu1 %vm196_vm2, %v2335_v62  ;;  %v2998_v62 = vld [vmem:[%s4482_s11 + $0x1] ss:$0 sm:$0xff]  ;;  %s2918_s11 = scalar_lea.vmem [#allocation6], %s3036_s10 }
0x1b56   :  { %3400 = vmatprep.mubr.msk.bf16.mxu1 %vm3674_vm1, %v3673_v18  ;;  %3397 = vmatpush3.bf16.msra.mxu1 %v3500_v36 }
0x1b57   :  { %3398 = vmatprep.subr.bf16.mxu1 %v3673_v18 }
0x1b5a   :  { %3399 = vmatpush3.bf16.msra.mxu1 %v3501_v52 }
0x1b5b   :  { %3424 = vmatprep.subr.bf16.mxu1 %v3673_v18 }
0x1c20   :  { %v2378_v28 = vpop.f32.mrb[72].mxu0 }
0x1c21   :  { %v3380_v32 = vpop.f32.mrb[73].mxu0 }
0x1c22   :  { %v2381_v33 = vpop.f32.mrb[74].mxu0 }
0x1c23   :  { %v3381_v0 = vpop.f32.mrb[75].mxu0  ;;  %v3502_v33 = vld [vmem:[%s4485_s14 + $0x40] sm:$0xff]  }
0x1c24   :  { %v3503_v0 = vld [vmem:[%s4485_s14 + $0x48] sm:$0xff]  }
0x1c28   :  { %v2426_v49 = vpop.f32.mrb[68].mxu1 }
0x1c29   :  { %v3477_v1 = vpack.i.bf16 %v2426_v49, %v2378_v28  ;;  %v3386_v53 = vpop.f32.mrb[69].mxu1  ;;  %v3504_v49 = vld [vmem:[%s4485_s14 + $0x50] sm:$0xff]  }
0x1c2a   :  { %v2429_v2 = vpop.f32.mrb[70].mxu1  ;;  %v3506_v53 = vld [vmem:[%s4485_s14 + $0x60] sm:$0xff]  }
0x1c2b   :  { %v3387_v5 = vpop.f32.mrb[71].mxu1  ;;  %3478 = vrot.lane.b32.xlu1 %v3477_v1, %s4523_s24  ;;  %v3505_v1 = vld [vmem:[%s4485_s14 + $0x58] sm:$0xff]   ;;  %v3507_v2 = vld [vmem:[%s4485_s14 + $0x68] sm:$0xff]  }
0x1c2c   :  { %v3508_v5 = vld [vmem:[%s4485_s14 + $0x70] sm:$0xff]  }
0x1c9d   :  { %v3479_v11 = vpop.permute.xlu1 %3478 }
0x1c9e   :  { %v3481_v15 = vunpack.i.h.bf16 %v3479_v11  ;;  %v3480_v16 = vunpack.i.l.bf16 %v3479_v11 }
0x1ca0   :  { %v2461_v23 = vsel %vm1118_vm6, %v2459_v21, %v3481_v15  ;;  %v2460_v24 = vsel %vm1118_vm6, %v2458_v19, %v3480_v16 }
0x1ca1   :  { %v2462_v25 = vpack.c.bf16 %v2461_v23, %v2460_v24 }
0x1ca3   :  { %3393 = vmatmul.mubr.msk.bf16.vlgmr.msra.gmra.mrb[76].mxu0 %vm85_vm0, %v2462_v25 }
0x1ca4   :  { %3420 = vmatprep.mubr.msk.bf16.mxu0 %vm3674_vm1, %v3673_v18  ;;  %3405 = vmatpush3.bf16.msra.mxu0 %v3502_v33 }
0x1ca5   :  { %3406 = vmatprep.subr.bf16.mxu0 %v3673_v18 }
0x1ca8   :  { %3407 = vmatpush3.bf16.msra.mxu0 %v3503_v0 }
0x1ca9   :  { %3408 = vmatprep.subr.bf16.mxu0 %v3673_v18 }
0x1cac   :  { %3409 = vmatpush3.bf16.msra.mxu0 %v3504_v49 }
0x1cad   :  { %3410 = vmatprep.subr.bf16.mxu0 %v3673_v18 }
0x1cb0   :  { %3411 = vmatpush3.bf16.msra.mxu0 %v3505_v1 }
0x1cb1   :  { %3412 = vmatprep.subr.bf16.mxu0 %v3673_v18 }
0x1cb4   :  { %3413 = vmatpush3.bf16.msra.mxu0 %v3506_v53 }
0x1cb5   :  { %3414 = vmatprep.subr.bf16.mxu0 %v3673_v18 }
0x1cb8   :  { %3415 = vmatpush3.bf16.msra.mxu0 %v3507_v2 }
0x1cb9   :  { %3416 = vmatprep.subr.bf16.mxu0 %v3673_v18 }
0x1cbc   :  { %3417 = vmatpush3.bf16.msra.mxu0 %v3508_v5 }
0x1cbd   :  { %3418 = vmatprep.subr.bf16.mxu0 %v3673_v18 }
0x1cc0   :  { %3419 = vmatpush3.bf16.msra.mxu0 %v3509_v6 }
0x1d76   :  { %v2522_v26 = vpop.f32.mrb[76].mxu0 }
0x1d77   :  { %v2523_v27 = vadd.f32 %v2993_v22, %v2522_v26  ;;  %v3394_v29 = vpop.f32.mrb[77].mxu0 }
0x1d78   :  { %v2525_v30 = vpop.f32.mrb[78].mxu0 }
0x1d79   :  { %v4357_v31 = vadd.f32 %v2523_v27, %v4132_v45  ;;  %v2526_v34 = vadd.f32 %v2993_v22, %v2525_v30  ;;  %v3395_v37 = vpop.f32.mrb[79].mxu0 }
0x1d7b   :  { %v4360_v39 = vadd.f32 %v2526_v34, %v4136_v63  ;;  %v2533_v41 = vsel %vm85_vm0, %v4357_v31, 0.0  ;;  %v3025_v34 = vld [vmem:[%s4486_s15 + $0x1] ss:$0 sm:$0xff] }
0x1d7c   :  { %2534 = vadd.xlane.f32.xlu0 %v2533_v41 }
0x1d7d   :  { %v2536_v43 = vsel %vm85_vm0, %v4360_v39, 0.0 }
0x1d7e   :  { %2537 = vadd.xlane.f32.xlu1 %v2536_v43 }
0x1e09   :  { %v2535_v44 = vpop.xlane.xlu0 %2534 }
0x1e0a   :  { %v2539_v35 = vmul.f32 0.03125, %v2535_v44 }
0x1e0b   :  { %v2538_v38 = vpop.xlane.xlu1 %2537 }
0x1e0c   :  { %v2541_v46 = vsub.f32 %v4357_v31, %v2539_v35  ;;  %v2540_v45 = vmul.f32 0.03125, %v2538_v38 }
0x1e0e   :  { %v2542_v47 = vsub.f32 %v4360_v39, %v2540_v45  ;;  %v2543_v54 = vmul.f32 %v2541_v46, %v2541_v46 }
0x1e10   :  { %v2545_v63 = vsel %vm85_vm0, %v2543_v54, 0.0  ;;  %v2544_v48 = vmul.f32 %v2542_v47, %v2542_v47 }
0x1e11   :  { %2546 = vadd.xlane.f32.xlu0 %v2545_v63 }
0x1e12   :  { %v2548_v50 = vsel %vm85_vm0, %v2544_v48, 0.0 }
0x1e15   :  { %2549 = vadd.xlane.f32.xlu0 %v2548_v50 }
0x1e9e   :  { %v2547_v13 = vpop.xlane.xlu0 %2546 }
0x1e9f   :  { %v2551_v17 = vmul.f32 0.03125, %v2547_v13 }
0x1ea1   :  { %v2553_v20 = vadd.f32 1e-05, %v2551_v17 }
0x1ea2   :  { %v2550_v55 = vpop.xlane.xlu0 %2549 }
0x1ea3   :  { %3596 = vrsqrt.f32 %v2553_v20  ;;  %v2552_v56 = vmul.f32 0.03125, %v2550_v55 }
0x1ea5   :  { %v2554_v57 = vadd.f32 1e-05, %v2552_v56  ;;  %v3511_v56 = vld [vmem:[%s4489_s18 + $0x8] sm:$0xff]  }
0x1ea7   :  { %3598 = vrsqrt.f32 %v2554_v57 }
0x1ead   :  { %v3597_v58 = vpop.eup %3596 }
0x1eae   :  { %v2557_v59 = vmul.f32 %v3597_v58, %v2541_v46 }
0x1eb0   :  { %v2563_v61 = vmul.f32 %v2997_v60, %v2557_v59 }
0x1eb1   :  { %v3599_v3 = vpop.eup %3598 }
0x1eb2   :  { %v2558_v40 = vmul.f32 %v3599_v3, %v2542_v47  ;;  %v2569_v51 = vadd.f32 %v2998_v62, %v2563_v61 }
0x1eb4   :  { %v2564_v4 = vmul.f32 %v2997_v60, %v2558_v40 }
0x1eb6   :  { %v2570_v28 = vadd.f32 %v2998_v62, %v2564_v4  ;;  %v3034_v62 = vld [vmem:[%s4487_s16] ss:$0 sm:$0xff]  ;;  %s2815_s16 = scalar_lea.vmem [#allocation6], %s2814_s7 }
0x1eb8   :  { %v2571_v32 = vpack.c.bf16 %v2570_v28, %v2569_v51 }
0x1eba   :  { %3401 = vmatmul.mubr.msk.bf16.vlgmr.msra.gmra.mrb[72].mxu1 %vm85_vm0, %v2571_v32 }
0x1ebb   :  { %3428 = vmatprep.mubr.msk.bf16.mxu1 %vm3674_vm1, %v3673_v18 }
0x1f8d   :  { %v2631_v8 = vpop.f32.mrb[72].mxu1 }
0x1f8e   :  { %v2632_v9 = vadd.f32 %v3003_v7, %v2631_v8  ;;  %v3402_v10 = vpop.f32.mrb[73].mxu1 }
0x1f8f   :  { %v2634_v42 = vpop.f32.mrb[74].mxu1 }
0x1f90   :  { %v3007_v11 = vmul.f32 -1.702, %v2632_v9  ;;  %v2635_v12 = vadd.f32 %v3003_v7, %v2634_v42  ;;  %v3403_v14 = vpop.f32.mrb[75].mxu1 }
0x1f92   :  { %v2642_v15 = vmul.f32 1.442695, %v3007_v11  ;;  %v3008_v16 = vmul.f32 -1.702, %v2635_v12 }
0x1f94   :  { %3600 = vpow2.f32 %v2642_v15  ;;  %v2644_v19 = vmul.f32 1.442695, %v3008_v16 }
0x1f96   :  { %3602 = vpow2.f32 %v2644_v19 }
0x1f9e   :  { %v3601_v21 = vpop.eup %3600 }
0x1f9f   :  { %v2646_v23 = vadd.f32 1.0, %v3601_v21 }
0x1fa0   :  { %v3603_v24 = vpop.eup %3602 }
0x1fa1   :  { %3604 = vrcp.f32 %v2646_v23  ;;  %v2647_v25 = vadd.f32 1.0, %v3603_v24 }
0x1fa3   :  { %3606 = vrcp.f32 %v2647_v25 }
0x1fab   :  { %v3605_v22 = vpop.eup %3604 }
0x1fac   :  { %v2652_v27 = vmul.f32 %v3605_v22, %v2632_v9 }
0x1fad   :  { %v3607_v26 = vpop.eup %3606 }
0x1fae   :  { %v2653_v29 = vmul.f32 %v3607_v26, %v2635_v12 }
0x1fb0   :  { %v2654_v30 = vpack.c.bf16 %v2653_v29, %v2652_v27 }
0x1fb2   :  { %3421 = vmatmul.mubr.bf16.vlgmr.msra.gmra.mrb[80].mxu0 %v2654_v30 }
0x2085   :  { %v2759_v37 = vpop.f32.mrb[80].mxu0 }
0x2086   :  { %v2760_v41 = vadd.f32 %v3025_v34, %v2759_v37  ;;  %v3422_v43 = vpop.f32.mrb[81].mxu0 }
0x2087   :  { %v2762_v44 = vpop.f32.mrb[82].mxu0 }
0x2088   :  { %v2766_v35 = vadd.f32 %v2760_v41, %v4357_v31  ;;  %v2763_v38 = vadd.f32 %v3025_v34, %v2762_v44  ;;  %v3423_v46 = vpop.f32.mrb[83].mxu0 }
0x208a   :  { %v2767_v45 = vadd.f32 %v2763_v38, %v4360_v39  ;;  %v2770_v47 = vsel %vm85_vm0, %v2766_v35, 0.0  ;;  %v3510_v39 = vld [vmem:[%s4489_s18] sm:$0xff]  }
0x208b   :  { %2771 = vadd.xlane.f32.xlu0 %v2770_v47  ;;  %3425 = vmatpush3.bf16.msra.mxu1 %v3510_v39 }
0x208c   :  { %v2773_v54 = vsel %vm85_vm0, %v2767_v45, 0.0  ;;  %3426 = vmatprep.subr.bf16.mxu1 %v3673_v18  ;;  %v3035_v18 = vld [vmem:[%s4488_s17] ss:$0 sm:$0xff]  ;;  %s3689_s17 = smov [#allocation6]  }
0x208d   :  { %2774 = vadd.xlane.f32.xlu1 %v2773_v54  ;;  %s2902_s27 = sshll.u32 %s3689_s17, 4  ;;  %s2903_s27 = int_to_ptr.vmem [resolvable:$true] %s2902_s27 }
0x208e   :  { %s3622_s21 = scalar_lea.vmem %s2903_s27, 256  ;;  %p3627_p4 = scmp.lt.s32.totalorder %s2903_s27, %s2903_s27 }
0x208f   :  { %3427 = vmatpush3.bf16.msra.mxu1 %v3511_v56  ;;  %p3623_p3 = scmp.ne.s32.totalorder %s2903_s27, %s3622_s21  ;;  %p3628_p5 = scmp.lt.s32.totalorder %s3622_s21, %s3622_s21 }
0x2091   :  { %p3629_p6 = por %p3628_p5, %p3627_p4 }
0x2093   :  { %p3630_p7 = pnand %p3629_p6, %p3623_p3 }
0x2118   :  { %v2772_v63 = vpop.xlane.xlu0 %2771 }
0x2119   :  { %v2776_v48 = vmul.f32 0.03125, %v2772_v63 }
0x211a   :  { %v2775_v50 = vpop.xlane.xlu1 %2774 }
0x211b   :  { %v2778_v36 = vsub.f32 %v2766_v35, %v2776_v48  ;;  %v2777_v52 = vmul.f32 0.03125, %v2775_v50 }
0x211d   :  { %v2779_v13 = vsub.f32 %v2767_v45, %v2777_v52  ;;  %v2780_v17 = vmul.f32 %v2778_v36, %v2778_v36 }
0x211f   :  { %v2782_v20 = vsel %vm85_vm0, %v2780_v17, 0.0  ;;  %v2781_v31 = vmul.f32 %v2779_v13, %v2779_v13 }
0x2120   :  { %2783 = vadd.xlane.f32.xlu0 %v2782_v20 }
0x2121   :  { %v2785_v55 = vsel %vm85_vm0, %v2781_v31, 0.0 }
0x2122   :  { %2786 = vadd.xlane.f32.xlu1 %v2785_v55 }
0x21ad   :  { %v2784_v57 = vpop.xlane.xlu0 %2783 }
0x21ae   :  { %v2788_v58 = vmul.f32 0.03125, %v2784_v57 }
0x21af   :  { %v2787_v59 = vpop.xlane.xlu1 %2786 }
0x21b0   :  { %v2790_v60 = vadd.f32 1e-05, %v2788_v58  ;;  %v2789_v3 = vmul.f32 0.03125, %v2787_v59 }
0x21b2   :  { %3608 = vrsqrt.f32 %v2790_v60  ;;  %v2791_v61 = vadd.f32 1e-05, %v2789_v3 }
0x21b4   :  { %3610 = vrsqrt.f32 %v2791_v61 }
0x21bc   :  { %v3609_v40 = vpop.eup %3608 }
0x21bd   :  { %v2794_v4 = vmul.f32 %v3609_v40, %v2778_v36 }
0x21be   :  { %v3611_v51 = vpop.eup %3610 }
0x21bf   :  { %v2802_v28 = vmul.f32 %v3034_v62, %v2794_v4  ;;  %v2795_v32 = vmul.f32 %v3611_v51, %v2779_v13 }
0x21c1   :  { %v2810_v33 = vadd.f32 %v3035_v18, %v2802_v28  ;;  %v2803_v0 = vmul.f32 %v3034_v62, %v2795_v32 }
0x21c3   :  { %2812 = vst.msk [vmem:[#allocation6] sm:$0xff] %vm85_vm0, %v2810_v33  ;;  %v2811_v49 = vadd.f32 %v3035_v18, %v2803_v0 }
0x21c5   :  { %2813 = vst.msk [vmem:[#allocation6 + $0x8] sm:$0xff] %vm85_vm0, %v2811_v49 }
0x21cc   :  { %v3037_v1 = vld [vmem:[%s2918_s11 + $0x8] sm:$0x1]  ;;  %v2816_v2 = vld [vmem:[%s2815_s16] sm:$0x1] }
0x21cd   :  { %v2822_v53 = vrot.slane %v3037_v1, 7 }
0x21cf   :  { %v2825_v5 = vsel %vm2824_vm10, %v2816_v2, %v2822_v53 }
0x21d0   :  { %v2826_v6 = vpack.c.bf16 %v2825_v5, %v2825_v5 }
0x21d2   :  { %3429 = vmatmul.mubr.msk.bf16.vlgmr.msra.gmra.mrb[76].mxu1 %vm85_vm0, %v2826_v6 }
0x21d3   :  { %3633 = shalt.err (!%p3630_p7)
}
0x21d4   :  { %s3634_s22 = scalar_lea.hbm %s4491_s20, 256 }
0x21d5   :  { %p3635_p8 = scmp.ne.s32.totalorder %s4491_s20, %s3634_s22  ;;  %p3638_p9 = scmp.lt.u32.totalorder %s3634_s22, %s4491_s20 }
0x21d7   :  { %p3640_p10 = pnand %p3638_p9, %p3635_p8 }
0x21d9   :  { %3643 = shalt.err (!%p3640_p10)
}
0x21da   :  { %s3690_s9 = smov 128   ;;  %s3691_s30 = smov [#allocation4]  }
0x21db   :  { %2908 = dma.vmem_to_hbm [thread:$0]  %s2903_s27, 256, %s4491_s20, [#allocation7], %s3690_s9, %s3690_s9, %s4521_s0  }
0x21dc   :  { %s2893_s14 = sshll.u32 %s3691_s30, 4  ;;  %s2894_s14 = int_to_ptr.vmem [resolvable:$true] %s2893_s14 }
0x21dd   :  { %s3644_s29 = scalar_lea.vmem %s2894_s14, 32  ;;  %p3649_p12 = scmp.lt.s32.totalorder %s2894_s14, %s2894_s14 }
0x21de   :  { %p3645_p11 = scmp.ne.s32.totalorder %s2894_s14, %s3644_s29  ;;  %p3650_p13 = scmp.lt.s32.totalorder %s3644_s29, %s3644_s29 }
0x21e0   :  { %p3651_p0 = por %p3650_p13, %p3649_p12 }
0x21e2   :  { %p3652_p1 = pnand %p3651_p0, %p3645_p11 }
0x22a5   :  { %v2880_v7 = vpop.f32.mrb[76].mxu1 }
0x22a6   :  { %2886 = vst [vmem:[#allocation4] sm:$0x3] %v2880_v7  ;;  %v3430_v8 = vpop.f32.mrb[77].mxu1 }
0x22a7   :  { %v2883_v9 = vpop.f32.mrb[78].mxu1 }
0x22a8   :  { %3655 = shalt.err (!%p3652_p1)
}
0x22a9   :  { %s3656_s28 = scalar_lea.hbm %s4490_s19, 32 }
0x22aa   :  { %p3657_p2 = scmp.ne.s32.totalorder %s4490_s19, %s3656_s28  ;;  %p3660_p3 = scmp.lt.u32.totalorder %s3656_s28, %s4490_s19 }
0x22ac   :  { %p3662_p4 = pnand %p3660_p3, %p3657_p2 }
0x22ae   :  { %3665 = shalt.err (!%p3662_p4)
}
0x22af   :  { %2896 = dma.vmem_to_hbm [thread:$0]  %s2894_s14, 32, %s4490_s19, [#allocation5]   ;;  %v3431_v10 = vpop.f32.mrb[79].mxu1 }
0x22b0   :  { %3668 = dma.done.wait [#allocation5], 32  }
0x22b1   :  { %3669 = vsyncadd [#allocation5], 4294967264 }
0x22b2   :  { %3670 = dma.done.wait [#allocation7], 256  }
0x22b3   :  { %3671 = vsyncadd [#allocation7], 4294967040 }
0x22b4   :  { %2915 = vsyncpa [#allocation5], 1 }
0x22b5   :  { %2916 = vsyncpa [#allocation7], 1 }

</bundles_post_ra>
